<compile_context>
chip_gen: v5e
topology: v5e:2x2
jax: 0.10.0
libtpu: 0.0.40
codegen_flags: <defaults>
</compile_context>

<pallas_src>
import functools

import jax
import jax.numpy as jnp
from jax import lax
from jax.experimental import pallas as pl
from jax.experimental.pallas import tpu as pltpu

BN_EPS = 1e-5
TILE_N_MAX = 1024                    # rows per grid step (multiple of 8)
FUSED_Y_MAX_BYTES = 8 * 1024 * 1024  # resident conv-output budget for the fused path
VMEM_LIMIT = 32 * 1024 * 1024        # scoped-VMEM budget, safe on v5e/v6e/v7x


def _round_up(x, m):
    return (x + m - 1) // m * m


# ---------------------------------------------------------------------------
# Fused kernel: conv-as-GEMM (bf16 x bf16 -> f32 on the MXU) + bias, BatchNorm
# statistics accumulation, and a finalize pass (BN normalize + affine
# [+ residual] [+ ReLU]) on the VMEM-resident output block at the last step.
# ---------------------------------------------------------------------------
def _fused_conv_bn_kernel(*refs, n_valid, tile_n, relu, has_res):
    if has_res:
        (patch_ref, w_ref, b_ref, g_ref, be_ref, res_ref, out_ref,
         sum_ref, sumsq_ref) = refs
    else:
        (patch_ref, w_ref, b_ref, g_ref, be_ref, out_ref,
         sum_ref, sumsq_ref) = refs
        res_ref = None

    i = pl.program_id(0)
    last = pl.num_programs(0) - 1

    @pl.when(i == 0)
    def _():
        sum_ref[...] = jnp.zeros_like(sum_ref)
        sumsq_ref[...] = jnp.zeros_like(sumsq_ref)

    # conv-as-GEMM, f32 accumulation on the MXU, + bias.
    y = jnp.dot(patch_ref[...], w_ref[...], preferred_element_type=jnp.float32)
    y = y + b_ref[...]

    # Stash the raw conv output tile into the VMEM-resident output block.
    row0 = pl.multiple_of(i * tile_n, tile_n)
    out_ref[pl.ds(row0, tile_n), :] = y

    # BN statistics.  Only the last tile can contain zero-padded rows, so the
    # validity mask (iota + 2 extra multiplies) only runs there.
    @pl.when(i < last)
    def _():
        sum_ref[...] += jnp.sum(y, axis=0, keepdims=True)
        sumsq_ref[...] += jnp.sum(y * y, axis=0, keepdims=True)

    @pl.when(i == last)
    def _():
        row = i * tile_n + lax.broadcasted_iota(jnp.int32, y.shape, 0)
        valid = (row < n_valid).astype(jnp.float32)
        yv = y * valid
        s = sum_ref[...] + jnp.sum(yv, axis=0, keepdims=True)
        ss = sumsq_ref[...] + jnp.sum(yv * yv, axis=0, keepdims=True)

        inv_n = 1.0 / float(n_valid)
        mean = s * inv_n
        var = jnp.maximum(ss * inv_n - mean * mean, 0.0)   # clamp: no NaN
        scale = g_ref[...] * lax.rsqrt(var + BN_EPS)       # EUP
        shift = be_ref[...] - mean * scale

        z = out_ref[...] * scale + shift
        if has_res:
            z = z + res_ref[...]
        if relu:
            z = jnp.maximum(z, 0.0)
        out_ref[...] = z


# ---------------------------------------------------------------------------
# Fallback (huge B*L_out only): two-phase path with bf16 intermediate y and
# BN scale/shift hoisted to (1,128) JAX glue between the two kernels.
# ---------------------------------------------------------------------------
def _conv_stats_kernel(patch_ref, w_ref, b_ref, y_ref, sum_ref, sumsq_ref, *,
                       n_valid, tile_n):
    i = pl.program_id(0)
    last = pl.num_programs(0) - 1

    @pl.when(i == 0)
    def _():
        sum_ref[...] = jnp.zeros_like(sum_ref)
        sumsq_ref[...] = jnp.zeros_like(sumsq_ref)

    y = jnp.dot(patch_ref[...], w_ref[...], preferred_element_type=jnp.float32)
    y = y + b_ref[...]
    y_ref[...] = y.astype(y_ref.dtype)       # bf16 writeback halves inter-phase HBM bytes

    @pl.when(i < last)
    def _():
        sum_ref[...] += jnp.sum(y, axis=0, keepdims=True)
        sumsq_ref[...] += jnp.sum(y * y, axis=0, keepdims=True)

    @pl.when(i == last)
    def _():
        row = i * tile_n + lax.broadcasted_iota(jnp.int32, y.shape, 0)
        valid = (row < n_valid).astype(jnp.float32)
        yv = y * valid
        sum_ref[...] += jnp.sum(yv, axis=0, keepdims=True)
        sumsq_ref[...] += jnp.sum(yv * yv, axis=0, keepdims=True)


def _bn_act_kernel(*refs, relu, has_res):
    if has_res:
        y_ref, res_ref, scale_ref, shift_ref, out_ref = refs
    else:
        y_ref, scale_ref, shift_ref, out_ref = refs
        res_ref = None
    z = y_ref[...].astype(jnp.float32) * scale_ref[...] + shift_ref[...]
    if has_res:
        z = z + res_ref[...]
    if relu:
        z = jnp.maximum(z, 0.0)
    out_ref[...] = z


# ---------------------------------------------------------------------------
# Fused Conv1d + BatchNorm1d (train-mode batch stats) [+ residual] [+ ReLU].
# x_nlc: (B, L, Cin) f32 channels-last.  weight: (Cout, Cin, K) PyTorch layout.
# Returns (B, L_out, Cout) f32.
# ---------------------------------------------------------------------------
def conv1d_bn_act(x_nlc, weight, bias, gamma, beta, *, stride, padding, dilation,
                  residual_nlc=None, relu=True):
    B, L, Cin = x_nlc.shape
    Cout, _, K = weight.shape

    # --- im2col glue (pure indexing in XLA); patches kept in bf16 ---
    x_pad = jnp.pad(x_nlc, ((0, 0), (padding, padding), (0, 0)))
    Lp = L + 2 * padding
    L_out = (Lp - dilation * (K - 1) - 1) // stride + 1
    assert L_out > 0

    idx = jnp.arange(L_out)[:, None] * stride + jnp.arange(K)[None, :] * dilation
    patches = x_pad[:, idx, :]                                 # (B, L_out, K, Cin)
    patches = patches.reshape(B * L_out, K * Cin).astype(jnp.bfloat16)
    w2d = jnp.transpose(weight, (2, 1, 0)).reshape(K * Cin, Cout).astype(jnp.bfloat16)

    N, CK = B * L_out, K * Cin
    CKp = _round_up(CK, 128)                                   # lane-aligned contraction dim
    tile_n = min(TILE_N_MAX, _round_up(N, 8))
    n_pad = _round_up(N, tile_n)

    patches = jnp.pad(patches, ((0, n_pad - N), (0, CKp - CK)))
    w2d = jnp.pad(w2d, ((0, CKp - CK), (0, 0)))
    b2d = bias.reshape(1, Cout).astype(jnp.float32)
    g2d = gamma.reshape(1, Cout).astype(jnp.float32)
    be2d = beta.reshape(1, Cout).astype(jnp.float32)

    has_res = residual_nlc is not None
    if has_res:
        res2d = residual_nlc.reshape(B * L_out, Cout).astype(jnp.float32)
        res2d = jnp.pad(res2d, ((0, n_pad - N), (0, 0)))

    grid = (n_pad // tile_n,)

    # ---------------- fused single-kernel path (activation stays on-chip) ----------------
    if n_pad * Cout * 4 <= FUSED_Y_MAX_BYTES:
        in_specs = [
            pl.BlockSpec((tile_n, CKp), lambda i: (i, 0)),
            pl.BlockSpec((CKp, Cout), lambda i: (0, 0)),       # weight stays VMEM-resident
            pl.BlockSpec((1, Cout), lambda i: (0, 0)),
            pl.BlockSpec((1, Cout), lambda i: (0, 0)),
            pl.BlockSpec((1, Cout), lambda i: (0, 0)),
        ]
        args = [patches, w2d, b2d, g2d, be2d]
        if has_res:
            in_specs.append(pl.BlockSpec((n_pad, Cout), lambda i: (0, 0)))  # resident
            args.append(res2d)

        out2d = pl.pallas_call(
            functools.partial(_fused_conv_bn_kernel, n_valid=N, tile_n=tile_n,
                              relu=relu, has_res=has_res),
            grid=grid,
            in_specs=in_specs,
            out_specs=pl.BlockSpec((n_pad, Cout), lambda i: (0, 0)),  # resident, lane-dense
            out_shape=jax.ShapeDtypeStruct((n_pad, Cout), jnp.float32),
            scratch_shapes=[pltpu.VMEM((1, Cout), jnp.float32),
                            pltpu.VMEM((1, Cout), jnp.float32)],
            compiler_params=pltpu.CompilerParams(
                dimension_semantics=("arbitrary",),            # resident output + stats
                vmem_limit_bytes=VMEM_LIMIT),
        )(*args)
        return out2d[:N].reshape(B, L_out, Cout)

    # ---------------- fallback: two-phase path (bf16 intermediate y) ----------------
    y, ch_sum, ch_sumsq = pl.pallas_call(
        functools.partial(_conv_stats_kernel, n_valid=N, tile_n=tile_n),
        grid=grid,
        in_specs=[
            pl.BlockSpec((tile_n, CKp), lambda i: (i, 0)),
            pl.BlockSpec((CKp, Cout), lambda i: (0, 0)),
            pl.BlockSpec((1, Cout), lambda i: (0, 0)),
        ],
        out_specs=(
            pl.BlockSpec((tile_n, Cout), lambda i: (i, 0)),
            pl.BlockSpec((1, Cout), lambda i: (0, 0)),
            pl.BlockSpec((1, Cout), lambda i: (0, 0)),
        ),
        out_shape=(
            jax.ShapeDtypeStruct((n_pad, Cout), jnp.bfloat16),
            jax.ShapeDtypeStruct((1, Cout), jnp.float32),
            jax.ShapeDtypeStruct((1, Cout), jnp.float32),
        ),
        compiler_params=pltpu.CompilerParams(
            dimension_semantics=("arbitrary",),
            vmem_limit_bytes=VMEM_LIMIT),
    )(patches, w2d, b2d)

    # Hoisted BN scale/shift: tiny (1,128) JAX glue, removes per-step rsqrt in phase 2.
    mean = ch_sum / float(N)
    var = jnp.maximum(ch_sumsq / float(N) - mean * mean, 0.0)
    scale = g2d * lax.rsqrt(var + BN_EPS)
    shift = be2d - mean * scale

    phase2_in = [y]
    in_specs = [pl.BlockSpec((tile_n, Cout), lambda i: (i, 0))]
    if has_res:
        phase2_in.append(res2d)
        in_specs.append(pl.BlockSpec((tile_n, Cout), lambda i: (i, 0)))
    phase2_in += [scale, shift]
    in_specs += [pl.BlockSpec((1, Cout), lambda i: (0, 0))] * 2

    out2d = pl.pallas_call(
        functools.partial(_bn_act_kernel, relu=relu, has_res=has_res),
        grid=grid,
        in_specs=in_specs,
        out_specs=pl.BlockSpec((tile_n, Cout), lambda i: (i, 0)),
        out_shape=jax.ShapeDtypeStruct((n_pad, Cout), jnp.float32),
        compiler_params=pltpu.CompilerParams(
            dimension_semantics=("parallel",),
            vmem_limit_bytes=VMEM_LIMIT),
    )(*phase2_in)

    return out2d[:N].reshape(B, L_out, Cout)


# ---------------------------------------------------------------------------
# Model blocks (channels-last internally).
# ---------------------------------------------------------------------------
def first_conv_block(x_nlc, p, *, size, stride):
    pad = size // 2
    # scale = Conv1d(dilation=2) -> BN -> ReLU ; outer ReLU is idempotent
    return conv1d_bn_act(x_nlc, p["w"], p["b"], p["g"], p["be"],
                         stride=stride, padding=pad, dilation=2, relu=True)


def conv_block(x_nlc, p, *, size, stride):
    pad = size // 2
    scaled = conv1d_bn_act(x_nlc, p["w1"], p["b1"], p["g1"], p["be1"],
                           stride=stride, padding=pad, dilation=2, relu=True)
    h = conv1d_bn_act(scaled, p["w2"], p["b2"], p["g2"], p["be2"],
                      stride=1, padding=pad, dilation=1, relu=True)
    out = conv1d_bn_act(h, p["w3"], p["b3"], p["g3"], p["be3"],
                        stride=1, padding=pad, dilation=1,
                        residual_nlc=scaled, relu=True)   # relu(BN(conv) + identity)
    return out


def avg_pool_nlc(x, k):
    B, L, C = x.shape
    n = L // k
    return jnp.mean(x[:, :n * k, :].reshape(B, n, k, C), axis=2)


@jax.jit
def my_model_forward(x_ncl, params):
    x = jnp.transpose(x_ncl, (0, 2, 1))                        # NCL -> NLC
    x = first_conv_block(x, params["block1"], size=20, stride=1)
    x = avg_pool_nlc(x, 20)
    # dropout1: identity (eval mode)
    x = conv_block(x, params["block2"], size=3, stride=2)
    x = avg_pool_nlc(x, 2)
    # dropout2: identity (eval mode)
    x = conv_block(x, params["block3"], size=3, stride=2)
    x = avg_pool_nlc(x, 2)
    feat = jnp.sum(x, axis=1)                                  # sum over length
    out = feat @ params["fc_w"].T + params["fc_b"]             # tiny Linear(128,1): JAX glue
    return out[:, 0]                                           # squeeze


# ---------------------------------------------------------------------------
# Plain-JAX reference (same bf16 conv operands, f32 accumulation) for self-check.
# ---------------------------------------------------------------------------
def _ref_conv_bn(x, w, b, g, be, *, stride, padding, dilation, relu, residual=None):
    y = lax.conv_general_dilated(
        x.astype(jnp.bfloat16), w.astype(jnp.bfloat16),
        window_strides=(stride,), padding=[(padding, padding)],
        rhs_dilation=(dilation,),
        dimension_numbers=("NCH", "OIH", "NCH"),
        preferred_element_type=jnp.float32) + b[None, :, None]
    mean = jnp.mean(y, axis=(0, 2), keepdims=True)
    var = jnp.mean((y - mean) ** 2, axis=(0, 2), keepdims=True)
    z = (y - mean) * lax.rsqrt(var + BN_EPS) * g[None, :, None] + be[None, :, None]
    if residual is not None:
        z = z + residual
    if relu:
        z = jnp.maximum(z, 0.0)
    return z


def _ref_model(x, p):
    def avgpool(x, k):
        B, C, L = x.shape
        n = L // k
        return jnp.mean(x[:, :, :n * k].reshape(B, C, n, k), axis=3)

    def convblock(x, q, stride):
        scaled = _ref_conv_bn(x, q["w1"], q["b1"], q["g1"], q["be1"],
                              stride=stride, padding=1, dilation=2, relu=True)
        h = _ref_conv_bn(scaled, q["w2"], q["b2"], q["g2"], q["be2"],
                         stride=1, padding=1, dilation=1, relu=True)
        return _ref_conv_bn(h, q["w3"], q["b3"], q["g3"], q["be3"],
                            stride=1, padding=1, dilation=1, relu=True, residual=scaled)

    q = p["block1"]
    x = _ref_conv_bn(x, q["w"], q["b"], q["g"], q["be"],
                     stride=1, padding=10, dilation=2, relu=True)
    x = avgpool(x, 20)
    x = convblock(x, p["block2"], 2)
    x = avgpool(x, 2)
    x = convblock(x, p["block3"], 2)
    x = avgpool(x, 2)
    feat = jnp.sum(x, axis=2)
    return (feat @ p["fc_w"].T + p["fc_b"])[:, 0]


if __name__ == "__main__":
    hidden_in, hidden = 4, 128
    B, L = 2, 512   # smallest input length the module supports is ~438 (stride/pool stages)

    key = jax.random.PRNGKey(0)
    keys = jax.random.split(key, 17)

    def conv_params(kw, kb, cout, cin, k):
        return {"w": jax.random.normal(kw, (cout, cin, k), jnp.float32) * 0.05,
                "b": jax.random.normal(kb, (cout,), jnp.float32) * 0.05,
                "g": jnp.ones((cout,), jnp.float32),     # BatchNorm1d default weight
                "be": jnp.zeros((cout,), jnp.float32)}   # BatchNorm1d default bias

    def block_params(ks, cin):
        c1 = conv_params(ks[0], ks[1], hidden, cin, 3)
        c2 = conv_params(ks[2], ks[3], hidden, hidden, 3)
        c3 = conv_params(ks[4], ks[5], hidden, hidden, 3)
        return {"w1": c1["w"], "b1": c1["b"], "g1": c1["g"], "be1": c1["be"],
                "w2": c2["w"], "b2": c2["b"], "g2": c2["g"], "be2": c2["be"],
                "w3": c3["w"], "b3": c3["b"], "g3": c3["g"], "be3": c3["be"]}

    params = {
        "block1": conv_params(keys[0], keys[1], hidden, hidden_in, 20),
        "block2": block_params(keys[2:8], hidden),
        "block3": block_params(keys[8:14], hidden),
        "fc_w": jax.random.normal(keys[14], (1, hidden), jnp.float32) * 0.05,
        "fc_b": jax.random.normal(keys[15], (1,), jnp.float32) * 0.05,
    }
    x = jax.random.normal(keys[16], (B, hidden_in, L), jnp.float32)

    out = my_model_forward(x, params)
    out = jax.block_until_ready(out)

    ref = _ref_model(x, params)
    assert out.shape == ref.shape == (B,), (out.shape, ref.shape)
    max_err = float(jnp.max(jnp.abs(out - ref)))
    assert jnp.allclose(out, ref, atol=2e-2, rtol=2e-2), max_err

    print("KERNEL_OK")
</pallas_src>

<mosaic_0001>
module attributes {stable_mosaic.version = 11 : i64} {
  func.func @_fused_conv_bn_kernel(%arg0: i32, %arg1: memref<992x128xbf16, #tpu.memory_space<vmem>>, %arg2: memref<128x128xbf16, #tpu.memory_space<vmem>>, %arg3: memref<1x128xf32, #tpu.memory_space<vmem>>, %arg4: memref<1x128xf32, #tpu.memory_space<vmem>>, %arg5: memref<1x128xf32, #tpu.memory_space<vmem>>, %arg6: memref<992x128xf32, #tpu.memory_space<vmem>>, %arg7: memref<1x128xf32, #tpu.memory_space<vmem>>, %arg8: memref<1x128xf32, #tpu.memory_space<vmem>>) attributes {dimension_semantics = [#tpu.dimension_semantics<arbitrary>], iteration_bounds = array<i64: 1>, scalar_prefetch = 0 : i64, scratch_operands = 2 : i64, tpu.core_type = #tpu.core_type<tc>, window_params = [{transform_indices = @transform_0, window_bounds = array<i64: 992, 128>}, {pipeline_mode = #tpu.pipeline_mode<synchronous>, transform_indices = @transform_1, window_bounds = array<i64: 128, 128>}, {pipeline_mode = #tpu.pipeline_mode<synchronous>, transform_indices = @transform_2, window_bounds = array<i64: 1, 128>}, {pipeline_mode = #tpu.pipeline_mode<synchronous>, transform_indices = @transform_3, window_bounds = array<i64: 1, 128>}, {pipeline_mode = #tpu.pipeline_mode<synchronous>, transform_indices = @transform_4, window_bounds = array<i64: 1, 128>}, {pipeline_mode = #tpu.pipeline_mode<synchronous>, transform_indices = @transform_5, window_bounds = array<i64: 992, 128>}]} {
    %c0_i32 = arith.constant 0 : i32
    %0 = arith.cmpi eq, %arg0, %c0_i32 : i32
    %1 = arith.extui %0 : i1 to i32
    %c0_i32_0 = arith.constant 0 : i32
    %2 = arith.cmpi ne, %1, %c0_i32_0 : i32
    scf.if %2 {
      %cst_11 = arith.constant 0.000000e+00 : f32
      %19 = vector.broadcast %cst_11 : f32 to vector<1x128xf32>
      %c0_12 = arith.constant 0 : index
      %c0_13 = arith.constant 0 : index
      %20 = vector.load %arg7[%c0_12, %c0_13] : memref<1x128xf32, #tpu.memory_space<vmem>>, vector<1x128xf32>
      tpu.vector_store %arg7[%c0_12, %c0_13], %19 {strides = array<i32>} : memref<1x128xf32, #tpu.memory_space<vmem>>, vector<1x128xf32>,
      %cst_14 = arith.constant 0.000000e+00 : f32
      %21 = vector.broadcast %cst_14 : f32 to vector<1x128xf32>
      %c0_15 = arith.constant 0 : index
      %c0_16 = arith.constant 0 : index
      %22 = vector.load %arg8[%c0_15, %c0_16] : memref<1x128xf32, #tpu.memory_space<vmem>>, vector<1x128xf32>
      tpu.vector_store %arg8[%c0_15, %c0_16], %21 {strides = array<i32>} : memref<1x128xf32, #tpu.memory_space<vmem>>, vector<1x128xf32>,
    } else {
    }
    %c0 = arith.constant 0 : index
    %c0_1 = arith.constant 0 : index
    %3 = vector.load %arg1[%c0, %c0_1] : memref<992x128xbf16, #tpu.memory_space<vmem>>, vector<992x128xbf16>
    %c0_2 = arith.constant 0 : index
    %c0_3 = arith.constant 0 : index
    %4 = vector.load %arg2[%c0_2, %c0_3] : memref<128x128xbf16, #tpu.memory_space<vmem>>, vector<128x128xbf16>
    %cst = arith.constant dense<0.000000e+00> : vector<992x128xf32>
    %5 = tpu.matmul %3, %4, %cst {dimension_numbers = #tpu.dot_dimension_numbers<[1], [0], [0], [1], [0, 0, 1, 1], [], []>} : vector<992x128xbf16>, vector<128x128xbf16>, vector<992x128xf32> -> vector<992x128xf32>
    %c0_4 = arith.constant 0 : index
    %c0_5 = arith.constant 0 : index
    %6 = vector.load %arg3[%c0_4, %c0_5] : memref<1x128xf32, #tpu.memory_space<vmem>>, vector<1x128xf32>
    %7 = vector.broadcast %6 : vector<1x128xf32> to vector<992x128xf32>
    %8 = arith.addf %5, %7 : vector<992x128xf32>
    %c992_i32 = arith.constant 992 : i32
    %9 = arith.muli %arg0, %c992_i32 : i32
    %10 = tpu.assume_multiple %9, 992 : i32
    %11 = arith.index_cast %10 : i32 to index
    %c0_6 = arith.constant 0 : index
    %12 = vector.load %arg6[%11, %c0_6] : memref<992x128xf32, #tpu.memory_space<vmem>>, vector<992x128xf32>
    tpu.vector_store %arg6[%11, %c0_6], %8 {strides = array<i32>} : memref<992x128xf32, #tpu.memory_space<vmem>>, vector<992x128xf32>,
    %c0_i32_7 = arith.constant 0 : i32
    %13 = arith.cmpi slt, %arg0, %c0_i32_7 : i32
    %14 = arith.extui %13 : i1 to i32
    %c0_i32_8 = arith.constant 0 : i32
    %15 = arith.cmpi ne, %14, %c0_i32_8 : i32
    scf.if %15 {
      %c0_11 = arith.constant 0 : index
      %c0_12 = arith.constant 0 : index
      %19 = vector.load %arg7[%c0_11, %c0_12] : memref<1x128xf32, #tpu.memory_space<vmem>>, vector<1x128xf32>
      %cst_13 = arith.constant dense<0.000000e+00> : vector<128xf32>
      %20 = vector.multi_reduction <add>, %8, %cst_13 [0] : vector<992x128xf32> to vector<128xf32>
      %21 = vector.shape_cast %20 : vector<128xf32> to vector<1x128xf32>
      %22 = arith.addf %19, %21 : vector<1x128xf32>
      %c0_14 = arith.constant 0 : index
      %c0_15 = arith.constant 0 : index
      %23 = vector.load %arg7[%c0_14, %c0_15] : memref<1x128xf32, #tpu.memory_space<vmem>>, vector<1x128xf32>
      tpu.vector_store %arg7[%c0_14, %c0_15], %22 {strides = array<i32>} : memref<1x128xf32, #tpu.memory_space<vmem>>, vector<1x128xf32>,
      %c0_16 = arith.constant 0 : index
      %c0_17 = arith.constant 0 : index
      %24 = vector.load %arg8[%c0_16, %c0_17] : memref<1x128xf32, #tpu.memory_space<vmem>>, vector<1x128xf32>
      %25 = arith.mulf %8, %8 : vector<992x128xf32>
      %cst_18 = arith.constant dense<0.000000e+00> : vector<128xf32>
      %26 = vector.multi_reduction <add>, %25, %cst_18 [0] : vector<992x128xf32> to vector<128xf32>
      %27 = vector.shape_cast %26 : vector<128xf32> to vector<1x128xf32>
      %28 = arith.addf %24, %27 : vector<1x128xf32>
      %c0_19 = arith.constant 0 : index
      %c0_20 = arith.constant 0 : index
      %29 = vector.load %arg8[%c0_19, %c0_20] : memref<1x128xf32, #tpu.memory_space<vmem>>, vector<1x128xf32>
      tpu.vector_store %arg8[%c0_19, %c0_20], %28 {strides = array<i32>} : memref<1x128xf32, #tpu.memory_space<vmem>>, vector<1x128xf32>,
    } else {
    }
    %c0_i32_9 = arith.constant 0 : i32
    %16 = arith.cmpi eq, %arg0, %c0_i32_9 : i32
    %17 = arith.extui %16 : i1 to i32
    %c0_i32_10 = arith.constant 0 : i32
    %18 = arith.cmpi ne, %17, %c0_i32_10 : i32
    scf.if %18 {
      %c992_i32_11 = arith.constant 992 : i32
      %19 = arith.muli %arg0, %c992_i32_11 : i32
      %20 = tpu.iota {dimensions = array<i32: 0>} : vector<992x128xi32>
      %21 = vector.broadcast %19 : i32 to vector<992x128xi32>
      %22 = arith.addi %21, %20 : vector<992x128xi32>
      %c988_i32 = arith.constant 988 : i32
      %23 = vector.broadcast %c988_i32 : i32 to vector<992x128xi32>
      %24 = arith.cmpi slt, %22, %23 : vector<992x128xi32>
      %25 = arith.extui %24 : vector<992x128xi1> to vector<992x128xi32>
      %26 = arith.sitofp %25 : vector<992x128xi32> to vector<992x128xf32>
      %27 = arith.mulf %8, %26 : vector<992x128xf32>
      %c0_12 = arith.constant 0 : index
      %c0_13 = arith.constant 0 : index
      %28 = vector.load %arg7[%c0_12, %c0_13] : memref<1x128xf32, #tpu.memory_space<vmem>>, vector<1x128xf32>
      %cst_14 = arith.constant dense<0.000000e+00> : vector<128xf32>
      %29 = vector.multi_reduction <add>, %27, %cst_14 [0] : vector<992x128xf32> to vector<128xf32>
      %30 = vector.shape_cast %29 : vector<128xf32> to vector<1x128xf32>
      %31 = arith.addf %28, %30 : vector<1x128xf32>
      %c0_15 = arith.constant 0 : index
      %c0_16 = arith.constant 0 : index
      %32 = vector.load %arg8[%c0_15, %c0_16] : memref<1x128xf32, #tpu.memory_space<vmem>>, vector<1x128xf32>
      %33 = arith.mulf %27, %27 : vector<992x128xf32>
      %cst_17 = arith.constant dense<0.000000e+00> : vector<128xf32>
      %34 = vector.multi_reduction <add>, %33, %cst_17 [0] : vector<992x128xf32> to vector<128xf32>
      %35 = vector.shape_cast %34 : vector<128xf32> to vector<1x128xf32>
      %36 = arith.addf %32, %35 : vector<1x128xf32>
      %cst_18 = arith.constant 0.00101214577 : f32
      %37 = vector.broadcast %cst_18 : f32 to vector<1x128xf32>
      %38 = arith.mulf %31, %37 : vector<1x128xf32>
      %cst_19 = arith.constant 0.00101214577 : f32
      %39 = vector.broadcast %cst_19 : f32 to vector<1x128xf32>
      %40 = arith.mulf %36, %39 : vector<1x128xf32>
      %41 = arith.mulf %38, %38 : vector<1x128xf32>
      %42 = arith.subf %40, %41 : vector<1x128xf32>
      %cst_20 = arith.constant 0.000000e+00 : f32
      %43 = vector.broadcast %cst_20 : f32 to vector<1x128xf32>
      %44 = arith.maximumf %42, %43 : vector<1x128xf32>
      %c0_21 = arith.constant 0 : index
      %c0_22 = arith.constant 0 : index
      %45 = vector.load %arg4[%c0_21, %c0_22] : memref<1x128xf32, #tpu.memory_space<vmem>>, vector<1x128xf32>
      %cst_23 = arith.constant 9.99999974E-6 : f32
      %46 = vector.broadcast %cst_23 : f32 to vector<1x128xf32>
      %47 = arith.addf %44, %46 : vector<1x128xf32>
      %48 = math.rsqrt %47 : vector<1x128xf32>
      %49 = arith.mulf %45, %48 : vector<1x128xf32>
      %c0_24 = arith.constant 0 : index
      %c0_25 = arith.constant 0 : index
      %50 = vector.load %arg5[%c0_24, %c0_25] : memref<1x128xf32, #tpu.memory_space<vmem>>, vector<1x128xf32>
      %51 = arith.mulf %38, %49 : vector<1x128xf32>
      %52 = arith.subf %50, %51 : vector<1x128xf32>
      %c0_26 = arith.constant 0 : index
      %c0_27 = arith.constant 0 : index
      %53 = vector.load %arg6[%c0_26, %c0_27] : memref<992x128xf32, #tpu.memory_space<vmem>>, vector<992x128xf32>
      %54 = vector.broadcast %49 : vector<1x128xf32> to vector<992x128xf32>
      %55 = arith.mulf %53, %54 : vector<992x128xf32>
      %56 = vector.broadcast %52 : vector<1x128xf32> to vector<992x128xf32>
      %57 = arith.addf %55, %56 : vector<992x128xf32>
      %cst_28 = arith.constant 0.000000e+00 : f32
      %58 = vector.broadcast %cst_28 : f32 to vector<992x128xf32>
      %59 = arith.maximumf %57, %58 : vector<992x128xf32>
      %c0_29 = arith.constant 0 : index
      %c0_30 = arith.constant 0 : index
      %60 = vector.load %arg6[%c0_29, %c0_30] : memref<992x128xf32, #tpu.memory_space<vmem>>, vector<992x128xf32>
      tpu.vector_store %arg6[%c0_29, %c0_30], %59 {strides = array<i32>} : memref<992x128xf32, #tpu.memory_space<vmem>>, vector<992x128xf32>,
    } else {
    }
    return
  }
  func.func @transform_0(%arg0: i32) -> (i32, i32) {
    %c0_i32 = arith.constant 0 : i32
    %c0_i32_0 = arith.constant 0 : i32
    return %arg0, %c0_i32 : i32, i32
  }
  func.func @transform_1(%arg0: i32) -> (i32, i32) {
    %c0_i32 = arith.constant 0 : i32
    %c0_i32_0 = arith.constant 0 : i32
    %c0_i32_1 = arith.constant 0 : i32
    return %c0_i32, %c0_i32_0 : i32, i32
  }
  func.func @transform_2(%arg0: i32) -> (i32, i32) {
    %c0_i32 = arith.constant 0 : i32
    %c0_i32_0 = arith.constant 0 : i32
    %c0_i32_1 = arith.constant 0 : i32
    return %c0_i32, %c0_i32_0 : i32, i32
  }
  func.func @transform_3(%arg0: i32) -> (i32, i32) {
    %c0_i32 = arith.constant 0 : i32
    %c0_i32_0 = arith.constant 0 : i32
    %c0_i32_1 = arith.constant 0 : i32
    return %c0_i32, %c0_i32_0 : i32, i32
  }
  func.func @transform_4(%arg0: i32) -> (i32, i32) {
    %c0_i32 = arith.constant 0 : i32
    %c0_i32_0 = arith.constant 0 : i32
    %c0_i32_1 = arith.constant 0 : i32
    return %c0_i32, %c0_i32_0 : i32, i32
  }
  func.func @transform_5(%arg0: i32) -> (i32, i32) {
    %c0_i32 = arith.constant 0 : i32
    %c0_i32_0 = arith.constant 0 : i32
    %c0_i32_1 = arith.constant 0 : i32
    return %c0_i32, %c0_i32_0 : i32, i32
  }
}

module attributes {stable_mosaic.version = 11 : i64} {
  func.func @_fused_conv_bn_kernel(%arg0: i32, %arg1: memref<24x384xbf16, #tpu.memory_space<vmem>>, %arg2: memref<384x128xbf16, #tpu.memory_space<vmem>>, %arg3: memref<1x128xf32, #tpu.memory_space<vmem>>, %arg4: memref<1x128xf32, #tpu.memory_space<vmem>>, %arg5: memref<1x128xf32, #tpu.memory_space<vmem>>, %arg6: memref<24x128xf32, #tpu.memory_space<vmem>>, %arg7: memref<1x128xf32, #tpu.memory_space<vmem>>, %arg8: memref<1x128xf32, #tpu.memory_space<vmem>>) attributes {dimension_semantics = [#tpu.dimension_semantics<arbitrary>], iteration_bounds = array<i64: 1>, scalar_prefetch = 0 : i64, scratch_operands = 2 : i64, tpu.core_type = #tpu.core_type<tc>, window_params = [{transform_indices = @transform_0, window_bounds = array<i64: 24, 384>}, {pipeline_mode = #tpu.pipeline_mode<synchronous>, transform_indices = @transform_1, window_bounds = array<i64: 384, 128>}, {pipeline_mode = #tpu.pipeline_mode<synchronous>, transform_indices = @transform_2, window_bounds = array<i64: 1, 128>}, {pipeline_mode = #tpu.pipeline_mode<synchronous>, transform_indices = @transform_3, window_bounds = array<i64: 1, 128>}, {pipeline_mode = #tpu.pipeline_mode<synchronous>, transform_indices = @transform_4, window_bounds = array<i64: 1, 128>}, {pipeline_mode = #tpu.pipeline_mode<synchronous>, transform_indices = @transform_5, window_bounds = array<i64: 24, 128>}]} {
    %c0_i32 = arith.constant 0 : i32
    %0 = arith.cmpi eq, %arg0, %c0_i32 : i32
    %1 = arith.extui %0 : i1 to i32
    %c0_i32_0 = arith.constant 0 : i32
    %2 = arith.cmpi ne, %1, %c0_i32_0 : i32
    scf.if %2 {
      %cst_11 = arith.constant 0.000000e+00 : f32
      %19 = vector.broadcast %cst_11 : f32 to vector<1x128xf32>
      %c0_12 = arith.constant 0 : index
      %c0_13 = arith.constant 0 : index
      %20 = vector.load %arg7[%c0_12, %c0_13] : memref<1x128xf32, #tpu.memory_space<vmem>>, vector<1x128xf32>
      tpu.vector_store %arg7[%c0_12, %c0_13], %19 {strides = array<i32>} : memref<1x128xf32, #tpu.memory_space<vmem>>, vector<1x128xf32>,
      %cst_14 = arith.constant 0.000000e+00 : f32
      %21 = vector.broadcast %cst_14 : f32 to vector<1x128xf32>
      %c0_15 = arith.constant 0 : index
      %c0_16 = arith.constant 0 : index
      %22 = vector.load %arg8[%c0_15, %c0_16] : memref<1x128xf32, #tpu.memory_space<vmem>>, vector<1x128xf32>
      tpu.vector_store %arg8[%c0_15, %c0_16], %21 {strides = array<i32>} : memref<1x128xf32, #tpu.memory_space<vmem>>, vector<1x128xf32>,
    } else {
    }
    %c0 = arith.constant 0 : index
    %c0_1 = arith.constant 0 : index
    %3 = vector.load %arg1[%c0, %c0_1] : memref<24x384xbf16, #tpu.memory_space<vmem>>, vector<24x384xbf16>
    %c0_2 = arith.constant 0 : index
    %c0_3 = arith.constant 0 : index
    %4 = vector.load %arg2[%c0_2, %c0_3] : memref<384x128xbf16, #tpu.memory_space<vmem>>, vector<384x128xbf16>
    %cst = arith.constant dense<0.000000e+00> : vector<24x128xf32>
    %5 = tpu.matmul %3, %4, %cst {dimension_numbers = #tpu.dot_dimension_numbers<[1], [0], [0], [1], [0, 0, 1, 1], [], []>} : vector<24x384xbf16>, vector<384x128xbf16>, vector<24x128xf32> -> vector<24x128xf32>
    %c0_4 = arith.constant 0 : index
    %c0_5 = arith.constant 0 : index
    %6 = vector.load %arg3[%c0_4, %c0_5] : memref<1x128xf32, #tpu.memory_space<vmem>>, vector<1x128xf32>
    %7 = vector.broadcast %6 : vector<1x128xf32> to vector<24x128xf32>
    %8 = arith.addf %5, %7 : vector<24x128xf32>
    %c24_i32 = arith.constant 24 : i32
    %9 = arith.muli %arg0, %c24_i32 : i32
    %10 = tpu.assume_multiple %9, 24 : i32
    %11 = arith.index_cast %10 : i32 to index
    %c0_6 = arith.constant 0 : index
    %12 = vector.load %arg6[%11, %c0_6] : memref<24x128xf32, #tpu.memory_space<vmem>>, vector<24x128xf32>
    tpu.vector_store %arg6[%11, %c0_6], %8 {strides = array<i32>} : memref<24x128xf32, #tpu.memory_space<vmem>>, vector<24x128xf32>,
    %c0_i32_7 = arith.constant 0 : i32
    %13 = arith.cmpi slt, %arg0, %c0_i32_7 : i32
    %14 = arith.extui %13 : i1 to i32
    %c0_i32_8 = arith.constant 0 : i32
    %15 = arith.cmpi ne, %14, %c0_i32_8 : i32
    scf.if %15 {
      %c0_11 = arith.constant 0 : index
      %c0_12 = arith.constant 0 : index
      %19 = vector.load %arg7[%c0_11, %c0_12] : memref<1x128xf32, #tpu.memory_space<vmem>>, vector<1x128xf32>
      %cst_13 = arith.constant dense<0.000000e+00> : vector<128xf32>
      %20 = vector.multi_reduction <add>, %8, %cst_13 [0] : vector<24x128xf32> to vector<128xf32>
      %21 = vector.shape_cast %20 : vector<128xf32> to vector<1x128xf32>
      %22 = arith.addf %19, %21 : vector<1x128xf32>
      %c0_14 = arith.constant 0 : index
      %c0_15 = arith.constant 0 : index
      %23 = vector.load %arg7[%c0_14, %c0_15] : memref<1x128xf32, #tpu.memory_space<vmem>>, vector<1x128xf32>
      tpu.vector_store %arg7[%c0_14, %c0_15], %22 {strides = array<i32>} : memref<1x128xf32, #tpu.memory_space<vmem>>, vector<1x128xf32>,
      %c0_16 = arith.constant 0 : index
      %c0_17 = arith.constant 0 : index
      %24 = vector.load %arg8[%c0_16, %c0_17] : memref<1x128xf32, #tpu.memory_space<vmem>>, vector<1x128xf32>
      %25 = arith.mulf %8, %8 : vector<24x128xf32>
      %cst_18 = arith.constant dense<0.000000e+00> : vector<128xf32>
      %26 = vector.multi_reduction <add>, %25, %cst_18 [0] : vector<24x128xf32> to vector<128xf32>
      %27 = vector.shape_cast %26 : vector<128xf32> to vector<1x128xf32>
      %28 = arith.addf %24, %27 : vector<1x128xf32>
      %c0_19 = arith.constant 0 : index
      %c0_20 = arith.constant 0 : index
      %29 = vector.load %arg8[%c0_19, %c0_20] : memref<1x128xf32, #tpu.memory_space<vmem>>, vector<1x128xf32>
      tpu.vector_store %arg8[%c0_19, %c0_20], %28 {strides = array<i32>} : memref<1x128xf32, #tpu.memory_space<vmem>>, vector<1x128xf32>,
    } else {
    }
    %c0_i32_9 = arith.constant 0 : i32
    %16 = arith.cmpi eq, %arg0, %c0_i32_9 : i32
    %17 = arith.extui %16 : i1 to i32
    %c0_i32_10 = arith.constant 0 : i32
    %18 = arith.cmpi ne, %17, %c0_i32_10 : i32
    scf.if %18 {
      %c24_i32_11 = arith.constant 24 : i32
      %19 = arith.muli %arg0, %c24_i32_11 : i32
      %20 = tpu.iota {dimensions = array<i32: 0>} : vector<24x128xi32>
      %21 = vector.broadcast %19 : i32 to vector<24x128xi32>
      %22 = arith.addi %21, %20 : vector<24x128xi32>
      %c22_i32 = arith.constant 22 : i32
      %23 = vector.broadcast %c22_i32 : i32 to vector<24x128xi32>
      %24 = arith.cmpi slt, %22, %23 : vector<24x128xi32>
      %25 = arith.extui %24 : vector<24x128xi1> to vector<24x128xi32>
      %26 = arith.sitofp %25 : vector<24x128xi32> to vector<24x128xf32>
      %27 = arith.mulf %8, %26 : vector<24x128xf32>
      %c0_12 = arith.constant 0 : index
      %c0_13 = arith.constant 0 : index
      %28 = vector.load %arg7[%c0_12, %c0_13] : memref<1x128xf32, #tpu.memory_space<vmem>>, vector<1x128xf32>
      %cst_14 = arith.constant dense<0.000000e+00> : vector<128xf32>
      %29 = vector.multi_reduction <add>, %27, %cst_14 [0] : vector<24x128xf32> to vector<128xf32>
      %30 = vector.shape_cast %29 : vector<128xf32> to vector<1x128xf32>
      %31 = arith.addf %28, %30 : vector<1x128xf32>
      %c0_15 = arith.constant 0 : index
      %c0_16 = arith.constant 0 : index
      %32 = vector.load %arg8[%c0_15, %c0_16] : memref<1x128xf32, #tpu.memory_space<vmem>>, vector<1x128xf32>
      %33 = arith.mulf %27, %27 : vector<24x128xf32>
      %cst_17 = arith.constant dense<0.000000e+00> : vector<128xf32>
      %34 = vector.multi_reduction <add>, %33, %cst_17 [0] : vector<24x128xf32> to vector<128xf32>
      %35 = vector.shape_cast %34 : vector<128xf32> to vector<1x128xf32>
      %36 = arith.addf %32, %35 : vector<1x128xf32>
      %cst_18 = arith.constant 0.0454545468 : f32
      %37 = vector.broadcast %cst_18 : f32 to vector<1x128xf32>
      %38 = arith.mulf %31, %37 : vector<1x128xf32>
      %cst_19 = arith.constant 0.0454545468 : f32
      %39 = vector.broadcast %cst_19 : f32 to vector<1x128xf32>
      %40 = arith.mulf %36, %39 : vector<1x128xf32>
      %41 = arith.mulf %38, %38 : vector<1x128xf32>
      %42 = arith.subf %40, %41 : vector<1x128xf32>
      %cst_20 = arith.constant 0.000000e+00 : f32
      %43 = vector.broadcast %cst_20 : f32 to vector<1x128xf32>
      %44 = arith.maximumf %42, %43 : vector<1x128xf32>
      %c0_21 = arith.constant 0 : index
      %c0_22 = arith.constant 0 : index
      %45 = vector.load %arg4[%c0_21, %c0_22] : memref<1x128xf32, #tpu.memory_space<vmem>>, vector<1x128xf32>
      %cst_23 = arith.constant 9.99999974E-6 : f32
      %46 = vector.broadcast %cst_23 : f32 to vector<1x128xf32>
      %47 = arith.addf %44, %46 : vector<1x128xf32>
      %48 = math.rsqrt %47 : vector<1x128xf32>
      %49 = arith.mulf %45, %48 : vector<1x128xf32>
      %c0_24 = arith.constant 0 : index
      %c0_25 = arith.constant 0 : index
      %50 = vector.load %arg5[%c0_24, %c0_25] : memref<1x128xf32, #tpu.memory_space<vmem>>, vector<1x128xf32>
      %51 = arith.mulf %38, %49 : vector<1x128xf32>
      %52 = arith.subf %50, %51 : vector<1x128xf32>
      %c0_26 = arith.constant 0 : index
      %c0_27 = arith.constant 0 : index
      %53 = vector.load %arg6[%c0_26, %c0_27] : memref<24x128xf32, #tpu.memory_space<vmem>>, vector<24x128xf32>
      %54 = vector.broadcast %49 : vector<1x128xf32> to vector<24x128xf32>
      %55 = arith.mulf %53, %54 : vector<24x128xf32>
      %56 = vector.broadcast %52 : vector<1x128xf32> to vector<24x128xf32>
      %57 = arith.addf %55, %56 : vector<24x128xf32>
      %cst_28 = arith.constant 0.000000e+00 : f32
      %58 = vector.broadcast %cst_28 : f32 to vector<24x128xf32>
      %59 = arith.maximumf %57, %58 : vector<24x128xf32>
      %c0_29 = arith.constant 0 : index
      %c0_30 = arith.constant 0 : index
      %60 = vector.load %arg6[%c0_29, %c0_30] : memref<24x128xf32, #tpu.memory_space<vmem>>, vector<24x128xf32>
      tpu.vector_store %arg6[%c0_29, %c0_30], %59 {strides = array<i32>} : memref<24x128xf32, #tpu.memory_space<vmem>>, vector<24x128xf32>,
    } else {
    }
    return
  }
  func.func @transform_0(%arg0: i32) -> (i32, i32) {
    %c0_i32 = arith.constant 0 : i32
    %c0_i32_0 = arith.constant 0 : i32
    return %arg0, %c0_i32 : i32, i32
  }
  func.func @transform_1(%arg0: i32) -> (i32, i32) {
    %c0_i32 = arith.constant 0 : i32
    %c0_i32_0 = arith.constant 0 : i32
    %c0_i32_1 = arith.constant 0 : i32
    return %c0_i32, %c0_i32_0 : i32, i32
  }
  func.func @transform_2(%arg0: i32) -> (i32, i32) {
    %c0_i32 = arith.constant 0 : i32
    %c0_i32_0 = arith.constant 0 : i32
    %c0_i32_1 = arith.constant 0 : i32
    return %c0_i32, %c0_i32_0 : i32, i32
  }
  func.func @transform_3(%arg0: i32) -> (i32, i32) {
    %c0_i32 = arith.constant 0 : i32
    %c0_i32_0 = arith.constant 0 : i32
    %c0_i32_1 = arith.constant 0 : i32
    return %c0_i32, %c0_i32_0 : i32, i32
  }
  func.func @transform_4(%arg0: i32) -> (i32, i32) {
    %c0_i32 = arith.constant 0 : i32
    %c0_i32_0 = arith.constant 0 : i32
    %c0_i32_1 = arith.constant 0 : i32
    return %c0_i32, %c0_i32_0 : i32, i32
  }
  func.func @transform_5(%arg0: i32) -> (i32, i32) {
    %c0_i32 = arith.constant 0 : i32
    %c0_i32_0 = arith.constant 0 : i32
    %c0_i32_1 = arith.constant 0 : i32
    return %c0_i32, %c0_i32_0 : i32, i32
  }
}

module attributes {stable_mosaic.version = 11 : i64} {
  func.func @_fused_conv_bn_kernel(%arg0: i32, %arg1: memref<24x384xbf16, #tpu.memory_space<vmem>>, %arg2: memref<384x128xbf16, #tpu.memory_space<vmem>>, %arg3: memref<1x128xf32, #tpu.memory_space<vmem>>, %arg4: memref<1x128xf32, #tpu.memory_space<vmem>>, %arg5: memref<1x128xf32, #tpu.memory_space<vmem>>, %arg6: memref<24x128xf32, #tpu.memory_space<vmem>>, %arg7: memref<24x128xf32, #tpu.memory_space<vmem>>, %arg8: memref<1x128xf32, #tpu.memory_space<vmem>>, %arg9: memref<1x128xf32, #tpu.memory_space<vmem>>) attributes {dimension_semantics = [#tpu.dimension_semantics<arbitrary>], iteration_bounds = array<i64: 1>, scalar_prefetch = 0 : i64, scratch_operands = 2 : i64, tpu.core_type = #tpu.core_type<tc>, window_params = [{transform_indices = @transform_0, window_bounds = array<i64: 24, 384>}, {pipeline_mode = #tpu.pipeline_mode<synchronous>, transform_indices = @transform_1, window_bounds = array<i64: 384, 128>}, {pipeline_mode = #tpu.pipeline_mode<synchronous>, transform_indices = @transform_2, window_bounds = array<i64: 1, 128>}, {pipeline_mode = #tpu.pipeline_mode<synchronous>, transform_indices = @transform_3, window_bounds = array<i64: 1, 128>}, {pipeline_mode = #tpu.pipeline_mode<synchronous>, transform_indices = @transform_4, window_bounds = array<i64: 1, 128>}, {pipeline_mode = #tpu.pipeline_mode<synchronous>, transform_indices = @transform_5, window_bounds = array<i64: 24, 128>}, {pipeline_mode = #tpu.pipeline_mode<synchronous>, transform_indices = @transform_6, window_bounds = array<i64: 24, 128>}]} {
    %c0_i32 = arith.constant 0 : i32
    %0 = arith.cmpi eq, %arg0, %c0_i32 : i32
    %1 = arith.extui %0 : i1 to i32
    %c0_i32_0 = arith.constant 0 : i32
    %2 = arith.cmpi ne, %1, %c0_i32_0 : i32
    scf.if %2 {
      %cst_11 = arith.constant 0.000000e+00 : f32
      %19 = vector.broadcast %cst_11 : f32 to vector<1x128xf32>
      %c0_12 = arith.constant 0 : index
      %c0_13 = arith.constant 0 : index
      %20 = vector.load %arg8[%c0_12, %c0_13] : memref<1x128xf32, #tpu.memory_space<vmem>>, vector<1x128xf32>
      tpu.vector_store %arg8[%c0_12, %c0_13], %19 {strides = array<i32>} : memref<1x128xf32, #tpu.memory_space<vmem>>, vector<1x128xf32>,
      %cst_14 = arith.constant 0.000000e+00 : f32
      %21 = vector.broadcast %cst_14 : f32 to vector<1x128xf32>
      %c0_15 = arith.constant 0 : index
      %c0_16 = arith.constant 0 : index
      %22 = vector.load %arg9[%c0_15, %c0_16] : memref<1x128xf32, #tpu.memory_space<vmem>>, vector<1x128xf32>
      tpu.vector_store %arg9[%c0_15, %c0_16], %21 {strides = array<i32>} : memref<1x128xf32, #tpu.memory_space<vmem>>, vector<1x128xf32>,
    } else {
    }
    %c0 = arith.constant 0 : index
    %c0_1 = arith.constant 0 : index
    %3 = vector.load %arg1[%c0, %c0_1] : memref<24x384xbf16, #tpu.memory_space<vmem>>, vector<24x384xbf16>
    %c0_2 = arith.constant 0 : index
    %c0_3 = arith.constant 0 : index
    %4 = vector.load %arg2[%c0_2, %c0_3] : memref<384x128xbf16, #tpu.memory_space<vmem>>, vector<384x128xbf16>
    %cst = arith.constant dense<0.000000e+00> : vector<24x128xf32>
    %5 = tpu.matmul %3, %4, %cst {dimension_numbers = #tpu.dot_dimension_numbers<[1], [0], [0], [1], [0, 0, 1, 1], [], []>} : vector<24x384xbf16>, vector<384x128xbf16>, vector<24x128xf32> -> vector<24x128xf32>
    %c0_4 = arith.constant 0 : index
    %c0_5 = arith.constant 0 : index
    %6 = vector.load %arg3[%c0_4, %c0_5] : memref<1x128xf32, #tpu.memory_space<vmem>>, vector<1x128xf32>
    %7 = vector.broadcast %6 : vector<1x128xf32> to vector<24x128xf32>
    %8 = arith.addf %5, %7 : vector<24x128xf32>
    %c24_i32 = arith.constant 24 : i32
    %9 = arith.muli %arg0, %c24_i32 : i32
    %10 = tpu.assume_multiple %9, 24 : i32
    %11 = arith.index_cast %10 : i32 to index
    %c0_6 = arith.constant 0 : index
    %12 = vector.load %arg7[%11, %c0_6] : memref<24x128xf32, #tpu.memory_space<vmem>>, vector<24x128xf32>
    tpu.vector_store %arg7[%11, %c0_6], %8 {strides = array<i32>} : memref<24x128xf32, #tpu.memory_space<vmem>>, vector<24x128xf32>,
    %c0_i32_7 = arith.constant 0 : i32
    %13 = arith.cmpi slt, %arg0, %c0_i32_7 : i32
    %14 = arith.extui %13 : i1 to i32
    %c0_i32_8 = arith.constant 0 : i32
    %15 = arith.cmpi ne, %14, %c0_i32_8 : i32
    scf.if %15 {
      %c0_11 = arith.constant 0 : index
      %c0_12 = arith.constant 0 : index
      %19 = vector.load %arg8[%c0_11, %c0_12] : memref<1x128xf32, #tpu.memory_space<vmem>>, vector<1x128xf32>
      %cst_13 = arith.constant dense<0.000000e+00> : vector<128xf32>
      %20 = vector.multi_reduction <add>, %8, %cst_13 [0] : vector<24x128xf32> to vector<128xf32>
      %21 = vector.shape_cast %20 : vector<128xf32> to vector<1x128xf32>
      %22 = arith.addf %19, %21 : vector<1x128xf32>
      %c0_14 = arith.constant 0 : index
      %c0_15 = arith.constant 0 : index
      %23 = vector.load %arg8[%c0_14, %c0_15] : memref<1x128xf32, #tpu.memory_space<vmem>>, vector<1x128xf32>
      tpu.vector_store %arg8[%c0_14, %c0_15], %22 {strides = array<i32>} : memref<1x128xf32, #tpu.memory_space<vmem>>, vector<1x128xf32>,
      %c0_16 = arith.constant 0 : index
      %c0_17 = arith.constant 0 : index
      %24 = vector.load %arg9[%c0_16, %c0_17] : memref<1x128xf32, #tpu.memory_space<vmem>>, vector<1x128xf32>
      %25 = arith.mulf %8, %8 : vector<24x128xf32>
      %cst_18 = arith.constant dense<0.000000e+00> : vector<128xf32>
      %26 = vector.multi_reduction <add>, %25, %cst_18 [0] : vector<24x128xf32> to vector<128xf32>
      %27 = vector.shape_cast %26 : vector<128xf32> to vector<1x128xf32>
      %28 = arith.addf %24, %27 : vector<1x128xf32>
      %c0_19 = arith.constant 0 : index
      %c0_20 = arith.constant 0 : index
      %29 = vector.load %arg9[%c0_19, %c0_20] : memref<1x128xf32, #tpu.memory_space<vmem>>, vector<1x128xf32>
      tpu.vector_store %arg9[%c0_19, %c0_20], %28 {strides = array<i32>} : memref<1x128xf32, #tpu.memory_space<vmem>>, vector<1x128xf32>,
    } else {
    }
    %c0_i32_9 = arith.constant 0 : i32
    %16 = arith.cmpi eq, %arg0, %c0_i32_9 : i32
    %17 = arith.extui %16 : i1 to i32
    %c0_i32_10 = arith.constant 0 : i32
    %18 = arith.cmpi ne, %17, %c0_i32_10 : i32
    scf.if %18 {
      %c24_i32_11 = arith.constant 24 : i32
      %19 = arith.muli %arg0, %c24_i32_11 : i32
      %20 = tpu.iota {dimensions = array<i32: 0>} : vector<24x128xi32>
      %21 = vector.broadcast %19 : i32 to vector<24x128xi32>
      %22 = arith.addi %21, %20 : vector<24x128xi32>
      %c22_i32 = arith.constant 22 : i32
      %23 = vector.broadcast %c22_i32 : i32 to vector<24x128xi32>
      %24 = arith.cmpi slt, %22, %23 : vector<24x128xi32>
      %25 = arith.extui %24 : vector<24x128xi1> to vector<24x128xi32>
      %26 = arith.sitofp %25 : vector<24x128xi32> to vector<24x128xf32>
      %27 = arith.mulf %8, %26 : vector<24x128xf32>
      %c0_12 = arith.constant 0 : index
      %c0_13 = arith.constant 0 : index
      %28 = vector.load %arg8[%c0_12, %c0_13] : memref<1x128xf32, #tpu.memory_space<vmem>>, vector<1x128xf32>
      %cst_14 = arith.constant dense<0.000000e+00> : vector<128xf32>
      %29 = vector.multi_reduction <add>, %27, %cst_14 [0] : vector<24x128xf32> to vector<128xf32>
      %30 = vector.shape_cast %29 : vector<128xf32> to vector<1x128xf32>
      %31 = arith.addf %28, %30 : vector<1x128xf32>
      %c0_15 = arith.constant 0 : index
      %c0_16 = arith.constant 0 : index
      %32 = vector.load %arg9[%c0_15, %c0_16] : memref<1x128xf32, #tpu.memory_space<vmem>>, vector<1x128xf32>
      %33 = arith.mulf %27, %27 : vector<24x128xf32>
      %cst_17 = arith.constant dense<0.000000e+00> : vector<128xf32>
      %34 = vector.multi_reduction <add>, %33, %cst_17 [0] : vector<24x128xf32> to vector<128xf32>
      %35 = vector.shape_cast %34 : vector<128xf32> to vector<1x128xf32>
      %36 = arith.addf %32, %35 : vector<1x128xf32>
      %cst_18 = arith.constant 0.0454545468 : f32
      %37 = vector.broadcast %cst_18 : f32 to vector<1x128xf32>
      %38 = arith.mulf %31, %37 : vector<1x128xf32>
      %cst_19 = arith.constant 0.0454545468 : f32
      %39 = vector.broadcast %cst_19 : f32 to vector<1x128xf32>
      %40 = arith.mulf %36, %39 : vector<1x128xf32>
      %41 = arith.mulf %38, %38 : vector<1x128xf32>
      %42 = arith.subf %40, %41 : vector<1x128xf32>
      %cst_20 = arith.constant 0.000000e+00 : f32
      %43 = vector.broadcast %cst_20 : f32 to vector<1x128xf32>
      %44 = arith.maximumf %42, %43 : vector<1x128xf32>
      %c0_21 = arith.constant 0 : index
      %c0_22 = arith.constant 0 : index
      %45 = vector.load %arg4[%c0_21, %c0_22] : memref<1x128xf32, #tpu.memory_space<vmem>>, vector<1x128xf32>
      %cst_23 = arith.constant 9.99999974E-6 : f32
      %46 = vector.broadcast %cst_23 : f32 to vector<1x128xf32>
      %47 = arith.addf %44, %46 : vector<1x128xf32>
      %48 = math.rsqrt %47 : vector<1x128xf32>
      %49 = arith.mulf %45, %48 : vector<1x128xf32>
      %c0_24 = arith.constant 0 : index
      %c0_25 = arith.constant 0 : index
      %50 = vector.load %arg5[%c0_24, %c0_25] : memref<1x128xf32, #tpu.memory_space<vmem>>, vector<1x128xf32>
      %51 = arith.mulf %38, %49 : vector<1x128xf32>
      %52 = arith.subf %50, %51 : vector<1x128xf32>
      %c0_26 = arith.constant 0 : index
      %c0_27 = arith.constant 0 : index
      %53 = vector.load %arg7[%c0_26, %c0_27] : memref<24x128xf32, #tpu.memory_space<vmem>>, vector<24x128xf32>
      %54 = vector.broadcast %49 : vector<1x128xf32> to vector<24x128xf32>
      %55 = arith.mulf %53, %54 : vector<24x128xf32>
      %56 = vector.broadcast %52 : vector<1x128xf32> to vector<24x128xf32>
      %57 = arith.addf %55, %56 : vector<24x128xf32>
      %c0_28 = arith.constant 0 : index
      %c0_29 = arith.constant 0 : index
      %58 = vector.load %arg6[%c0_28, %c0_29] : memref<24x128xf32, #tpu.memory_space<vmem>>, vector<24x128xf32>
      %59 = arith.addf %57, %58 : vector<24x128xf32>
      %cst_30 = arith.constant 0.000000e+00 : f32
      %60 = vector.broadcast %cst_30 : f32 to vector<24x128xf32>
      %61 = arith.maximumf %59, %60 : vector<24x128xf32>
      %c0_31 = arith.constant 0 : index
      %c0_32 = arith.constant 0 : index
      %62 = vector.load %arg7[%c0_31, %c0_32] : memref<24x128xf32, #tpu.memory_space<vmem>>, vector<24x128xf32>
      tpu.vector_store %arg7[%c0_31, %c0_32], %61 {strides = array<i32>} : memref<24x128xf32, #tpu.memory_space<vmem>>, vector<24x128xf32>,
    } else {
    }
    return
  }
  func.func @transform_0(%arg0: i32) -> (i32, i32) {
    %c0_i32 = arith.constant 0 : i32
    %c0_i32_0 = arith.constant 0 : i32
    return %arg0, %c0_i32 : i32, i32
  }
  func.func @transform_1(%arg0: i32) -> (i32, i32) {
    %c0_i32 = arith.constant 0 : i32
    %c0_i32_0 = arith.constant 0 : i32
    %c0_i32_1 = arith.constant 0 : i32
    return %c0_i32, %c0_i32_0 : i32, i32
  }
  func.func @transform_2(%arg0: i32) -> (i32, i32) {
    %c0_i32 = arith.constant 0 : i32
    %c0_i32_0 = arith.constant 0 : i32
    %c0_i32_1 = arith.constant 0 : i32
    return %c0_i32, %c0_i32_0 : i32, i32
  }
  func.func @transform_3(%arg0: i32) -> (i32, i32) {
    %c0_i32 = arith.constant 0 : i32
    %c0_i32_0 = arith.constant 0 : i32
    %c0_i32_1 = arith.constant 0 : i32
    return %c0_i32, %c0_i32_0 : i32, i32
  }
  func.func @transform_4(%arg0: i32) -> (i32, i32) {
    %c0_i32 = arith.constant 0 : i32
    %c0_i32_0 = arith.constant 0 : i32
    %c0_i32_1 = arith.constant 0 : i32
    return %c0_i32, %c0_i32_0 : i32, i32
  }
  func.func @transform_5(%arg0: i32) -> (i32, i32) {
    %c0_i32 = arith.constant 0 : i32
    %c0_i32_0 = arith.constant 0 : i32
    %c0_i32_1 = arith.constant 0 : i32
    return %c0_i32, %c0_i32_0 : i32, i32
  }
  func.func @transform_6(%arg0: i32) -> (i32, i32) {
    %c0_i32 = arith.constant 0 : i32
    %c0_i32_0 = arith.constant 0 : i32
    %c0_i32_1 = arith.constant 0 : i32
    return %c0_i32, %c0_i32_0 : i32, i32
  }
}

module attributes {stable_mosaic.version = 11 : i64} {
  func.func @_fused_conv_bn_kernel(%arg0: i32, %arg1: memref<8x384xbf16, #tpu.memory_space<vmem>>, %arg2: memref<384x128xbf16, #tpu.memory_space<vmem>>, %arg3: memref<1x128xf32, #tpu.memory_space<vmem>>, %arg4: memref<1x128xf32, #tpu.memory_space<vmem>>, %arg5: memref<1x128xf32, #tpu.memory_space<vmem>>, %arg6: memref<8x128xf32, #tpu.memory_space<vmem>>, %arg7: memref<1x128xf32, #tpu.memory_space<vmem>>, %arg8: memref<1x128xf32, #tpu.memory_space<vmem>>) attributes {dimension_semantics = [#tpu.dimension_semantics<arbitrary>], iteration_bounds = array<i64: 1>, scalar_prefetch = 0 : i64, scratch_operands = 2 : i64, tpu.core_type = #tpu.core_type<tc>, window_params = [{transform_indices = @transform_0, window_bounds = array<i64: 8, 384>}, {pipeline_mode = #tpu.pipeline_mode<synchronous>, transform_indices = @transform_1, window_bounds = array<i64: 384, 128>}, {pipeline_mode = #tpu.pipeline_mode<synchronous>, transform_indices = @transform_2, window_bounds = array<i64: 1, 128>}, {pipeline_mode = #tpu.pipeline_mode<synchronous>, transform_indices = @transform_3, window_bounds = array<i64: 1, 128>}, {pipeline_mode = #tpu.pipeline_mode<synchronous>, transform_indices = @transform_4, window_bounds = array<i64: 1, 128>}, {pipeline_mode = #tpu.pipeline_mode<synchronous>, transform_indices = @transform_5, window_bounds = array<i64: 8, 128>}]} {
    %c0_i32 = arith.constant 0 : i32
    %0 = arith.cmpi eq, %arg0, %c0_i32 : i32
    %1 = arith.extui %0 : i1 to i32
    %c0_i32_0 = arith.constant 0 : i32
    %2 = arith.cmpi ne, %1, %c0_i32_0 : i32
    scf.if %2 {
      %cst_11 = arith.constant 0.000000e+00 : f32
      %19 = vector.broadcast %cst_11 : f32 to vector<1x128xf32>
      %c0_12 = arith.constant 0 : index
      %c0_13 = arith.constant 0 : index
      %20 = vector.load %arg7[%c0_12, %c0_13] : memref<1x128xf32, #tpu.memory_space<vmem>>, vector<1x128xf32>
      tpu.vector_store %arg7[%c0_12, %c0_13], %19 {strides = array<i32>} : memref<1x128xf32, #tpu.memory_space<vmem>>, vector<1x128xf32>,
      %cst_14 = arith.constant 0.000000e+00 : f32
      %21 = vector.broadcast %cst_14 : f32 to vector<1x128xf32>
      %c0_15 = arith.constant 0 : index
      %c0_16 = arith.constant 0 : index
      %22 = vector.load %arg8[%c0_15, %c0_16] : memref<1x128xf32, #tpu.memory_space<vmem>>, vector<1x128xf32>
      tpu.vector_store %arg8[%c0_15, %c0_16], %21 {strides = array<i32>} : memref<1x128xf32, #tpu.memory_space<vmem>>, vector<1x128xf32>,
    } else {
    }
    %c0 = arith.constant 0 : index
    %c0_1 = arith.constant 0 : index
    %3 = vector.load %arg1[%c0, %c0_1] : memref<8x384xbf16, #tpu.memory_space<vmem>>, vector<8x384xbf16>
    %c0_2 = arith.constant 0 : index
    %c0_3 = arith.constant 0 : index
    %4 = vector.load %arg2[%c0_2, %c0_3] : memref<384x128xbf16, #tpu.memory_space<vmem>>, vector<384x128xbf16>
    %cst = arith.constant dense<0.000000e+00> : vector<8x128xf32>
    %5 = tpu.matmul %3, %4, %cst {dimension_numbers = #tpu.dot_dimension_numbers<[1], [0], [0], [1], [0, 0, 1, 1], [], []>} : vector<8x384xbf16>, vector<384x128xbf16>, vector<8x128xf32> -> vector<8x128xf32>
    %c0_4 = arith.constant 0 : index
    %c0_5 = arith.constant 0 : index
    %6 = vector.load %arg3[%c0_4, %c0_5] : memref<1x128xf32, #tpu.memory_space<vmem>>, vector<1x128xf32>
    %7 = vector.broadcast %6 : vector<1x128xf32> to vector<8x128xf32>
    %8 = arith.addf %5, %7 : vector<8x128xf32>
    %c8_i32 = arith.constant 8 : i32
    %9 = arith.muli %arg0, %c8_i32 : i32
    %10 = tpu.assume_multiple %9, 8 : i32
    %11 = arith.index_cast %10 : i32 to index
    %c0_6 = arith.constant 0 : index
    %12 = vector.load %arg6[%11, %c0_6] : memref<8x128xf32, #tpu.memory_space<vmem>>, vector<8x128xf32>
    tpu.vector_store %arg6[%11, %c0_6], %8 {strides = array<i32>} : memref<8x128xf32, #tpu.memory_space<vmem>>, vector<8x128xf32>,
    %c0_i32_7 = arith.constant 0 : i32
    %13 = arith.cmpi slt, %arg0, %c0_i32_7 : i32
    %14 = arith.extui %13 : i1 to i32
    %c0_i32_8 = arith.constant 0 : i32
    %15 = arith.cmpi ne, %14, %c0_i32_8 : i32
    scf.if %15 {
      %c0_11 = arith.constant 0 : index
      %c0_12 = arith.constant 0 : index
      %19 = vector.load %arg7[%c0_11, %c0_12] : memref<1x128xf32, #tpu.memory_space<vmem>>, vector<1x128xf32>
      %cst_13 = arith.constant dense<0.000000e+00> : vector<128xf32>
      %20 = vector.multi_reduction <add>, %8, %cst_13 [0] : vector<8x128xf32> to vector<128xf32>
      %21 = vector.shape_cast %20 : vector<128xf32> to vector<1x128xf32>
      %22 = arith.addf %19, %21 : vector<1x128xf32>
      %c0_14 = arith.constant 0 : index
      %c0_15 = arith.constant 0 : index
      %23 = vector.load %arg7[%c0_14, %c0_15] : memref<1x128xf32, #tpu.memory_space<vmem>>, vector<1x128xf32>
      tpu.vector_store %arg7[%c0_14, %c0_15], %22 {strides = array<i32>} : memref<1x128xf32, #tpu.memory_space<vmem>>, vector<1x128xf32>,
      %c0_16 = arith.constant 0 : index
      %c0_17 = arith.constant 0 : index
      %24 = vector.load %arg8[%c0_16, %c0_17] : memref<1x128xf32, #tpu.memory_space<vmem>>, vector<1x128xf32>
      %25 = arith.mulf %8, %8 : vector<8x128xf32>
      %cst_18 = arith.constant dense<0.000000e+00> : vector<128xf32>
      %26 = vector.multi_reduction <add>, %25, %cst_18 [0] : vector<8x128xf32> to vector<128xf32>
      %27 = vector.shape_cast %26 : vector<128xf32> to vector<1x128xf32>
      %28 = arith.addf %24, %27 : vector<1x128xf32>
      %c0_19 = arith.constant 0 : index
      %c0_20 = arith.constant 0 : index
      %29 = vector.load %arg8[%c0_19, %c0_20] : memref<1x128xf32, #tpu.memory_space<vmem>>, vector<1x128xf32>
      tpu.vector_store %arg8[%c0_19, %c0_20], %28 {strides = array<i32>} : memref<1x128xf32, #tpu.memory_space<vmem>>, vector<1x128xf32>,
    } else {
    }
    %c0_i32_9 = arith.constant 0 : i32
    %16 = arith.cmpi eq, %arg0, %c0_i32_9 : i32
    %17 = arith.extui %16 : i1 to i32
    %c0_i32_10 = arith.constant 0 : i32
    %18 = arith.cmpi ne, %17, %c0_i32_10 : i32
    scf.if %18 {
      %c8_i32_11 = arith.constant 8 : i32
      %19 = arith.muli %arg0, %c8_i32_11 : i32
      %20 = tpu.iota {dimensions = array<i32: 0>} : vector<8x128xi32>
      %21 = vector.broadcast %19 : i32 to vector<8x128xi32>
      %22 = arith.addi %21, %20 : vector<8x128xi32>
      %c4_i32 = arith.constant 4 : i32
      %23 = vector.broadcast %c4_i32 : i32 to vector<8x128xi32>
      %24 = arith.cmpi slt, %22, %23 : vector<8x128xi32>
      %25 = arith.extui %24 : vector<8x128xi1> to vector<8x128xi32>
      %26 = arith.sitofp %25 : vector<8x128xi32> to vector<8x128xf32>
      %27 = arith.mulf %8, %26 : vector<8x128xf32>
      %c0_12 = arith.constant 0 : index
      %c0_13 = arith.constant 0 : index
      %28 = vector.load %arg7[%c0_12, %c0_13] : memref<1x128xf32, #tpu.memory_space<vmem>>, vector<1x128xf32>
      %cst_14 = arith.constant dense<0.000000e+00> : vector<128xf32>
      %29 = vector.multi_reduction <add>, %27, %cst_14 [0] : vector<8x128xf32> to vector<128xf32>
      %30 = vector.shape_cast %29 : vector<128xf32> to vector<1x128xf32>
      %31 = arith.addf %28, %30 : vector<1x128xf32>
      %c0_15 = arith.constant 0 : index
      %c0_16 = arith.constant 0 : index
      %32 = vector.load %arg8[%c0_15, %c0_16] : memref<1x128xf32, #tpu.memory_space<vmem>>, vector<1x128xf32>
      %33 = arith.mulf %27, %27 : vector<8x128xf32>
      %cst_17 = arith.constant dense<0.000000e+00> : vector<128xf32>
      %34 = vector.multi_reduction <add>, %33, %cst_17 [0] : vector<8x128xf32> to vector<128xf32>
      %35 = vector.shape_cast %34 : vector<128xf32> to vector<1x128xf32>
      %36 = arith.addf %32, %35 : vector<1x128xf32>
      %cst_18 = arith.constant 2.500000e-01 : f32
      %37 = vector.broadcast %cst_18 : f32 to vector<1x128xf32>
      %38 = arith.mulf %31, %37 : vector<1x128xf32>
      %cst_19 = arith.constant 2.500000e-01 : f32
      %39 = vector.broadcast %cst_19 : f32 to vector<1x128xf32>
      %40 = arith.mulf %36, %39 : vector<1x128xf32>
      %41 = arith.mulf %38, %38 : vector<1x128xf32>
      %42 = arith.subf %40, %41 : vector<1x128xf32>
      %cst_20 = arith.constant 0.000000e+00 : f32
      %43 = vector.broadcast %cst_20 : f32 to vector<1x128xf32>
      %44 = arith.maximumf %42, %43 : vector<1x128xf32>
      %c0_21 = arith.constant 0 : index
      %c0_22 = arith.constant 0 : index
      %45 = vector.load %arg4[%c0_21, %c0_22] : memref<1x128xf32, #tpu.memory_space<vmem>>, vector<1x128xf32>
      %cst_23 = arith.constant 9.99999974E-6 : f32
      %46 = vector.broadcast %cst_23 : f32 to vector<1x128xf32>
      %47 = arith.addf %44, %46 : vector<1x128xf32>
      %48 = math.rsqrt %47 : vector<1x128xf32>
      %49 = arith.mulf %45, %48 : vector<1x128xf32>
      %c0_24 = arith.constant 0 : index
      %c0_25 = arith.constant 0 : index
      %50 = vector.load %arg5[%c0_24, %c0_25] : memref<1x128xf32, #tpu.memory_space<vmem>>, vector<1x128xf32>
      %51 = arith.mulf %38, %49 : vector<1x128xf32>
      %52 = arith.subf %50, %51 : vector<1x128xf32>
      %c0_26 = arith.constant 0 : index
      %c0_27 = arith.constant 0 : index
      %53 = vector.load %arg6[%c0_26, %c0_27] : memref<8x128xf32, #tpu.memory_space<vmem>>, vector<8x128xf32>
      %54 = vector.broadcast %49 : vector<1x128xf32> to vector<8x128xf32>
      %55 = arith.mulf %53, %54 : vector<8x128xf32>
      %56 = vector.broadcast %52 : vector<1x128xf32> to vector<8x128xf32>
      %57 = arith.addf %55, %56 : vector<8x128xf32>
      %cst_28 = arith.constant 0.000000e+00 : f32
      %58 = vector.broadcast %cst_28 : f32 to vector<8x128xf32>
      %59 = arith.maximumf %57, %58 : vector<8x128xf32>
      %c0_29 = arith.constant 0 : index
      %c0_30 = arith.constant 0 : index
      %60 = vector.load %arg6[%c0_29, %c0_30] : memref<8x128xf32, #tpu.memory_space<vmem>>, vector<8x128xf32>
      tpu.vector_store %arg6[%c0_29, %c0_30], %59 {strides = array<i32>} : memref<8x128xf32, #tpu.memory_space<vmem>>, vector<8x128xf32>,
    } else {
    }
    return
  }
  func.func @transform_0(%arg0: i32) -> (i32, i32) {
    %c0_i32 = arith.constant 0 : i32
    %c0_i32_0 = arith.constant 0 : i32
    return %arg0, %c0_i32 : i32, i32
  }
  func.func @transform_1(%arg0: i32) -> (i32, i32) {
    %c0_i32 = arith.constant 0 : i32
    %c0_i32_0 = arith.constant 0 : i32
    %c0_i32_1 = arith.constant 0 : i32
    return %c0_i32, %c0_i32_0 : i32, i32
  }
  func.func @transform_2(%arg0: i32) -> (i32, i32) {
    %c0_i32 = arith.constant 0 : i32
    %c0_i32_0 = arith.constant 0 : i32
    %c0_i32_1 = arith.constant 0 : i32
    return %c0_i32, %c0_i32_0 : i32, i32
  }
  func.func @transform_3(%arg0: i32) -> (i32, i32) {
    %c0_i32 = arith.constant 0 : i32
    %c0_i32_0 = arith.constant 0 : i32
    %c0_i32_1 = arith.constant 0 : i32
    return %c0_i32, %c0_i32_0 : i32, i32
  }
  func.func @transform_4(%arg0: i32) -> (i32, i32) {
    %c0_i32 = arith.constant 0 : i32
    %c0_i32_0 = arith.constant 0 : i32
    %c0_i32_1 = arith.constant 0 : i32
    return %c0_i32, %c0_i32_0 : i32, i32
  }
  func.func @transform_5(%arg0: i32) -> (i32, i32) {
    %c0_i32 = arith.constant 0 : i32
    %c0_i32_0 = arith.constant 0 : i32
    %c0_i32_1 = arith.constant 0 : i32
    return %c0_i32, %c0_i32_0 : i32, i32
  }
}

module attributes {stable_mosaic.version = 11 : i64} {
  func.func @_fused_conv_bn_kernel(%arg0: i32, %arg1: memref<8x384xbf16, #tpu.memory_space<vmem>>, %arg2: memref<384x128xbf16, #tpu.memory_space<vmem>>, %arg3: memref<1x128xf32, #tpu.memory_space<vmem>>, %arg4: memref<1x128xf32, #tpu.memory_space<vmem>>, %arg5: memref<1x128xf32, #tpu.memory_space<vmem>>, %arg6: memref<8x128xf32, #tpu.memory_space<vmem>>, %arg7: memref<8x128xf32, #tpu.memory_space<vmem>>, %arg8: memref<1x128xf32, #tpu.memory_space<vmem>>, %arg9: memref<1x128xf32, #tpu.memory_space<vmem>>) attributes {dimension_semantics = [#tpu.dimension_semantics<arbitrary>], iteration_bounds = array<i64: 1>, scalar_prefetch = 0 : i64, scratch_operands = 2 : i64, tpu.core_type = #tpu.core_type<tc>, window_params = [{transform_indices = @transform_0, window_bounds = array<i64: 8, 384>}, {pipeline_mode = #tpu.pipeline_mode<synchronous>, transform_indices = @transform_1, window_bounds = array<i64: 384, 128>}, {pipeline_mode = #tpu.pipeline_mode<synchronous>, transform_indices = @transform_2, window_bounds = array<i64: 1, 128>}, {pipeline_mode = #tpu.pipeline_mode<synchronous>, transform_indices = @transform_3, window_bounds = array<i64: 1, 128>}, {pipeline_mode = #tpu.pipeline_mode<synchronous>, transform_indices = @transform_4, window_bounds = array<i64: 1, 128>}, {pipeline_mode = #tpu.pipeline_mode<synchronous>, transform_indices = @transform_5, window_bounds = array<i64: 8, 128>}, {pipeline_mode = #tpu.pipeline_mode<synchronous>, transform_indices = @transform_6, window_bounds = array<i64: 8, 128>}]} {
    %c0_i32 = arith.constant 0 : i32
    %0 = arith.cmpi eq, %arg0, %c0_i32 : i32
    %1 = arith.extui %0 : i1 to i32
    %c0_i32_0 = arith.constant 0 : i32
    %2 = arith.cmpi ne, %1, %c0_i32_0 : i32
    scf.if %2 {
      %cst_11 = arith.constant 0.000000e+00 : f32
      %19 = vector.broadcast %cst_11 : f32 to vector<1x128xf32>
      %c0_12 = arith.constant 0 : index
      %c0_13 = arith.constant 0 : index
      %20 = vector.load %arg8[%c0_12, %c0_13] : memref<1x128xf32, #tpu.memory_space<vmem>>, vector<1x128xf32>
      tpu.vector_store %arg8[%c0_12, %c0_13], %19 {strides = array<i32>} : memref<1x128xf32, #tpu.memory_space<vmem>>, vector<1x128xf32>,
      %cst_14 = arith.constant 0.000000e+00 : f32
      %21 = vector.broadcast %cst_14 : f32 to vector<1x128xf32>
      %c0_15 = arith.constant 0 : index
      %c0_16 = arith.constant 0 : index
      %22 = vector.load %arg9[%c0_15, %c0_16] : memref<1x128xf32, #tpu.memory_space<vmem>>, vector<1x128xf32>
      tpu.vector_store %arg9[%c0_15, %c0_16], %21 {strides = array<i32>} : memref<1x128xf32, #tpu.memory_space<vmem>>, vector<1x128xf32>,
    } else {
    }
    %c0 = arith.constant 0 : index
    %c0_1 = arith.constant 0 : index
    %3 = vector.load %arg1[%c0, %c0_1] : memref<8x384xbf16, #tpu.memory_space<vmem>>, vector<8x384xbf16>
    %c0_2 = arith.constant 0 : index
    %c0_3 = arith.constant 0 : index
    %4 = vector.load %arg2[%c0_2, %c0_3] : memref<384x128xbf16, #tpu.memory_space<vmem>>, vector<384x128xbf16>
    %cst = arith.constant dense<0.000000e+00> : vector<8x128xf32>
    %5 = tpu.matmul %3, %4, %cst {dimension_numbers = #tpu.dot_dimension_numbers<[1], [0], [0], [1], [0, 0, 1, 1], [], []>} : vector<8x384xbf16>, vector<384x128xbf16>, vector<8x128xf32> -> vector<8x128xf32>
    %c0_4 = arith.constant 0 : index
    %c0_5 = arith.constant 0 : index
    %6 = vector.load %arg3[%c0_4, %c0_5] : memref<1x128xf32, #tpu.memory_space<vmem>>, vector<1x128xf32>
    %7 = vector.broadcast %6 : vector<1x128xf32> to vector<8x128xf32>
    %8 = arith.addf %5, %7 : vector<8x128xf32>
    %c8_i32 = arith.constant 8 : i32
    %9 = arith.muli %arg0, %c8_i32 : i32
    %10 = tpu.assume_multiple %9, 8 : i32
    %11 = arith.index_cast %10 : i32 to index
    %c0_6 = arith.constant 0 : index
    %12 = vector.load %arg7[%11, %c0_6] : memref<8x128xf32, #tpu.memory_space<vmem>>, vector<8x128xf32>
    tpu.vector_store %arg7[%11, %c0_6], %8 {strides = array<i32>} : memref<8x128xf32, #tpu.memory_space<vmem>>, vector<8x128xf32>,
    %c0_i32_7 = arith.constant 0 : i32
    %13 = arith.cmpi slt, %arg0, %c0_i32_7 : i32
    %14 = arith.extui %13 : i1 to i32
    %c0_i32_8 = arith.constant 0 : i32
    %15 = arith.cmpi ne, %14, %c0_i32_8 : i32
    scf.if %15 {
      %c0_11 = arith.constant 0 : index
      %c0_12 = arith.constant 0 : index
      %19 = vector.load %arg8[%c0_11, %c0_12] : memref<1x128xf32, #tpu.memory_space<vmem>>, vector<1x128xf32>
      %cst_13 = arith.constant dense<0.000000e+00> : vector<128xf32>
      %20 = vector.multi_reduction <add>, %8, %cst_13 [0] : vector<8x128xf32> to vector<128xf32>
      %21 = vector.shape_cast %20 : vector<128xf32> to vector<1x128xf32>
      %22 = arith.addf %19, %21 : vector<1x128xf32>
      %c0_14 = arith.constant 0 : index
      %c0_15 = arith.constant 0 : index
      %23 = vector.load %arg8[%c0_14, %c0_15] : memref<1x128xf32, #tpu.memory_space<vmem>>, vector<1x128xf32>
      tpu.vector_store %arg8[%c0_14, %c0_15], %22 {strides = array<i32>} : memref<1x128xf32, #tpu.memory_space<vmem>>, vector<1x128xf32>,
      %c0_16 = arith.constant 0 : index
      %c0_17 = arith.constant 0 : index
      %24 = vector.load %arg9[%c0_16, %c0_17] : memref<1x128xf32, #tpu.memory_space<vmem>>, vector<1x128xf32>
      %25 = arith.mulf %8, %8 : vector<8x128xf32>
      %cst_18 = arith.constant dense<0.000000e+00> : vector<128xf32>
      %26 = vector.multi_reduction <add>, %25, %cst_18 [0] : vector<8x128xf32> to vector<128xf32>
      %27 = vector.shape_cast %26 : vector<128xf32> to vector<1x128xf32>
      %28 = arith.addf %24, %27 : vector<1x128xf32>
      %c0_19 = arith.constant 0 : index
      %c0_20 = arith.constant 0 : index
      %29 = vector.load %arg9[%c0_19, %c0_20] : memref<1x128xf32, #tpu.memory_space<vmem>>, vector<1x128xf32>
      tpu.vector_store %arg9[%c0_19, %c0_20], %28 {strides = array<i32>} : memref<1x128xf32, #tpu.memory_space<vmem>>, vector<1x128xf32>,
    } else {
    }
    %c0_i32_9 = arith.constant 0 : i32
    %16 = arith.cmpi eq, %arg0, %c0_i32_9 : i32
    %17 = arith.extui %16 : i1 to i32
    %c0_i32_10 = arith.constant 0 : i32
    %18 = arith.cmpi ne, %17, %c0_i32_10 : i32
    scf.if %18 {
      %c8_i32_11 = arith.constant 8 : i32
      %19 = arith.muli %arg0, %c8_i32_11 : i32
      %20 = tpu.iota {dimensions = array<i32: 0>} : vector<8x128xi32>
      %21 = vector.broadcast %19 : i32 to vector<8x128xi32>
      %22 = arith.addi %21, %20 : vector<8x128xi32>
      %c4_i32 = arith.constant 4 : i32
      %23 = vector.broadcast %c4_i32 : i32 to vector<8x128xi32>
      %24 = arith.cmpi slt, %22, %23 : vector<8x128xi32>
      %25 = arith.extui %24 : vector<8x128xi1> to vector<8x128xi32>
      %26 = arith.sitofp %25 : vector<8x128xi32> to vector<8x128xf32>
      %27 = arith.mulf %8, %26 : vector<8x128xf32>
      %c0_12 = arith.constant 0 : index
      %c0_13 = arith.constant 0 : index
      %28 = vector.load %arg8[%c0_12, %c0_13] : memref<1x128xf32, #tpu.memory_space<vmem>>, vector<1x128xf32>
      %cst_14 = arith.constant dense<0.000000e+00> : vector<128xf32>
      %29 = vector.multi_reduction <add>, %27, %cst_14 [0] : vector<8x128xf32> to vector<128xf32>
      %30 = vector.shape_cast %29 : vector<128xf32> to vector<1x128xf32>
      %31 = arith.addf %28, %30 : vector<1x128xf32>
      %c0_15 = arith.constant 0 : index
      %c0_16 = arith.constant 0 : index
      %32 = vector.load %arg9[%c0_15, %c0_16] : memref<1x128xf32, #tpu.memory_space<vmem>>, vector<1x128xf32>
      %33 = arith.mulf %27, %27 : vector<8x128xf32>
      %cst_17 = arith.constant dense<0.000000e+00> : vector<128xf32>
      %34 = vector.multi_reduction <add>, %33, %cst_17 [0] : vector<8x128xf32> to vector<128xf32>
      %35 = vector.shape_cast %34 : vector<128xf32> to vector<1x128xf32>
      %36 = arith.addf %32, %35 : vector<1x128xf32>
      %cst_18 = arith.constant 2.500000e-01 : f32
      %37 = vector.broadcast %cst_18 : f32 to vector<1x128xf32>
      %38 = arith.mulf %31, %37 : vector<1x128xf32>
      %cst_19 = arith.constant 2.500000e-01 : f32
      %39 = vector.broadcast %cst_19 : f32 to vector<1x128xf32>
      %40 = arith.mulf %36, %39 : vector<1x128xf32>
      %41 = arith.mulf %38, %38 : vector<1x128xf32>
      %42 = arith.subf %40, %41 : vector<1x128xf32>
      %cst_20 = arith.constant 0.000000e+00 : f32
      %43 = vector.broadcast %cst_20 : f32 to vector<1x128xf32>
      %44 = arith.maximumf %42, %43 : vector<1x128xf32>
      %c0_21 = arith.constant 0 : index
      %c0_22 = arith.constant 0 : index
      %45 = vector.load %arg4[%c0_21, %c0_22] : memref<1x128xf32, #tpu.memory_space<vmem>>, vector<1x128xf32>
      %cst_23 = arith.constant 9.99999974E-6 : f32
      %46 = vector.broadcast %cst_23 : f32 to vector<1x128xf32>
      %47 = arith.addf %44, %46 : vector<1x128xf32>
      %48 = math.rsqrt %47 : vector<1x128xf32>
      %49 = arith.mulf %45, %48 : vector<1x128xf32>
      %c0_24 = arith.constant 0 : index
      %c0_25 = arith.constant 0 : index
      %50 = vector.load %arg5[%c0_24, %c0_25] : memref<1x128xf32, #tpu.memory_space<vmem>>, vector<1x128xf32>
      %51 = arith.mulf %38, %49 : vector<1x128xf32>
      %52 = arith.subf %50, %51 : vector<1x128xf32>
      %c0_26 = arith.constant 0 : index
      %c0_27 = arith.constant 0 : index
      %53 = vector.load %arg7[%c0_26, %c0_27] : memref<8x128xf32, #tpu.memory_space<vmem>>, vector<8x128xf32>
      %54 = vector.broadcast %49 : vector<1x128xf32> to vector<8x128xf32>
      %55 = arith.mulf %53, %54 : vector<8x128xf32>
      %56 = vector.broadcast %52 : vector<1x128xf32> to vector<8x128xf32>
      %57 = arith.addf %55, %56 : vector<8x128xf32>
      %c0_28 = arith.constant 0 : index
      %c0_29 = arith.constant 0 : index
      %58 = vector.load %arg6[%c0_28, %c0_29] : memref<8x128xf32, #tpu.memory_space<vmem>>, vector<8x128xf32>
      %59 = arith.addf %57, %58 : vector<8x128xf32>
      %cst_30 = arith.constant 0.000000e+00 : f32
      %60 = vector.broadcast %cst_30 : f32 to vector<8x128xf32>
      %61 = arith.maximumf %59, %60 : vector<8x128xf32>
      %c0_31 = arith.constant 0 : index
      %c0_32 = arith.constant 0 : index
      %62 = vector.load %arg7[%c0_31, %c0_32] : memref<8x128xf32, #tpu.memory_space<vmem>>, vector<8x128xf32>
      tpu.vector_store %arg7[%c0_31, %c0_32], %61 {strides = array<i32>} : memref<8x128xf32, #tpu.memory_space<vmem>>, vector<8x128xf32>,
    } else {
    }
    return
  }
  func.func @transform_0(%arg0: i32) -> (i32, i32) {
    %c0_i32 = arith.constant 0 : i32
    %c0_i32_0 = arith.constant 0 : i32
    return %arg0, %c0_i32 : i32, i32
  }
  func.func @transform_1(%arg0: i32) -> (i32, i32) {
    %c0_i32 = arith.constant 0 : i32
    %c0_i32_0 = arith.constant 0 : i32
    %c0_i32_1 = arith.constant 0 : i32
    return %c0_i32, %c0_i32_0 : i32, i32
  }
  func.func @transform_2(%arg0: i32) -> (i32, i32) {
    %c0_i32 = arith.constant 0 : i32
    %c0_i32_0 = arith.constant 0 : i32
    %c0_i32_1 = arith.constant 0 : i32
    return %c0_i32, %c0_i32_0 : i32, i32
  }
  func.func @transform_3(%arg0: i32) -> (i32, i32) {
    %c0_i32 = arith.constant 0 : i32
    %c0_i32_0 = arith.constant 0 : i32
    %c0_i32_1 = arith.constant 0 : i32
    return %c0_i32, %c0_i32_0 : i32, i32
  }
  func.func @transform_4(%arg0: i32) -> (i32, i32) {
    %c0_i32 = arith.constant 0 : i32
    %c0_i32_0 = arith.constant 0 : i32
    %c0_i32_1 = arith.constant 0 : i32
    return %c0_i32, %c0_i32_0 : i32, i32
  }
  func.func @transform_5(%arg0: i32) -> (i32, i32) {
    %c0_i32 = arith.constant 0 : i32
    %c0_i32_0 = arith.constant 0 : i32
    %c0_i32_1 = arith.constant 0 : i32
    return %c0_i32, %c0_i32_0 : i32, i32
  }
  func.func @transform_6(%arg0: i32) -> (i32, i32) {
    %c0_i32 = arith.constant 0 : i32
    %c0_i32_0 = arith.constant 0 : i32
    %c0_i32_1 = arith.constant 0 : i32
    return %c0_i32, %c0_i32_0 : i32, i32
  }
}

</mosaic_0001>

<bundles_post_ra>
// kernel: my_model_forward.7
= control target key start
LH: loop header
LB: loop body
LE: loop exit
PB: predicated region body
PF: predicated region fallthrough
CT: control target
= control target key end

     0   :  { %s6066_s1 = inlined_call_operand.vmem [shape: bf16[128,128], index: 1, kind: input, shape index: {}]   ;;  %s6067_s2 = inlined_call_operand.vmem [shape: f32[1,128], index: 2, kind: input, shape index: {}]   ;;  %s6068_s0 = inlined_call_operand.vmem [shape: bf16[992,128], index: 0, kind: input, shape index: {}]   ;;  %s6069_s3 = inlined_call_operand.vmem [shape: f32[1,128], index: 3, kind: input, shape index: {}]   ;;  %s6070_s4 = inlined_call_operand.vmem [shape: f32[1,128], index: 4, kind: input, shape index: {}]   ;;  %s6071_s5 = inlined_call_operand.vmem [shape: f32[992,128], index: 5, kind: output, shape index: {}]  }
   0x1   :  { %v3563_v0 = vld [vmem:[%s6066_s1 + $0x38] sm:$0xff]  ;;  %v3562_v1 = vld [vmem:[%s6066_s1 + $0x30] sm:$0xff]  ;;  %v3561_v2 = vld [vmem:[%s6066_s1 + $0x28] sm:$0xff] }
   0x2   :  { %590 = vmatpush.bf16.msra.mxu0 %v3563_v0  ;;  %3564 = vmatpush.bf16.msra.mxu1 %v3563_v0  ;;  %v3560_v3 = vld [vmem:[%s6066_s1 + $0x20] sm:$0xff]  ;;  %v3559_v4 = vld [vmem:[%s6066_s1 + $0x18] sm:$0xff]  ;;  %v3558_v5 = vld [vmem:[%s6066_s1 + $0x10] sm:$0xff] }
   0x3   :  { %3565 = vmatpush.bf16.msra.mxu2 %v3563_v0  ;;  %3566 = vmatpush.bf16.msra.mxu3 %v3563_v0  ;;  %v3557_v6 = vld [vmem:[%s6066_s1 + $0x8] sm:$0xff]  ;;  %v3556_v7 = vld [vmem:[%s6066_s1] sm:$0xff]  ;;  %v3509_v10 = vld [vmem:[%s6068_s0 + $0x78] sm:$0xff] }
   0x4   :  { %v3494_v8 = vld [vmem:[%s6068_s0] sm:$0xff]  ;;  %v3495_v9 = vld [vmem:[%s6068_s0 + $0x8] sm:$0xff]  ;;  %v3496_v11 = vld [vmem:[%s6068_s0 + $0x10] sm:$0xff] }
   0x5   :  { %v3510_v12 = vld [vmem:[%s6068_s0 + $0x80] sm:$0xff]  ;;  %v3497_v13 = vld [vmem:[%s6068_s0 + $0x18] sm:$0xff]  ;;  %v3511_v14 = vld [vmem:[%s6068_s0 + $0x88] sm:$0xff] }
   0x6   :  { %591 = vmatpush.bf16.msra.mxu0 %v3562_v1  ;;  %3567 = vmatpush.bf16.msra.mxu1 %v3562_v1  ;;  %v3524_v15 = vld [vmem:[%s6068_s0 + $0xf0] sm:$0xff]  ;;  %v3498_v16 = vld [vmem:[%s6068_s0 + $0x20] sm:$0xff]  ;;  %v3525_v18 = vld [vmem:[%s6068_s0 + $0xf8] sm:$0xff] }
   0x7   :  { %3568 = vmatpush.bf16.msra.mxu2 %v3562_v1  ;;  %3569 = vmatpush.bf16.msra.mxu3 %v3562_v1  ;;  %v3512_v17 = vld [vmem:[%s6068_s0 + $0x90] sm:$0xff]  ;;  %v3499_v19 = vld [vmem:[%s6068_s0 + $0x28] sm:$0xff]  ;;  %v3513_v20 = vld [vmem:[%s6068_s0 + $0x98] sm:$0xff] }
   0x8   :  { %v3500_v21 = vld [vmem:[%s6068_s0 + $0x30] sm:$0xff]  ;;  %v3526_v22 = vld [vmem:[%s6068_s0 + $0x100] sm:$0xff]  ;;  %v3501_v24 = vld [vmem:[%s6068_s0 + $0x38] sm:$0xff] }
   0x9   :  { %v3514_v23 = vld [vmem:[%s6068_s0 + $0xa0] sm:$0xff]  ;;  %v3527_v25 = vld [vmem:[%s6068_s0 + $0x108] sm:$0xff]  ;;  %v3540_v27 = vld [vmem:[%s6068_s0 + $0x170] sm:$0xff] }
   0xa   :  { %592 = vmatpush.bf16.msra.mxu0 %v3561_v2  ;;  %3570 = vmatpush.bf16.msra.mxu1 %v3561_v2  ;;  %v3515_v26 = vld [vmem:[%s6068_s0 + $0xa8] sm:$0xff]  ;;  %v3502_v28 = vld [vmem:[%s6068_s0 + $0x40] sm:$0xff]  ;;  %v3528_v29 = vld [vmem:[%s6068_s0 + $0x110] sm:$0xff] }
   0xb   :  { %3571 = vmatpush.bf16.msra.mxu2 %v3561_v2  ;;  %3572 = vmatpush.bf16.msra.mxu3 %v3561_v2  ;;  %v3516_v31 = vld [vmem:[%s6068_s0 + $0xb0] sm:$0xff]  ;;  %v3541_v33 = vld [vmem:[%s6068_s0 + $0x178] sm:$0xff]  ;;  %v3503_v34 = vld [vmem:[%s6068_s0 + $0x48] sm:$0xff] }
   0xc   :  { %v3529_v35 = vld [vmem:[%s6068_s0 + $0x118] sm:$0xff]  ;;  %v3542_v41 = vld [vmem:[%s6068_s0 + $0x180] sm:$0xff]  ;;  %v3504_v42 = vld [vmem:[%s6068_s0 + $0x50] sm:$0xff] }
   0xd   :  { %v3517_v38 = vld [vmem:[%s6068_s0 + $0xb8] sm:$0xff]  ;;  %v3530_v43 = vld [vmem:[%s6068_s0 + $0x120] sm:$0xff]  ;;  %v3543_v49 = vld [vmem:[%s6068_s0 + $0x188] sm:$0xff] }
   0xe   :  { %593 = vmatpush.bf16.msra.mxu0 %v3560_v3  ;;  %3573 = vmatpush.bf16.msra.mxu1 %v3560_v3  ;;  %v3518_v46 = vld [vmem:[%s6068_s0 + $0xc0] sm:$0xff]  ;;  %v3505_v50 = vld [vmem:[%s6068_s0 + $0x58] sm:$0xff]  ;;  %v3531_v51 = vld [vmem:[%s6068_s0 + $0x128] sm:$0xff] }
   0xf   :  { %3574 = vmatpush.bf16.msra.mxu2 %v3560_v3  ;;  %3575 = vmatpush.bf16.msra.mxu3 %v3560_v3  ;;  %v3519_v54 = vld [vmem:[%s6068_s0 + $0xc8] sm:$0xff]  ;;  %v3544_v57 = vld [vmem:[%s6068_s0 + $0x190] sm:$0xff]  ;;  %v3506_v58 = vld [vmem:[%s6068_s0 + $0x60] sm:$0xff] }
  0x10   :  { %v3532_v59 = vld [vmem:[%s6068_s0 + $0x130] sm:$0xff]  ;;  %v3545_v3 = vld [vmem:[%s6068_s0 + $0x198] sm:$0xff] }
  0x11   :  { %v3520_v63 = vld [vmem:[%s6068_s0 + $0xd0] sm:$0xff] }
  0x12   :  { %594 = vmatpush.bf16.msra.mxu0 %v3559_v4  ;;  %3576 = vmatpush.bf16.msra.mxu1 %v3559_v4 }
  0x13   :  { %3577 = vmatpush.bf16.msra.mxu2 %v3559_v4  ;;  %3578 = vmatpush.bf16.msra.mxu3 %v3559_v4  ;;  %v3507_v4 = vld [vmem:[%s6068_s0 + $0x68] sm:$0xff] }
  0x16   :  { %595 = vmatpush.bf16.msra.mxu0 %v3558_v5  ;;  %3579 = vmatpush.bf16.msra.mxu1 %v3558_v5 }
  0x17   :  { %3580 = vmatpush.bf16.msra.mxu2 %v3558_v5  ;;  %3581 = vmatpush.bf16.msra.mxu3 %v3558_v5  ;;  %v3533_v5 = vld [vmem:[%s6068_s0 + $0x138] sm:$0xff] }
  0x1a   :  { %596 = vmatpush.bf16.msra.mxu0 %v3557_v6  ;;  %3582 = vmatpush.bf16.msra.mxu1 %v3557_v6 }
  0x1b   :  { %3583 = vmatpush.bf16.msra.mxu2 %v3557_v6  ;;  %3584 = vmatpush.bf16.msra.mxu3 %v3557_v6 }
  0x1e   :  { %597 = vmatpush.bf16.msra.mxu0 %v3556_v7  ;;  %3585 = vmatpush.bf16.msra.mxu1 %v3556_v7 }
  0x1f   :  { %3586 = vmatpush.bf16.msra.mxu2 %v3556_v7  ;;  %3587 = vmatpush.bf16.msra.mxu3 %v3556_v7 }
  0x21   :  { %598 = vmatmul.bf16.vlgmr.msra.gmra.mxu0 %v3494_v8  ;;  %673 = vmatmul.bf16.vlgmr.msra.gmra.mxu1 %v3509_v10 }
  0x22   :  { %748 = vmatmul.bf16.vlgmr.msra.gmra.mxu2 %v3524_v15  ;;  %828 = vmatmul.bf16.vlgmr.msra.gmra.mxu3 %v3540_v27  ;;  %v3534_v15 = vld [vmem:[%s6068_s0 + $0x140] sm:$0xff]  ;;  %v3523_v27 = vld [vmem:[%s6068_s0 + $0xe8] sm:$0xff] }
  0x31   :  { %603 = vmatmul.bf16.gmra.mxu0 %v3495_v9  ;;  %678 = vmatmul.bf16.gmra.mxu1 %v3510_v12  ;;  %v3521_v9 = vld [vmem:[%s6068_s0 + $0xd8] sm:$0xff] }
  0x32   :  { %753 = vmatmul.bf16.gmra.mxu2 %v3525_v18  ;;  %833 = vmatmul.bf16.gmra.mxu3 %v3541_v33  ;;  %v3548_v33 = vld [vmem:[%s6068_s0 + $0x1b0] sm:$0xff] }
  0x41   :  { %608 = vmatmul.bf16.gmra.mxu0 %v3496_v11  ;;  %683 = vmatmul.bf16.gmra.mxu1 %v3511_v14  ;;  %v3508_v14 = vld [vmem:[%s6068_s0 + $0x70] sm:$0xff] }
  0x42   :  { %758 = vmatmul.bf16.gmra.mxu2 %v3526_v22  ;;  %838 = vmatmul.bf16.gmra.mxu3 %v3542_v41 }
  0x51   :  { %613 = vmatmul.bf16.gmra.mxu0 %v3497_v13  ;;  %688 = vmatmul.bf16.gmra.mxu1 %v3512_v17  ;;  %v3546_v13 = vld [vmem:[%s6068_s0 + $0x1a0] sm:$0xff] }
  0x52   :  { %763 = vmatmul.bf16.gmra.mxu2 %v3527_v25  ;;  %843 = vmatmul.bf16.gmra.mxu3 %v3543_v49 }
  0x61   :  { %618 = vmatmul.bf16.gmra.mxu0 %v3498_v16  ;;  %693 = vmatmul.bf16.gmra.mxu1 %v3513_v20 }
  0x62   :  { %768 = vmatmul.bf16.gmra.mxu2 %v3528_v29  ;;  %848 = vmatmul.bf16.gmra.mxu3 %v3544_v57 }
  0x71   :  { %623 = vmatmul.bf16.gmra.mxu0 %v3499_v19  ;;  %698 = vmatmul.bf16.gmra.mxu1 %v3514_v23  ;;  %v3522_v19 = vld [vmem:[%s6068_s0 + $0xe0] sm:$0xff]  ;;  %v3547_v23 = vld [vmem:[%s6068_s0 + $0x1a8] sm:$0xff] }
  0x72   :  { %773 = vmatmul.bf16.gmra.mxu2 %v3529_v35  ;;  %853 = vmatmul.bf16.gmra.mxu3 %v3545_v3 }
  0x81   :  { %628 = vmatmul.bf16.gmra.mxu0 %v3500_v21  ;;  %703 = vmatmul.bf16.gmra.mxu1 %v3515_v26 }
  0x82   :  { %778 = vmatmul.bf16.gmra.mxu2 %v3530_v43  ;;  %858 = vmatmul.bf16.gmra.mxu3 %v3546_v13 }
  0x91   :  { %633 = vmatmul.bf16.gmra.mxu0 %v3501_v24  ;;  %708 = vmatmul.bf16.gmra.mxu1 %v3516_v31  ;;  %v3535_v24 = vld [vmem:[%s6068_s0 + $0x148] sm:$0xff] }
  0x92   :  { %783 = vmatmul.bf16.gmra.mxu2 %v3531_v51  ;;  %863 = vmatmul.bf16.gmra.mxu3 %v3547_v23  ;;  %v3549_v51 = vld [vmem:[%s6068_s0 + $0x1b8] sm:$0xff] }
  0x9e   :  { %v3714_v30 = vpop.f32.mrf.mxu0  ;;  %v3732_v37 = vpop.f32.mrf.mxu1 }
  0xa1   :  { %638 = vmatmul.bf16.gmra.mxu0 %v3502_v28  ;;  %713 = vmatmul.bf16.gmra.mxu1 %v3517_v38 }
  0xa2   :  { %788 = vmatmul.bf16.gmra.mxu2 %v3532_v59  ;;  %868 = vmatmul.bf16.gmra.mxu3 %v3548_v33 }
  0xa5   :  { %v3794_v62 = vpop.f32.mrf.mxu2  ;;  %v3882_v41 = vpop.f32.mrf.mxu3 }
  0xa6   :  { %v3719_v32 = vpop.f32.mrf.mxu0  ;;  %v3739_v40 = vpop.f32.mrf.mxu1  ;;  %6157 = vst [vmem:[#allocation4_spill] sm:$0xff] %v3882_v41 }
  0xad   :  { %v3803_v2 = vpop.f32.mrf.mxu2  ;;  %v3890_v49 = vpop.f32.mrf.mxu3 }
  0xae   :  { %v3730_v36 = vpop.f32.mrf.mxu0  ;;  %v3752_v45 = vpop.f32.mrf.mxu1  ;;  %6158 = vst [vmem:[#allocation5_spill] sm:$0xff] %v3890_v49 }
  0xb1   :  { %643 = vmatmul.bf16.gmra.mxu0 %v3503_v34  ;;  %718 = vmatmul.bf16.gmra.mxu1 %v3518_v46  ;;  %v3536_v34 = vld [vmem:[%s6068_s0 + $0x150] sm:$0xff] }
  0xb2   :  { %793 = vmatmul.bf16.gmra.mxu2 %v3533_v5  ;;  %873 = vmatmul.bf16.gmra.mxu3 %v3549_v51 }
  0xb5   :  { %v3818_v8 = vpop.f32.mrf.mxu2 }
  0xb6   :  { %v3737_v39 = vpop.f32.mrf.mxu0  ;;  %v3759_v48 = vpop.f32.mrf.mxu1 }
  0xbd   :  { %v3827_v12 = vpop.f32.mrf.mxu2 }
  0xbe   :  { %v3750_v44 = vpop.f32.mrf.mxu0  ;;  %v3772_v53 = vpop.f32.mrf.mxu1 }
  0xc1   :  { %648 = vmatmul.bf16.gmra.mxu0 %v3504_v42  ;;  %723 = vmatmul.bf16.gmra.mxu1 %v3519_v54  ;;  %v3537_v54 = vld [vmem:[%s6068_s0 + $0x158] sm:$0xff] }
  0xc2   :  { %798 = vmatmul.bf16.gmra.mxu2 %v3534_v15 }
  0xc5   :  { %v3842_v18 = vpop.f32.mrf.mxu2 }
  0xc6   :  { %v3757_v47 = vpop.f32.mrf.mxu0  ;;  %v3779_v56 = vpop.f32.mrf.mxu1 }
  0xcd   :  { %v3851_v22 = vpop.f32.mrf.mxu2 }
  0xce   :  { %v3770_v52 = vpop.f32.mrf.mxu0  ;;  %v3792_v61 = vpop.f32.mrf.mxu1 }
  0xd1   :  { %653 = vmatmul.bf16.gmra.mxu0 %v3505_v50  ;;  %728 = vmatmul.bf16.gmra.mxu1 %v3520_v63 }
  0xd2   :  { %803 = vmatmul.bf16.gmra.mxu2 %v3535_v24 }
  0xd5   :  { %v3861_v26 = vpop.f32.mrf.mxu2 }
  0xd6   :  { %v3777_v55 = vpop.f32.mrf.mxu0  ;;  %v3801_v1 = vpop.f32.mrf.mxu1 }
  0xdd   :  { %v3870_v31 = vpop.f32.mrf.mxu2 }
  0xde   :  { %v3790_v60 = vpop.f32.mrf.mxu0  ;;  %v3816_v7 = vpop.f32.mrf.mxu1 }
  0xe1   :  { %658 = vmatmul.bf16.gmra.mxu0 %v3506_v58  ;;  %733 = vmatmul.bf16.gmra.mxu1 %v3521_v9  ;;  %v3902_v58 = vpop.f32.mrf.mxu3  ;;  %v3550_v9 = vld [vmem:[%s6068_s0 + $0x1c0] sm:$0xff] }
  0xe2   :  { %808 = vmatmul.bf16.gmra.mxu2 %v3536_v34  ;;  %6159 = vst [vmem:[#allocation6_spill] sm:$0xff] %v3902_v58  ;;  %878 = vmatmul.bf16.gmra.mxu3 %v3550_v9  ;;  %v3937_v34 = vld [vmem:[%s6067_s2] ss:$0 sm:$0xff]  ;;  %v3551_v9 = vld [vmem:[%s6068_s0 + $0x1c8] sm:$0xff] }
  0xe3   :  { %v3965_v58 = vadd.f32 %v3937_v34, %v3737_v39 }
  0xe5   :  { %v3884_v42 = vpop.f32.mrf.mxu2  ;;  %6169 = vst [vmem:[#allocation16_spill] sm:$0xff] %v3965_v58 }
  0xe6   :  { %v3799_v0 = vpop.f32.mrf.mxu0  ;;  %v3825_v11 = vpop.f32.mrf.mxu1 }
  0xed   :  { %v3892_v50 = vpop.f32.mrf.mxu2 }
  0xee   :  { %v3814_v6 = vpop.f32.mrf.mxu0  ;;  %v3840_v17 = vpop.f32.mrf.mxu1 }
  0xf1   :  { %663 = vmatmul.bf16.gmra.mxu0 %v3507_v4  ;;  %738 = vmatmul.bf16.gmra.mxu1 %v3522_v19  ;;  %v3910_v4 = vpop.f32.mrf.mxu3 }
  0xf2   :  { %813 = vmatmul.bf16.gmra.mxu2 %v3537_v54  ;;  %6161 = vst [vmem:[#allocation8_spill] sm:$0xff] %v3910_v4  ;;  %v3943_v54 = vadd.f32 %v3937_v34, %v3719_v32  ;;  %883 = vmatmul.bf16.gmra.mxu3 %v3551_v9 }
  0xf4   :  { %6167 = vst [vmem:[#allocation14_spill] sm:$0xff] %v3943_v54  ;;  %v2309_v32 = vmul.f32 %v3943_v54, %v3943_v54 }
  0xf5   :  { %v3906_v63 = vpop.f32.mrf.mxu2 }
  0xf6   :  { %v3823_v10 = vpop.f32.mrf.mxu0  ;;  %v3849_v21 = vpop.f32.mrf.mxu1  ;;  %6160 = vst [vmem:[#allocation7_spill] sm:$0xff] %v3906_v63 }
  0xf9   :  { %v3924_v19 = vpop.f32.mrf.mxu3 }
  0xfa   :  { %6163 = vst [vmem:[#allocation10_spill] sm:$0xff] %v3924_v19  ;;  %v3539_v19 = vld [vmem:[%s6068_s0 + $0x168] sm:$0xff] }
  0xfd   :  { %v3912_v5 = vpop.f32.mrf.mxu2 }
  0xfe   :  { %v3838_v16 = vpop.f32.mrf.mxu0  ;;  %v3866_v28 = vpop.f32.mrf.mxu1  ;;  %6162 = vst [vmem:[#allocation9_spill] sm:$0xff] %v3912_v5 }
 0x101   :  { %668 = vmatmul.bf16.gmra.mxu0 %v3508_v14  ;;  %743 = vmatmul.bf16.gmra.mxu1 %v3523_v27  ;;  %v3538_v14 = vld [vmem:[%s6068_s0 + $0x160] sm:$0xff]  ;;  %v3932_v33 = vpop.f32.mrf.mxu3 }
 0x102   :  { %818 = vmatmul.bf16.gmra.mxu2 %v3538_v14  ;;  %6165 = vst [vmem:[#allocation12_spill] sm:$0xff] %v3932_v33  ;;  %v3950_v14 = vadd.f32 %v3937_v34, %v3714_v30  ;;  %v3954_v33 = vadd.f32 %v3937_v34, %v3730_v36 }
 0x104   :  { %6168 = vst [vmem:[#allocation15_spill] sm:$0xff] %v3950_v14  ;;  %v2308_v36 = vmul.f32 %v3950_v14, %v3950_v14  ;;  %v2177_v9 = vadd.f32 %v3943_v54, %v3950_v14  ;;  %v2310_v41 = vmul.f32 %v3954_v33, %v3954_v33 }
 0x105   :  { %v3926_v23 = vpop.f32.mrf.mxu2 }
 0x106   :  { %v3847_v20 = vpop.f32.mrf.mxu0  ;;  %v3880_v38 = vpop.f32.mrf.mxu1  ;;  %6164 = vst [vmem:[#allocation11_spill] sm:$0xff] %v3926_v23  ;;  %v2432_v39 = vadd.f32 %v2309_v32, %v2308_v36  ;;  %v2311_v23 = vmul.f32 %v3965_v58, %v3965_v58 }
 0x108   :  { %v2433_v54 = vadd.f32 %v2432_v39, %v2310_v41  ;;  %v4004_v41 = vadd.f32 %v3937_v34, %v3777_v55 }
 0x109   :  { %v3969_v49 = vpop.f32.mrf.mxu3 }
 0x10a   :  { %6170 = vst [vmem:[#allocation17_spill] sm:$0xff] %v3969_v49  ;;  %v3986_v49 = vadd.f32 %v3937_v34, %v3757_v47  ;;  %v2434_v36 = vadd.f32 %v2433_v54, %v2311_v23  ;;  %v4013_v23 = vadd.f32 %v3937_v34, %v3790_v60  ;;  %v2315_v55 = vmul.f32 %v4004_v41, %v4004_v41 }
 0x10b   :  { %6174 = vst [vmem:[#allocation21_spill] sm:$0xff] %v4004_v41 }
 0x10c   :  { %6172 = vst [vmem:[#allocation19_spill] sm:$0xff] %v3986_v49  ;;  %v2313_v47 = vmul.f32 %v3986_v49, %v3986_v49 }
 0x10d   :  { %v3939_v51 = vpop.f32.mrf.mxu2  ;;  %6175 = vst [vmem:[#allocation22_spill] sm:$0xff] %v4013_v23 }
 0x10e   :  { %v3859_v25 = vpop.f32.mrf.mxu0  ;;  %v3888_v46 = vpop.f32.mrf.mxu1  ;;  %6166 = vst [vmem:[#allocation13_spill] sm:$0xff] %v3939_v51  ;;  %v3979_v51 = vadd.f32 %v3937_v34, %v3750_v44  ;;  %v3995_v44 = vadd.f32 %v3937_v34, %v3770_v52 }
 0x110   :  { %6171 = vst [vmem:[#allocation18_spill] sm:$0xff] %v3979_v51  ;;  %v2312_v63 = vmul.f32 %v3979_v51, %v3979_v51  ;;  %v2314_v52 = vmul.f32 %v3995_v44, %v3995_v44 }
 0x111   :  { %6173 = vst [vmem:[#allocation20_spill] sm:$0xff] %v3995_v44  ;;  %v4006_v39 = vpop.f32.mrf.mxu3 }
 0x112   :  { %823 = vmatmul.bf16.gmra.mxu2 %v3539_v19  ;;  %v2178_v19 = vadd.f32 %v2177_v9, %v3954_v33 }
 0x114   :  { %v2179_v14 = vadd.f32 %v2178_v19, %v3965_v58  ;;  %v2435_v19 = vadd.f32 %v2434_v36, %v2312_v63  ;;  %v4022_v63 = vadd.f32 %v3937_v34, %v3799_v0  ;;  %v3552_v36 = vld [vmem:[%s6068_s0 + $0x1d0] sm:$0xff] }
 0x115   :  { %v3988_v5 = vpop.f32.mrf.mxu2  ;;  %888 = vmatmul.bf16.gmra.mxu3 %v3552_v36 }
 0x116   :  { %v3868_v29 = vpop.f32.mrf.mxu0  ;;  %v3904_v59 = vpop.f32.mrf.mxu1  ;;  %v2180_v9 = vadd.f32 %v2179_v14, %v3979_v51  ;;  %v2436_v14 = vadd.f32 %v2435_v19, %v2313_v47  ;;  %6176 = vst [vmem:[#allocation23_spill] sm:$0xff] %v4022_v63 }
 0x118   :  { %v2181_v58 = vadd.f32 %v2180_v9, %v3986_v49  ;;  %v2437_v9 = vadd.f32 %v2436_v14, %v2314_v52  ;;  %v2316_v49 = vmul.f32 %v4013_v23, %v4013_v23  ;;  %v2317_v52 = vmul.f32 %v4022_v63, %v4022_v63 }
 0x119   :  { %v4045_v14 = vpop.f32.mrf.mxu3 }
 0x11a   :  { %v2182_v51 = vadd.f32 %v2181_v58, %v3995_v44  ;;  %v4032_v58 = vadd.f32 %v3937_v34, %v3814_v6  ;;  %v2438_v0 = vadd.f32 %v2437_v9, %v2315_v55  ;;  %v4052_v55 = vadd.f32 %v3937_v34, %v3838_v16 }
 0x11b   :  { %v4068_v16 = vadd.f32 %v3937_v34, %v3859_v25 }
 0x11c   :  { %v2183_v60 = vadd.f32 %v2182_v51, %v4004_v41  ;;  %6177 = vst [vmem:[#allocation24_spill] sm:$0xff] %v4032_v58  ;;  %v4043_v51 = vadd.f32 %v3937_v34, %v3823_v10  ;;  %v2439_v41 = vadd.f32 %v2438_v0, %v2316_v49  ;;  %v2318_v36 = vmul.f32 %v4032_v58, %v4032_v58 }
 0x11d   :  { %v4036_v19 = vpop.f32.mrf.mxu2  ;;  %6179 = vst [vmem:[#allocation26_spill] sm:$0xff] %v4052_v55  ;;  %v4059_v10 = vadd.f32 %v3937_v34, %v3847_v20  ;;  %v2322_v25 = vmul.f32 %v4068_v16, %v4068_v16 }
 0x11e   :  { %v3878_v35 = vpop.f32.mrf.mxu0  ;;  %v3917_v13 = vpop.f32.mrf.mxu1  ;;  %v2184_v44 = vadd.f32 %v2183_v60, %v4013_v23  ;;  %6178 = vst [vmem:[#allocation25_spill] sm:$0xff] %v4043_v51  ;;  %v2440_v9 = vadd.f32 %v2439_v41, %v2317_v52  ;;  %v2319_v23 = vmul.f32 %v4043_v51, %v4043_v51 }
 0x11f   :  { %6180 = vst [vmem:[#allocation27_spill] sm:$0xff] %v4059_v10  ;;  %v2321_v20 = vmul.f32 %v4059_v10, %v4059_v10 }
 0x120   :  { %v2185_v6 = vadd.f32 %v2184_v44, %v4022_v63  ;;  %v2441_v44 = vadd.f32 %v2440_v9, %v2318_v36  ;;  %v2320_v63 = vmul.f32 %v4052_v55, %v4052_v55  ;;  %6181 = vst [vmem:[#allocation28_spill] sm:$0xff] %v4068_v16 }
 0x121   :  { %v4079_v9 = vpop.f32.mrf.mxu3 }
 0x122   :  { %v2186_v60 = vadd.f32 %v2185_v6, %v4032_v58  ;;  %v2442_v52 = vadd.f32 %v2441_v44, %v2319_v23  ;;  %v4075_v58 = vadd.f32 %v3937_v34, %v3868_v29  ;;  %v4086_v23 = vadd.f32 %v3937_v34, %v3878_v35 }
 0x124   :  { %v2187_v0 = vadd.f32 %v2186_v60, %v4043_v51  ;;  %6182 = vst [vmem:[#allocation29_spill] sm:$0xff] %v4075_v58  ;;  %v2443_v60 = vadd.f32 %v2442_v52, %v2320_v63  ;;  %v2323_v29 = vmul.f32 %v4075_v58, %v4075_v58  ;;  %v3553_v63 = vld [vmem:[%s6068_s0 + $0x1d8] sm:$0xff]  ;;  %v2324_v35 = vmul.f32 %v4086_v23, %v4086_v23 }
 0x125   :  { %v4077_v36 = vpop.f32.mrf.mxu2  ;;  %6183 = vst [vmem:[#allocation30_spill] sm:$0xff] %v4086_v23  ;;  %893 = vmatmul.bf16.gmra.mxu3 %v3553_v63 }
 0x126   :  { %v3886_v43 = vpop.f32.mrf.mxu0  ;;  %v3930_v27 = vpop.f32.mrf.mxu1  ;;  %v2188_v6 = vadd.f32 %v2187_v0, %v4052_v55  ;;  %v2444_v44 = vadd.f32 %v2443_v60, %v2321_v20 }
 0x127   :  { %v4093_v55 = vadd.f32 %v3937_v34, %v3886_v43 }
 0x128   :  { %v2189_v51 = vadd.f32 %v2188_v6, %v4059_v10  ;;  %v2445_v52 = vadd.f32 %v2444_v44, %v2322_v25 }
 0x129   :  { %6184 = vst [vmem:[#allocation31_spill] sm:$0xff] %v4093_v55  ;;  %v2325_v10 = vmul.f32 %v4093_v55, %v4093_v55  ;;  %v4114_v44 = vpop.f32.mrf.mxu3 }
 0x12a   :  { %v2190_v0 = vadd.f32 %v2189_v51, %v4068_v16  ;;  %v2446_v43 = vadd.f32 %v2445_v52, %v2323_v29 }
 0x12c   :  { %v2191_v6 = vadd.f32 %v2190_v0, %v4075_v58  ;;  %v2447_v0 = vadd.f32 %v2446_v43, %v2324_v35 }
 0x12d   :  { %v4123_v52 = vpop.f32.mrf.mxu2 }
 0x12e   :  { %v3900_v57 = vpop.f32.mrf.mxu0  ;;  %v3967_v30 = vpop.f32.mrf.mxu1  ;;  %v2192_v16 = vadd.f32 %v2191_v6, %v4086_v23  ;;  %v2448_v6 = vadd.f32 %v2447_v0, %v2325_v10 }
 0x12f   :  { %v4103_v51 = vadd.f32 %v3937_v34, %v3900_v57 }
 0x130   :  { %v2193_v57 = vadd.f32 %v2192_v16, %v4093_v55 }
 0x131   :  { %6185 = vst [vmem:[#allocation32_spill] sm:$0xff] %v4103_v51  ;;  %v2326_v63 = vmul.f32 %v4103_v51, %v4103_v51 }
 0x132   :  { %v2194_v23 = vadd.f32 %v2193_v57, %v4103_v51 }
 0x133   :  { %v2449_v16 = vadd.f32 %v2448_v6, %v2326_v63 }
 0x136   :  { %v3908_v3 = vpop.f32.mrf.mxu0  ;;  %v4015_v54 = vpop.f32.mrf.mxu1 }
 0x137   :  { %v4112_v25 = vadd.f32 %v3937_v34, %v3908_v3 }
 0x139   :  { %6186 = vst [vmem:[#allocation33_spill] sm:$0xff] %v4112_v25  ;;  %v2327_v3 = vmul.f32 %v4112_v25, %v4112_v25  ;;  %v2195_v43 = vadd.f32 %v2194_v23, %v4112_v25  ;;  %v4148_v23 = vpop.f32.mrf.mxu3 }
 0x13b   :  { %v2450_v0 = vadd.f32 %v2449_v16, %v2327_v3 }
 0x13e   :  { %v3922_v15 = vpop.f32.mrf.mxu0  ;;  %v4061_v49 = vpop.f32.mrf.mxu1 }
 0x13f   :  { %v4121_v29 = vadd.f32 %v3937_v34, %v3922_v15 }
 0x141   :  { %6187 = vst [vmem:[#allocation34_spill] sm:$0xff] %v4121_v29  ;;  %v2328_v55 = vmul.f32 %v4121_v29, %v4121_v29  ;;  %v2196_v57 = vadd.f32 %v2195_v43, %v4121_v29 }
 0x143   :  { %v2451_v6 = vadd.f32 %v2450_v0, %v2328_v55  ;;  %v3554_v55 = vld [vmem:[%s6068_s0 + $0x1e0] sm:$0xff]  ;;  %v4166_v0 = vpop.f32.mrf.mxu2 }
 0x144   :  { %898 = vmatmul.bf16.gmra.mxu3 %v3554_v55 }
 0x146   :  { %v3928_v24 = vpop.f32.mrf.mxu0  ;;  %v4105_v60 = vpop.f32.mrf.mxu1 }
 0x147   :  { %v4130_v35 = vadd.f32 %v3937_v34, %v3928_v24 }
 0x149   :  { %6188 = vst [vmem:[#allocation35_spill] sm:$0xff] %v4130_v35  ;;  %v2329_v51 = vmul.f32 %v4130_v35, %v4130_v35  ;;  %v2197_v25 = vadd.f32 %v2196_v57, %v4130_v35 }
 0x14b   :  { %v2452_v16 = vadd.f32 %v2451_v6, %v2329_v51 }
 0x14e   :  { %v3959_v4 = vpop.f32.mrf.mxu0  ;;  %v4146_v63 = vpop.f32.mrf.mxu1 }
 0x14f   :  { %v4137_v15 = vadd.f32 %v3937_v34, %v3959_v4 }
 0x151   :  { %6189 = vst [vmem:[#allocation36_spill] sm:$0xff] %v4137_v15  ;;  %v2330_v4 = vmul.f32 %v4137_v15, %v4137_v15  ;;  %v2198_v43 = vadd.f32 %v2197_v25, %v4137_v15 }
 0x153   :  { %v2453_v57 = vadd.f32 %v2452_v16, %v2330_v4  ;;  %v4180_v4 = vpop.f32.mrf.mxu3 }
 0x156   :  { %v3997_v32 = vpop.f32.mrf.mxu0 }
 0x157   :  { %v4144_v24 = vadd.f32 %v3937_v34, %v3997_v32 }
 0x159   :  { %6190 = vst [vmem:[#allocation37_spill] sm:$0xff] %v4144_v24  ;;  %v2331_v32 = vmul.f32 %v4144_v24, %v4144_v24  ;;  %v2199_v35 = vadd.f32 %v2198_v43, %v4144_v24 }
 0x15b   :  { %v2454_v6 = vadd.f32 %v2453_v57, %v2331_v32  ;;  %v4188_v32 = vpop.f32.mrf.mxu1 }
 0x15e   :  { %v4034_v47 = vpop.f32.mrf.mxu0 }
 0x15f   :  { %v4155_v3 = vadd.f32 %v3937_v34, %v4034_v47 }
 0x161   :  { %6191 = vst [vmem:[#allocation38_spill] sm:$0xff] %v4155_v3  ;;  %v2332_v47 = vmul.f32 %v4155_v3, %v4155_v3 }
 0x163   :  { %v2455_v16 = vadd.f32 %v2454_v6, %v2332_v47 }
 0x166   :  { %v661_v41 = vpop.f32.mrf.mxu0 }
 0x167   :  { %v4161_v29 = vadd.f32 %v3937_v34, %v661_v41  ;;  %v2200_v41 = vadd.f32 %v2199_v35, %v4155_v3 }
 0x169   :  { %6192 = vst [vmem:[#allocation39_spill] sm:$0xff] %v4161_v29  ;;  %v2333_v15 = vmul.f32 %v4161_v29, %v4161_v29  ;;  %v2201_v43 = vadd.f32 %v2200_v41, %v4161_v29  ;;  %v4196_v41 = vpop.f32.mrf.mxu2 }
 0x16b   :  { %v2456_v35 = vadd.f32 %v2455_v16, %v2333_v15 }
 0x16e   :  { %v664_v20 = vpop.f32.mrf.mxu0 }
 0x16f   :  { %v4172_v51 = vadd.f32 %v3937_v34, %v664_v20 }
 0x171   :  { %6193 = vst [vmem:[#allocation40_spill] sm:$0xff] %v4172_v51  ;;  %v2334_v20 = vmul.f32 %v4172_v51, %v4172_v51  ;;  %v2202_v57 = vadd.f32 %v2201_v43, %v4172_v51  ;;  %v4206_v43 = vpop.f32.mrf.mxu3  ;;  %v6242_v51 = vld [vmem:[#allocation6_spill] sm:$0xff] }
 0x173   :  { %v2457_v3 = vadd.f32 %v2456_v35, %v2334_v20  ;;  %v4210_v20 = vadd.f32 %v3937_v34, %v3739_v40  ;;  %v3555_v40 = vld [vmem:[%s6068_s0 + $0x1e8] sm:$0xff] }
 0x174   :  { %903 = vmatmul.bf16.gmra.mxu3 %v3555_v40  ;;  %v4256_v40 = vadd.f32 %v3937_v34, %v3792_v61  ;;  %v4272_v61 = vadd.f32 %v3937_v34, %v3816_v7 }
 0x175   :  { %6198 = vst [vmem:[#allocation45_spill] sm:$0xff] %v4210_v20 }
 0x176   :  { %v666_v10 = vpop.f32.mrf.mxu0  ;;  %6203 = vst [vmem:[#allocation50_spill] sm:$0xff] %v4256_v40  ;;  %v2346_v7 = vmul.f32 %v4272_v61, %v4272_v61 }
 0x177   :  { %v4178_v58 = vadd.f32 %v3937_v34, %v666_v10  ;;  %6205 = vst [vmem:[#allocation52_spill] sm:$0xff] %v4272_v61 }
 0x179   :  { %6194 = vst [vmem:[#allocation41_spill] sm:$0xff] %v4178_v58  ;;  %v2335_v10 = vmul.f32 %v4178_v58, %v4178_v58  ;;  %v2203_v24 = vadd.f32 %v2202_v57, %v4178_v58 }
 0x17b   :  { %v2458_v29 = vadd.f32 %v2457_v3, %v2335_v10 }
 0x17e   :  { %v669_v25 = vpop.f32.mrf.mxu0 }
 0x17f   :  { %v4186_v55 = vadd.f32 %v3937_v34, %v669_v25  ;;  %v4200_v25 = vadd.f32 %v3937_v34, %v3732_v37 }
 0x181   :  { %6195 = vst [vmem:[#allocation42_spill] sm:$0xff] %v4186_v55  ;;  %v2336_v47 = vmul.f32 %v4186_v55, %v4186_v55  ;;  %v2204_v15 = vadd.f32 %v2203_v24, %v4186_v55  ;;  %v2338_v37 = vmul.f32 %v4200_v25, %v4200_v25  ;;  %v4219_v24 = vadd.f32 %v3937_v34, %v3752_v45  ;;  %v4243_v55 = vpop.f32.mrf.mxu3 }
 0x182   :  { %6196 = vst [vmem:[#allocation43_spill] sm:$0xff] %v4200_v25 }
 0x183   :  { %v2459_v35 = vadd.f32 %v2458_v29, %v2336_v47  ;;  %6199 = vst [vmem:[#allocation46_spill] sm:$0xff] %v4219_v24  ;;  %v4225_v29 = vpop.f32.mrf.mxu1  ;;  %v2339_v47 = vmul.f32 %v4210_v20, %v4210_v20 }
 0x186   :  { %v671_v6 = vpop.f32.mrf.mxu0 }
 0x187   :  { %v4204_v16 = vadd.f32 %v3937_v34, %v671_v6  ;;  %v4231_v6 = vadd.f32 %v3937_v34, %v3759_v48 }
 0x189   :  { %6197 = vst [vmem:[#allocation44_spill] sm:$0xff] %v4204_v16  ;;  %v2205_v57 = vadd.f32 %v2204_v15, %v4204_v16  ;;  %v2337_v58 = vmul.f32 %v4204_v16, %v4204_v16  ;;  %v4241_v16 = vpop.f32.mrf.mxu2  ;;  %v2341_v48 = vmul.f32 %v4231_v6, %v4231_v6 }
 0x18a   :  { %6200 = vst [vmem:[#allocation47_spill] sm:$0xff] %v4231_v6 }
 0x18b   :  { %v2206_v3 = vadd.f32 %v2205_v57, %v4200_v25  ;;  %v2460_v10 = vadd.f32 %v2459_v35, %v2337_v58  ;;  %v2340_v58 = vmul.f32 %v4219_v24, %v4219_v24  ;;  %v4238_v35 = vadd.f32 %v3937_v34, %v3772_v53 }
 0x18d   :  { %v2207_v15 = vadd.f32 %v2206_v3, %v4210_v20  ;;  %v2461_v45 = vadd.f32 %v2460_v10, %v2338_v37  ;;  %6201 = vst [vmem:[#allocation48_spill] sm:$0xff] %v4238_v35  ;;  %v4249_v37 = vadd.f32 %v3937_v34, %v3779_v56  ;;  %v2342_v53 = vmul.f32 %v4238_v35, %v4238_v35  ;;  %v6240_v20 = vld [vmem:[#allocation5_spill] sm:$0xff] }
 0x18e   :  { %v4263_v56 = vadd.f32 %v3937_v34, %v3801_v1  ;;  %v4279_v1 = vadd.f32 %v3937_v34, %v3825_v11 }
 0x18f   :  { %v2208_v57 = vadd.f32 %v2207_v15, %v4219_v24  ;;  %v2462_v25 = vadd.f32 %v2461_v45, %v2339_v47  ;;  %6202 = vst [vmem:[#allocation49_spill] sm:$0xff] %v4249_v37  ;;  %v2343_v45 = vmul.f32 %v4249_v37, %v4249_v37  ;;  %v6238_v24 = vld [vmem:[#allocation4_spill] sm:$0xff] }
 0x190   :  { %6204 = vst [vmem:[#allocation51_spill] sm:$0xff] %v4263_v56  ;;  %v2347_v11 = vmul.f32 %v4279_v1, %v4279_v1 }
 0x191   :  { %v2209_v3 = vadd.f32 %v2208_v57, %v4231_v6  ;;  %v2463_v10 = vadd.f32 %v2462_v25, %v2340_v58  ;;  %v4266_v58 = vpop.f32.mrf.mxu1  ;;  %v2344_v6 = vmul.f32 %v4256_v40, %v4256_v40  ;;  %6206 = vst [vmem:[#allocation53_spill] sm:$0xff] %v4279_v1 }
 0x193   :  { %v2210_v47 = vadd.f32 %v2209_v3, %v4238_v35  ;;  %v2464_v15 = vadd.f32 %v2463_v10, %v2341_v48  ;;  %v2345_v10 = vmul.f32 %v4263_v56, %v4263_v56 }
 0x195   :  { %v2211_v57 = vadd.f32 %v2210_v47, %v4249_v37  ;;  %v2465_v25 = vadd.f32 %v2464_v15, %v2342_v53  ;;  %v4282_v15 = vpop.f32.mrf.mxu2  ;;  %v4284_v37 = vpop.f32.mrf.mxu3 }
 0x197   :  { %v2212_v48 = vadd.f32 %v2211_v57, %v4256_v40  ;;  %v2466_v3 = vadd.f32 %v2465_v25, %v2343_v45  ;;  %v4290_v45 = vadd.f32 %v3937_v34, %v3840_v17  ;;  %v4304_v17 = vadd.f32 %v3937_v34, %v3866_v28 }
 0x198   :  { %v4320_v28 = vadd.f32 %v3937_v34, %v3888_v46 }
 0x199   :  { %v2213_v53 = vadd.f32 %v2212_v48, %v4263_v56  ;;  %v2467_v47 = vadd.f32 %v2466_v3, %v2344_v6  ;;  %6207 = vst [vmem:[#allocation54_spill] sm:$0xff] %v4290_v45  ;;  %v4297_v6 = vadd.f32 %v3937_v34, %v3849_v21  ;;  %v2348_v56 = vmul.f32 %v4290_v45, %v4290_v45 }
 0x19a   :  { %6209 = vst [vmem:[#allocation56_spill] sm:$0xff] %v4304_v17  ;;  %v4313_v21 = vadd.f32 %v3937_v34, %v3880_v38  ;;  %v2352_v46 = vmul.f32 %v4320_v28, %v4320_v28 }
 0x19b   :  { %v2214_v57 = vadd.f32 %v2213_v53, %v4272_v61  ;;  %v2468_v25 = vadd.f32 %v2467_v47, %v2345_v10  ;;  %6208 = vst [vmem:[#allocation55_spill] sm:$0xff] %v4297_v6  ;;  %v4307_v47 = vpop.f32.mrf.mxu1  ;;  %v2349_v61 = vmul.f32 %v4297_v6, %v4297_v6 }
 0x19c   :  { %6210 = vst [vmem:[#allocation57_spill] sm:$0xff] %v4313_v21  ;;  %v2351_v38 = vmul.f32 %v4313_v21, %v4313_v21 }
 0x19d   :  { %v2215_v48 = vadd.f32 %v2214_v57, %v4279_v1  ;;  %v2469_v3 = vadd.f32 %v2468_v25, %v2346_v7  ;;  %v2350_v25 = vmul.f32 %v4304_v17, %v4304_v17  ;;  %6211 = vst [vmem:[#allocation58_spill] sm:$0xff] %v4320_v28 }
 0x19f   :  { %v2216_v53 = vadd.f32 %v2215_v48, %v4290_v45  ;;  %v2470_v10 = vadd.f32 %v2469_v3, %v2347_v11  ;;  %v4323_v3 = vpop.f32.mrf.mxu2  ;;  %v4325_v45 = vpop.f32.mrf.mxu3 }
 0x1a1   :  { %v2471_v7 = vadd.f32 %v2470_v10, %v2348_v56  ;;  %v2217_v57 = vadd.f32 %v2216_v53, %v4297_v6  ;;  %v4331_v56 = vadd.f32 %v3937_v34, %v3904_v59  ;;  %v4345_v59 = vadd.f32 %v3937_v34, %v3930_v27 }
 0x1a2   :  { %v4359_v27 = vadd.f32 %v3937_v34, %v4015_v54 }
 0x1a3   :  { %v2218_v11 = vadd.f32 %v2217_v57, %v4304_v17  ;;  %v2472_v48 = vadd.f32 %v2471_v7, %v2349_v61  ;;  %6212 = vst [vmem:[#allocation59_spill] sm:$0xff] %v4331_v56  ;;  %v4338_v61 = vadd.f32 %v3937_v34, %v3917_v13  ;;  %v2353_v17 = vmul.f32 %v4331_v56, %v4331_v56 }
 0x1a4   :  { %6214 = vst [vmem:[#allocation61_spill] sm:$0xff] %v4345_v59  ;;  %v4352_v13 = vadd.f32 %v3937_v34, %v3967_v30  ;;  %v2357_v54 = vmul.f32 %v4359_v27, %v4359_v27 }
 0x1a5   :  { %v2219_v53 = vadd.f32 %v2218_v11, %v4313_v21  ;;  %v2473_v10 = vadd.f32 %v2472_v48, %v2350_v25  ;;  %6213 = vst [vmem:[#allocation60_spill] sm:$0xff] %v4338_v61  ;;  %v741_v48 = vpop.f32.mrf.mxu1  ;;  %v2354_v21 = vmul.f32 %v4338_v61, %v4338_v61 }
 0x1a6   :  { %6215 = vst [vmem:[#allocation62_spill] sm:$0xff] %v4352_v13  ;;  %v2356_v30 = vmul.f32 %v4352_v13, %v4352_v13 }
 0x1a7   :  { %v2220_v7 = vadd.f32 %v2219_v53, %v4320_v28  ;;  %v2474_v57 = vadd.f32 %v2473_v10, %v2351_v38  ;;  %v2355_v10 = vmul.f32 %v4345_v59, %v4345_v59  ;;  %6216 = vst [vmem:[#allocation63_spill] sm:$0xff] %v4359_v27 }
 0x1a9   :  { %v2221_v11 = vadd.f32 %v2220_v7, %v4331_v56  ;;  %v2475_v25 = vadd.f32 %v2474_v57, %v2352_v46  ;;  %v4362_v57 = vpop.f32.mrf.mxu2  ;;  %v4364_v56 = vpop.f32.mrf.mxu3 }
 0x1ab   :  { %v2222_v38 = vadd.f32 %v2221_v11, %v4338_v61  ;;  %v2476_v53 = vadd.f32 %v2475_v25, %v2353_v17  ;;  %v4370_v17 = vadd.f32 %v3937_v34, %v4061_v49  ;;  %v4384_v49 = vadd.f32 %v3937_v34, %v4146_v63 }
 0x1ad   :  { %v2223_v46 = vadd.f32 %v2222_v38, %v4345_v59  ;;  %v2477_v7 = vadd.f32 %v2476_v53, %v2354_v21  ;;  %6217 = vst [vmem:[#allocation64_spill] sm:$0xff] %v4370_v17  ;;  %v4377_v21 = vadd.f32 %v3937_v34, %v4105_v60  ;;  %v2358_v59 = vmul.f32 %v4370_v17, %v4370_v17 }
 0x1ae   :  { %6219 = vst [vmem:[#allocation66_spill] sm:$0xff] %v4384_v49  ;;  %v4391_v60 = vadd.f32 %v3937_v34, %v4188_v32 }
 0x1af   :  { %v2224_v11 = vadd.f32 %v2223_v46, %v4352_v13  ;;  %v2478_v25 = vadd.f32 %v2477_v7, %v2355_v10  ;;  %6218 = vst [vmem:[#allocation65_spill] sm:$0xff] %v4377_v21  ;;  %v744_v7 = vpop.f32.mrf.mxu1  ;;  %v2359_v13 = vmul.f32 %v4377_v21, %v4377_v21 }
 0x1b0   :  { %6220 = vst [vmem:[#allocation67_spill] sm:$0xff] %v4391_v60 }
 0x1b1   :  { %v2225_v38 = vadd.f32 %v2224_v11, %v4359_v27  ;;  %v2479_v53 = vadd.f32 %v2478_v25, %v2356_v30  ;;  %v2360_v25 = vmul.f32 %v4384_v49, %v4384_v49 }
 0x1b3   :  { %v2226_v46 = vadd.f32 %v2225_v38, %v4370_v17  ;;  %v2480_v10 = vadd.f32 %v2479_v53, %v2357_v54  ;;  %v4399_v54 = vadd.f32 %v3937_v34, %v4225_v29  ;;  %v4401_v38 = vpop.f32.mrf.mxu2  ;;  %v4403_v53 = vpop.f32.mrf.mxu3 }
 0x1b5   :  { %v2227_v30 = vadd.f32 %v2226_v46, %v4377_v21  ;;  %v2481_v11 = vadd.f32 %v2480_v10, %v2358_v59  ;;  %6221 = vst [vmem:[#allocation68_spill] sm:$0xff] %v4399_v54  ;;  %v2361_v46 = vmul.f32 %v4391_v60, %v4391_v60  ;;  %v4410_v10 = vadd.f32 %v3937_v34, %v4266_v58  ;;  %v6233_v21 = vld [vmem:[#allocation13_spill] sm:$0xff] }
 0x1b6   :  { %v2362_v29 = vmul.f32 %v4399_v54, %v4399_v54 }
 0x1b7   :  { %v2228_v63 = vadd.f32 %v2227_v30, %v4384_v49  ;;  %v2482_v27 = vadd.f32 %v2481_v11, %v2359_v13  ;;  %6222 = vst [vmem:[#allocation69_spill] sm:$0xff] %v4410_v10  ;;  %v4417_v11 = vadd.f32 %v3937_v34, %v4307_v47  ;;  %v746_v58 = vpop.f32.mrf.mxu1 }
 0x1b9   :  { %v2229_v32 = vadd.f32 %v2228_v63, %v4391_v60  ;;  %v2483_v59 = vadd.f32 %v2482_v27, %v2360_v25  ;;  %6223 = vst [vmem:[#allocation70_spill] sm:$0xff] %v4417_v11  ;;  %v2363_v27 = vmul.f32 %v4410_v10, %v4410_v10  ;;  %v4423_v25 = vadd.f32 %v3937_v34, %v741_v48  ;;  %v6232_v60 = vld [vmem:[#allocation11_spill] sm:$0xff] }
 0x1bb   :  { %v2484_v30 = vadd.f32 %v2483_v59, %v2361_v46  ;;  %v2230_v13 = vadd.f32 %v2229_v32, %v4399_v54  ;;  %6224 = vst [vmem:[#allocation71_spill] sm:$0xff] %v4423_v25  ;;  %v2364_v59 = vmul.f32 %v4417_v11, %v4417_v11  ;;  %v4429_v54 = vadd.f32 %v3937_v34, %v744_v7  ;;  %v4437_v48 = vpop.f32.mrf.mxu2 }
 0x1bd   :  { %v2485_v49 = vadd.f32 %v2484_v30, %v2362_v29  ;;  %v2231_v63 = vadd.f32 %v2230_v13, %v4410_v10  ;;  %6225 = vst [vmem:[#allocation72_spill] sm:$0xff] %v4429_v54  ;;  %v2365_v13 = vmul.f32 %v4423_v25, %v4423_v25  ;;  %v4435_v29 = vadd.f32 %v3937_v34, %v746_v58 }
 0x1bf   :  { %v2486_v46 = vadd.f32 %v2485_v49, %v2363_v27  ;;  %v2232_v32 = vadd.f32 %v2231_v63, %v4417_v11  ;;  %6226 = vst [vmem:[#allocation73_spill] sm:$0xff] %v4435_v29  ;;  %v4439_v49 = vpop.f32.mrf.mxu3  ;;  %v4443_v63 = vadd.f32 %v3937_v34, %v3794_v62  ;;  %v6231_v11 = vld [vmem:[#allocation9_spill] sm:$0xff] }
 0x1c1   :  { %v2487_v47 = vadd.f32 %v2486_v46, %v2364_v59  ;;  %v2233_v30 = vadd.f32 %v2232_v32, %v4423_v25  ;;  %6227 = vst [vmem:[#allocation74_spill] sm:$0xff] %v4443_v63  ;;  %v2366_v46 = vmul.f32 %v4429_v54, %v4429_v54  ;;  %v4450_v32 = vadd.f32 %v3937_v34, %v3803_v2 }
 0x1c2   :  { %v2367_v25 = vmul.f32 %v4435_v29, %v4435_v29  ;;  %v2368_v62 = vmul.f32 %v4443_v63, %v4443_v63 }
 0x1c3   :  { %v2488_v27 = vadd.f32 %v2487_v47, %v2365_v13  ;;  %v2234_v7 = vadd.f32 %v2233_v30, %v4429_v54  ;;  %6228 = vst [vmem:[#allocation75_spill] sm:$0xff] %v4450_v32  ;;  %v4459_v47 = vadd.f32 %v3937_v34, %v3818_v8  ;;  %v2369_v2 = vmul.f32 %v4450_v32, %v4450_v32  ;;  %v6230_v54 = vld [vmem:[#allocation7_spill] sm:$0xff] }
 0x1c4   :  { %v4473_v8 = vadd.f32 %v3937_v34, %v3842_v18 }
 0x1c5   :  { %v2489_v58 = vadd.f32 %v2488_v27, %v2366_v46  ;;  %v2235_v59 = vadd.f32 %v2234_v7, %v4435_v29  ;;  %6229 = vst [vmem:[#allocation76_spill] sm:$0xff] %v4459_v47  ;;  %v4466_v27 = vadd.f32 %v3937_v34, %v3827_v12  ;;  %v2370_v29 = vmul.f32 %v4459_v47, %v4459_v47 }
 0x1c6   :  { %v2372_v18 = vmul.f32 %v4473_v8, %v4473_v8 }
 0x1c7   :  { %v2236_v30 = vadd.f32 %v2235_v59, %v4443_v63  ;;  %v2490_v13 = vadd.f32 %v2489_v58, %v2367_v25  ;;  %v4476_v58 = vpop.f32.mrf.mxu2  ;;  %v4478_v63 = vpop.f32.mrf.mxu3  ;;  %v2371_v12 = vmul.f32 %v4466_v27, %v4466_v27 }
 0x1c9   :  { %v2237_v7 = vadd.f32 %v2236_v30, %v4450_v32  ;;  %v2491_v46 = vadd.f32 %v2490_v13, %v2368_v62  ;;  %v4484_v62 = vadd.f32 %v3937_v34, %v3851_v22  ;;  %v4498_v22 = vadd.f32 %v3937_v34, %v3870_v31 }
 0x1ca   :  { %v4512_v31 = vadd.f32 %v3937_v34, %v3892_v50 }
 0x1cb   :  { %v2238_v59 = vadd.f32 %v2237_v7, %v4459_v47  ;;  %v2492_v25 = vadd.f32 %v2491_v46, %v2369_v2  ;;  %v4491_v2 = vadd.f32 %v3937_v34, %v3861_v26  ;;  %v2373_v47 = vmul.f32 %v4484_v62, %v4484_v62 }
 0x1cc   :  { %v4505_v26 = vadd.f32 %v3937_v34, %v3884_v42  ;;  %v2377_v50 = vmul.f32 %v4512_v31, %v4512_v31 }
 0x1cd   :  { %v2239_v30 = vadd.f32 %v2238_v59, %v4466_v27  ;;  %v2493_v13 = vadd.f32 %v2492_v25, %v2370_v29  ;;  %v2374_v25 = vmul.f32 %v4491_v2, %v4491_v2 }
 0x1ce   :  { %v2376_v42 = vmul.f32 %v4505_v26, %v4505_v26 }
 0x1cf   :  { %v2240_v7 = vadd.f32 %v2239_v30, %v4473_v8  ;;  %v2494_v46 = vadd.f32 %v2493_v13, %v2371_v12  ;;  %v2375_v13 = vmul.f32 %v4498_v22, %v4498_v22  ;;  %v4517_v32 = vpop.f32.mrf.mxu3 }
 0x1d1   :  { %v2241_v59 = vadd.f32 %v2240_v7, %v4484_v62  ;;  %v2495_v29 = vadd.f32 %v2494_v46, %v2372_v18  ;;  %v4515_v46 = vpop.f32.mrf.mxu2 }
 0x1d3   :  { %v2242_v30 = vadd.f32 %v2241_v59, %v4491_v2  ;;  %v2496_v12 = vadd.f32 %v2495_v29, %v2373_v47  ;;  %v4523_v47 = vadd.f32 %v3937_v34, %v6230_v54  ;;  %v4537_v54 = vadd.f32 %v3937_v34, %v6232_v60 }
 0x1d4   :  { %v4551_v60 = vadd.f32 %v3937_v34, %v3988_v5 }
 0x1d5   :  { %v2243_v7 = vadd.f32 %v2242_v30, %v4498_v22  ;;  %v2497_v18 = vadd.f32 %v2496_v12, %v2374_v25  ;;  %v4530_v25 = vadd.f32 %v3937_v34, %v6231_v11  ;;  %v2378_v10 = vmul.f32 %v4523_v47, %v4523_v47 }
 0x1d6   :  { %v4544_v11 = vadd.f32 %v3937_v34, %v6233_v21  ;;  %v2382_v5 = vmul.f32 %v4551_v60, %v4551_v60 }
 0x1d7   :  { %v2244_v59 = vadd.f32 %v2243_v7, %v4505_v26  ;;  %v2498_v29 = vadd.f32 %v2497_v18, %v2375_v13  ;;  %v2379_v18 = vmul.f32 %v4530_v25, %v4530_v25 }
 0x1d8   :  { %v2381_v21 = vmul.f32 %v4544_v11, %v4544_v11 }
 0x1d9   :  { %v2245_v30 = vadd.f32 %v2244_v59, %v4512_v31  ;;  %v2499_v12 = vadd.f32 %v2498_v29, %v2376_v42  ;;  %v2380_v59 = vmul.f32 %v4537_v54, %v4537_v54 }
 0x1db   :  { %v2246_v7 = vadd.f32 %v2245_v30, %v4523_v47  ;;  %v2500_v13 = vadd.f32 %v2499_v12, %v2377_v50  ;;  %v819_v30 = vpop.f32.mrf.mxu2  ;;  %v4554_v12 = vpop.f32.mrf.mxu3 }
 0x1dd   :  { %v2501_v17 = vadd.f32 %v2500_v13, %v2378_v10  ;;  %v2247_v42 = vadd.f32 %v2246_v7, %v4530_v25  ;;  %v4560_v10 = vadd.f32 %v3937_v34, %v4036_v19  ;;  %v4574_v19 = vadd.f32 %v3937_v34, %v4123_v52 }
 0x1de   :  { %v4588_v52 = vadd.f32 %v3937_v34, %v4196_v41 }
 0x1df   :  { %v2248_v29 = vadd.f32 %v2247_v42, %v4537_v54  ;;  %v2502_v50 = vadd.f32 %v2501_v17, %v2379_v18  ;;  %v4567_v42 = vadd.f32 %v3937_v34, %v4077_v36  ;;  %v2383_v61 = vmul.f32 %v4560_v10, %v4560_v10 }
 0x1e0   :  { %v4581_v36 = vadd.f32 %v3937_v34, %v4166_v0  ;;  %v2387_v41 = vmul.f32 %v4588_v52, %v4588_v52 }
 0x1e1   :  { %v2249_v7 = vadd.f32 %v2248_v29, %v4544_v11  ;;  %v2503_v13 = vadd.f32 %v2502_v50, %v2380_v59  ;;  %v2384_v50 = vmul.f32 %v4567_v42, %v4567_v42 }
 0x1e2   :  { %v2386_v0 = vmul.f32 %v4581_v36, %v4581_v36 }
 0x1e3   :  { %v2250_v17 = vadd.f32 %v2249_v7, %v4551_v60  ;;  %v2504_v18 = vadd.f32 %v2503_v13, %v2381_v21  ;;  %v2385_v13 = vmul.f32 %v4574_v19, %v4574_v19  ;;  %v4591_v28 = vpop.f32.mrf.mxu3 }
 0x1e5   :  { %v2251_v29 = vadd.f32 %v2250_v17, %v4560_v10  ;;  %v2505_v59 = vadd.f32 %v2504_v18, %v2382_v5  ;;  %v821_v18 = vpop.f32.mrf.mxu2 }
 0x1e7   :  { %v2252_v7 = vadd.f32 %v2251_v29, %v4567_v42  ;;  %v2506_v21 = vadd.f32 %v2505_v59, %v2383_v61  ;;  %v4597_v29 = vadd.f32 %v3937_v34, %v4241_v16  ;;  %v4611_v16 = vadd.f32 %v3937_v34, %v4323_v3 }
 0x1e9   :  { %v2253_v17 = vadd.f32 %v2252_v7, %v4574_v19  ;;  %v2507_v5 = vadd.f32 %v2506_v21, %v2384_v50  ;;  %v4604_v7 = vadd.f32 %v3937_v34, %v4282_v15  ;;  %v2388_v6 = vmul.f32 %v4597_v29, %v4597_v29 }
 0x1ea   :  { %v4618_v15 = vadd.f32 %v3937_v34, %v4362_v57 }
 0x1eb   :  { %v2254_v61 = vadd.f32 %v2253_v17, %v4581_v36  ;;  %v2508_v59 = vadd.f32 %v2507_v5, %v2385_v13  ;;  %v2389_v5 = vmul.f32 %v4604_v7, %v4604_v7 }
 0x1ec   :  { %v2391_v57 = vmul.f32 %v4618_v15, %v4618_v15 }
 0x1ed   :  { %v2255_v50 = vadd.f32 %v2254_v61, %v4588_v52  ;;  %v2509_v21 = vadd.f32 %v2508_v59, %v2386_v0  ;;  %v2390_v59 = vmul.f32 %v4611_v16, %v4611_v16 }
 0x1ef   :  { %v2256_v17 = vadd.f32 %v2255_v50, %v4597_v29  ;;  %v2510_v13 = vadd.f32 %v2509_v21, %v2387_v41  ;;  %v4626_v50 = vadd.f32 %v3937_v34, %v4401_v38  ;;  %v824_v41 = vpop.f32.mrf.mxu2  ;;  %v4628_v21 = vpop.f32.mrf.mxu3 }
 0x1f1   :  { %v2257_v61 = vadd.f32 %v2256_v17, %v4604_v7  ;;  %v2511_v0 = vadd.f32 %v2510_v13, %v2388_v6  ;;  %v4635_v6 = vadd.f32 %v3937_v34, %v4437_v48  ;;  %v2392_v38 = vmul.f32 %v4626_v50, %v4626_v50 }
 0x1f2   :  { %v4649_v48 = vadd.f32 %v3937_v34, %v4515_v46 }
 0x1f3   :  { %v2258_v1 = vadd.f32 %v2257_v61, %v4611_v16  ;;  %v2512_v3 = vadd.f32 %v2511_v0, %v2389_v5  ;;  %v4642_v61 = vadd.f32 %v3937_v34, %v4476_v58 }
 0x1f5   :  { %v2259_v40 = vadd.f32 %v2258_v1, %v4618_v15  ;;  %v2513_v17 = vadd.f32 %v2512_v3, %v2390_v59  ;;  %v2393_v59 = vmul.f32 %v4635_v6, %v4635_v6 }
 0x1f7   :  { %v2514_v13 = vadd.f32 %v2513_v17, %v2391_v57  ;;  %v2260_v5 = vadd.f32 %v2259_v40, %v4626_v50  ;;  %v2394_v57 = vmul.f32 %v4642_v61, %v4642_v61  ;;  %v4655_v17 = vadd.f32 %v3937_v34, %v819_v30  ;;  %v826_v46 = vpop.f32.mrf.mxu2  ;;  %v4663_v35 = vpop.f32.mrf.mxu3 }
 0x1f8   :  { %v4669_v30 = vadd.f32 %v3937_v34, %v824_v41 }
 0x1f9   :  { %v2515_v0 = vadd.f32 %v2514_v13, %v2392_v38  ;;  %v2261_v1 = vadd.f32 %v2260_v5, %v4635_v6  ;;  %6234 = vst [vmem:[#allocation7_spill] sm:$0xff] %v4655_v17  ;;  %v2395_v5 = vmul.f32 %v4649_v48, %v4649_v48  ;;  %v4661_v38 = vadd.f32 %v3937_v34, %v821_v18 }
 0x1fa   :  { %6236 = vst [vmem:[#allocation11_spill] sm:$0xff] %v4669_v30  ;;  %v4675_v18 = vadd.f32 %v3937_v34, %v826_v46  ;;  %v2398_v41 = vmul.f32 %v4669_v30, %v4669_v30 }
 0x1fb   :  { %v2516_v3 = vadd.f32 %v2515_v0, %v2393_v59  ;;  %v2262_v40 = vadd.f32 %v2261_v1, %v4642_v61  ;;  %6235 = vst [vmem:[#allocation9_spill] sm:$0xff] %v4661_v38  ;;  %v2396_v59 = vmul.f32 %v4655_v17, %v4655_v17 }
 0x1fc   :  { %6237 = vst [vmem:[#allocation13_spill] sm:$0xff] %v4675_v18  ;;  %v2399_v46 = vmul.f32 %v4675_v18, %v4675_v18 }
 0x1fd   :  { %v2517_v58 = vadd.f32 %v2516_v3, %v2394_v57  ;;  %v2263_v13 = vadd.f32 %v2262_v40, %v4649_v48  ;;  %v2397_v57 = vmul.f32 %v4661_v38, %v4661_v38 }
 0x1ff   :  { %v2518_v0 = vadd.f32 %v2517_v58, %v2395_v5  ;;  %v2264_v1 = vadd.f32 %v2263_v13, %v4655_v17  ;;  %v4679_v58 = vadd.f32 %v3937_v34, %v6238_v24 }
 0x201   :  { %v2519_v3 = vadd.f32 %v2518_v0, %v2396_v59  ;;  %v2265_v40 = vadd.f32 %v2264_v1, %v4661_v38  ;;  %6239 = vst [vmem:[#allocation4_spill] sm:$0xff] %v4679_v58  ;;  %v4686_v0 = vadd.f32 %v3937_v34, %v6240_v20  ;;  %v2400_v24 = vmul.f32 %v4679_v58, %v4679_v58 }
 0x203   :  { %v2520_v13 = vadd.f32 %v2519_v3, %v2397_v57  ;;  %v2266_v5 = vadd.f32 %v2265_v40, %v4669_v30  ;;  %6241 = vst [vmem:[#allocation5_spill] sm:$0xff] %v4686_v0  ;;  %v4695_v3 = vadd.f32 %v3937_v34, %v6242_v51  ;;  %v4698_v30 = vpop.f32.mrf.mxu3  ;;  %v2401_v20 = vmul.f32 %v4686_v0, %v4686_v0  ;;  %v6245_v51 = vld [vmem:[#allocation10_spill] sm:$0xff] }
 0x204   :  { %v4711_v17 = vadd.f32 %v3937_v34, %v6245_v51 }
 0x205   :  { %v2521_v1 = vadd.f32 %v2520_v13, %v2398_v41  ;;  %v2267_v59 = vadd.f32 %v2266_v5, %v4675_v18  ;;  %v6243_v13 = vld [vmem:[#allocation8_spill] sm:$0xff]  ;;  %v2402_v38 = vmul.f32 %v4695_v3, %v4695_v3 }
 0x206   :  { %v4704_v5 = vadd.f32 %v3937_v34, %v6243_v13 }
 0x207   :  { %v2268_v40 = vadd.f32 %v2267_v59, %v4679_v58  ;;  %v2522_v57 = vadd.f32 %v2521_v1, %v2399_v46  ;;  %v6246_v58 = vld [vmem:[#allocation12_spill] sm:$0xff] }
 0x208   :  { %6244 = vst [vmem:[#allocation6_spill] sm:$0xff] %v4704_v5  ;;  %v2403_v46 = vmul.f32 %v4704_v5, %v4704_v5  ;;  %v4718_v13 = vadd.f32 %v3937_v34, %v6246_v58  ;;  %v4732_v58 = vadd.f32 %v3937_v34, %v4006_v39 }
 0x209   :  { %v2269_v41 = vadd.f32 %v2268_v40, %v4686_v0  ;;  %v2523_v18 = vadd.f32 %v2522_v57, %v2400_v24  ;;  %v2404_v57 = vmul.f32 %v4711_v17, %v4711_v17  ;;  %v6247_v0 = vld [vmem:[#allocation17_spill] sm:$0xff] }
 0x20a   :  { %v4725_v51 = vadd.f32 %v3937_v34, %v6247_v0  ;;  %v4741_v0 = vadd.f32 %v3937_v34, %v4045_v14  ;;  %v2407_v39 = vmul.f32 %v4732_v58, %v4732_v58  ;;  %v4755_v14 = vadd.f32 %v3937_v34, %v4114_v44 }
 0x20b   :  { %v2270_v1 = vadd.f32 %v2269_v41, %v4695_v3  ;;  %v2524_v59 = vadd.f32 %v2523_v18, %v2401_v20  ;;  %v2405_v20 = vmul.f32 %v4718_v13, %v4718_v13 }
 0x20c   :  { %v2410_v44 = vmul.f32 %v4755_v14, %v4755_v14 }
 0x20d   :  { %v2271_v40 = vadd.f32 %v2270_v1, %v4704_v5  ;;  %v2525_v24 = vadd.f32 %v2524_v59, %v2402_v38  ;;  %v4735_v59 = vpop.f32.mrf.mxu3  ;;  %v2406_v5 = vmul.f32 %v4725_v51, %v4725_v51 }
 0x20f   :  { %v2272_v41 = vadd.f32 %v2271_v40, %v4711_v17  ;;  %v2526_v18 = vadd.f32 %v2525_v24, %v2403_v46  ;;  %v4746_v24 = vadd.f32 %v3937_v34, %v4079_v9 }
 0x211   :  { %v2273_v1 = vadd.f32 %v2272_v41, %v4718_v13  ;;  %v2527_v38 = vadd.f32 %v2526_v18, %v2404_v57  ;;  %6248 = vst [vmem:[#allocation8_spill] sm:$0xff] %v4746_v24  ;;  %v2408_v18 = vmul.f32 %v4741_v0, %v4741_v0  ;;  %v2409_v9 = vmul.f32 %v4746_v24, %v4746_v24 }
 0x213   :  { %v2274_v46 = vadd.f32 %v2273_v1, %v4725_v51  ;;  %v2528_v40 = vadd.f32 %v2527_v38, %v2405_v20  ;;  %v4762_v38 = vadd.f32 %v3937_v34, %v4148_v23 }
 0x215   :  { %v2275_v57 = vadd.f32 %v2274_v46, %v4732_v58  ;;  %v2529_v41 = vadd.f32 %v2528_v40, %v2406_v5  ;;  %v6142_v40 = vmov 0.0   ;;  %v4774_v23 = vpop.f32.mrf.mxu3 }
 0x216   :  { %24 = vst [vmem:[#allocation2] sm:$0x1] %v6142_v40 }
 0x217   :  { %v2276_v1 = vadd.f32 %v2275_v57, %v4741_v0  ;;  %v2530_v20 = vadd.f32 %v2529_v41, %v2407_v39  ;;  %v4770_v57 = vadd.f32 %v3937_v34, %v4180_v4  ;;  %25 = vst [vmem:[#allocation3] sm:$0x1] %v6142_v40 }
 0x219   :  { %v2277_v46 = vadd.f32 %v2276_v1, %v4746_v24  ;;  %v2531_v5 = vadd.f32 %v2530_v20, %v2408_v18  ;;  %v2411_v18 = vmul.f32 %v4762_v38, %v4762_v38  ;;  %v4780_v1 = vadd.f32 %v3937_v34, %v4206_v43 }
 0x21a   :  { %v2412_v4 = vmul.f32 %v4770_v57, %v4770_v57  ;;  %v4794_v43 = vadd.f32 %v3937_v34, %v4284_v37  ;;  %v4808_v37 = vadd.f32 %v3937_v34, %v4364_v56  ;;  %v3592_v56 = vld [vmem:[%s6067_s2] ss:$0 sm:$0xff] }
 0x21b   :  { %v2278_v39 = vadd.f32 %v2277_v46, %v4755_v14  ;;  %v2532_v41 = vadd.f32 %v2531_v5, %v2409_v9  ;;  %6249 = vst [vmem:[#allocation10_spill] sm:$0xff] %v4780_v1  ;;  %v4787_v9 = vadd.f32 %v3937_v34, %v4243_v55  ;;  %v2413_v40 = vmul.f32 %v4780_v1, %v4780_v1 }
 0x21c   :  { %6250 = vst [vmem:[#allocation12_spill] sm:$0xff] %v4794_v43  ;;  %v4801_v55 = vadd.f32 %v3937_v34, %v4325_v45  ;;  %v4815_v45 = vadd.f32 %v3937_v34, %v4403_v53  ;;  %v4830_v53 = vadd.f32 %v3592_v56, %v4478_v63 }
 0x21d   :  { %v2279_v20 = vadd.f32 %v2278_v39, %v4762_v38  ;;  %v2533_v24 = vadd.f32 %v2532_v41, %v2410_v44  ;;  %v2414_v41 = vmul.f32 %v4787_v9, %v4787_v9 }
 0x21e   :  { %6251 = vst [vmem:[#allocation17_spill] sm:$0xff] %v4801_v55  ;;  %v2418_v34 = vmul.f32 %v4815_v45, %v4815_v45 }
 0x21f   :  { %v2534_v46 = vadd.f32 %v2533_v24, %v2411_v18  ;;  %v2280_v5 = vadd.f32 %v2279_v20, %v4770_v57  ;;  %v2415_v20 = vmul.f32 %v4794_v43, %v4794_v43  ;;  %6252 = vst [vmem:[#allocation77_spill] sm:$0xff] %v4815_v45 }
 0x220   :  { %6254 = vst [vmem:[#allocation79_spill] sm:$0xff] %v4830_v53 }
 0x221   :  { %v2281_v39 = vadd.f32 %v2280_v5, %v4780_v1  ;;  %v2535_v44 = vadd.f32 %v2534_v46, %v2412_v4  ;;  %v901_v46 = vpop.f32.mrf.mxu3  ;;  %v2416_v1 = vmul.f32 %v4801_v55, %v4801_v55 }
 0x223   :  { %v2282_v24 = vadd.f32 %v2281_v39, %v4787_v9  ;;  %v2536_v18 = vadd.f32 %v2535_v44, %v2413_v40  ;;  %v2417_v44 = vmul.f32 %v4808_v37, %v4808_v37 }
 0x225   :  { %v2283_v5 = vadd.f32 %v2282_v24, %v4794_v43  ;;  %v2537_v4 = vadd.f32 %v2536_v18, %v2414_v41  ;;  %v4824_v41 = vadd.f32 %v3592_v56, %v4439_v49 }
 0x227   :  { %v2284_v40 = vadd.f32 %v2283_v5, %v4801_v55  ;;  %v2538_v39 = vadd.f32 %v2537_v4, %v2415_v20  ;;  %6253 = vst [vmem:[#allocation78_spill] sm:$0xff] %v4824_v41  ;;  %v2419_v4 = vmul.f32 %v4824_v41, %v4824_v41  ;;  %v4836_v55 = vadd.f32 %v3592_v56, %v4517_v32 }
 0x228   :  { %v4848_v32 = vadd.f32 %v3592_v56, %v4591_v28 }
 0x229   :  { %v2285_v24 = vadd.f32 %v2284_v40, %v4808_v37  ;;  %v2539_v18 = vadd.f32 %v2538_v39, %v2416_v1  ;;  %v4840_v1 = vadd.f32 %v3592_v56, %v4554_v12  ;;  %v2420_v40 = vmul.f32 %v4830_v53, %v4830_v53 }
 0x22b   :  { %v2286_v20 = vadd.f32 %v2285_v24, %v4815_v45  ;;  %v2540_v5 = vadd.f32 %v2539_v18, %v2417_v44  ;;  %v1430_v24 = vlaneseq  ;;  %v904_v44 = vpop.f32.mrf.mxu3  ;;  %v2421_v18 = vmul.f32 %v4836_v55, %v4836_v55 }
 0x22c   :  { %v2422_v12 = vmul.f32 %v4840_v1, %v4840_v1  ;;  %v4861_v45 = vadd.f32 %v3592_v56, %v4663_v35 }
 0x22d   :  { %v2287_v49 = vadd.f32 %v2286_v20, %v4824_v41  ;;  %v2541_v43 = vadd.f32 %v2540_v5, %v2418_v34  ;;  %v4854_v5 = vadd.f32 %v3592_v56, %v4628_v21 }
 0x22e   :  { %6256 = vst [vmem:[#allocation81_spill] sm:$0xff] %v4861_v45  ;;  %v2425_v35 = vmul.f32 %v4861_v45, %v4861_v45 }
 0x22f   :  { %v2288_v63 = vadd.f32 %v2287_v49, %v4830_v53  ;;  %v2542_v39 = vadd.f32 %v2541_v43, %v2419_v4  ;;  %6255 = vst [vmem:[#allocation80_spill] sm:$0xff] %v4854_v5  ;;  %v1431_v4 = vshrl.u32 %v1430_v24, 7  ;;  %v2423_v53 = vmul.f32 %v4848_v32, %v4848_v32 }
 0x230   :  { %v2424_v21 = vmul.f32 %v4854_v5, %v4854_v5  ;;  %v4870_v24 = vadd.f32 %v3592_v56, %v4735_v59 }
 0x231   :  { %v2289_v20 = vadd.f32 %v2288_v63, %v4836_v55  ;;  %v2543_v34 = vadd.f32 %v2542_v39, %v2420_v40  ;;  %v4864_v40 = vadd.f32 %v3592_v56, %v4698_v30 }
 0x232   :  { %6258 = vst [vmem:[#allocation83_spill] sm:$0xff] %v4870_v24  ;;  %v2427_v59 = vmul.f32 %v4870_v24, %v4870_v24 }
 0x233   :  { %v2290_v49 = vadd.f32 %v2289_v20, %v4840_v1  ;;  %v2544_v43 = vadd.f32 %v2543_v34, %v2421_v18  ;;  %6257 = vst [vmem:[#allocation82_spill] sm:$0xff] %v4864_v40  ;;  %v1554_v18 = vadd.s32 984, %v1431_v4  ;;  %v2426_v30 = vmul.f32 %v4864_v40, %v4864_v40 }
 0x235   :  { %v2291_v41 = vadd.f32 %v2290_v49, %v4848_v32  ;;  %v2545_v28 = vadd.f32 %v2544_v43, %v2422_v12  ;;  %v906_v12 = vpop.f32.mrf.mxu3  ;;  %v4879_v43 = vadd.f32 %v3592_v56, %v4774_v23  ;;  %vm1803_vm0 = vcmp.lt.s32.totalorder %v1554_v18, 988 }
 0x237   :  { %v2292_v63 = vadd.f32 %v2291_v41, %v4854_v5  ;;  %v2546_v39 = vadd.f32 %v2545_v28, %v2423_v53  ;;  %6259 = vst [vmem:[#allocation84_spill] sm:$0xff] %v4879_v43  ;;  %v4884_v28 = vadd.f32 %v3592_v56, %v901_v46  ;;  %v2428_v23 = vmul.f32 %v4879_v43, %v4879_v43 }
 0x239   :  { %v2547_v20 = vadd.f32 %v2546_v39, %v2424_v21  ;;  %v2293_v34 = vadd.f32 %v2292_v63, %v4861_v45  ;;  %6260 = vst [vmem:[#allocation85_spill] sm:$0xff] %v4884_v28  ;;  %v4886_v63 = vadd.f32 %v3592_v56, %v906_v12  ;;  %v6262_v21 = vmov 0.0  }
 0x23a   :  { %v3493_v39 = vsel %vm1803_vm0, 1.0, %v6262_v21 }
 0x23b   :  { %v2548_v49 = vadd.f32 %v2547_v20, %v2425_v35  ;;  %v2294_v41 = vadd.f32 %v2293_v34, %v4864_v40  ;;  %6261 = vst [vmem:[#allocation86_spill] sm:$0xff] %v4886_v63  ;;  %v4892_v34 = vadd.f32 %v3592_v56, %v904_v44  ;;  %v2175_v46 = vmul.f32 %v3493_v39, %v4886_v63  ;;  %v2176_v39 = vld [vmem:[#allocation2] sm:$0x1]  ;;  %v2307_v63 = vld [vmem:[#allocation3] sm:$0x1] }
 0x23d   :  { %v2549_v53 = vadd.f32 %v2548_v49, %v2426_v30  ;;  %v2295_v4 = vadd.f32 %v2294_v41, %v4870_v24  ;;  %6263 = vst [vmem:[#allocation87_spill] sm:$0xff] %v4892_v34  ;;  %v2429_v30 = vmul.f32 %v4884_v28, %v4884_v28  ;;  %v2430_v41 = vmul.f32 %v4892_v34, %v4892_v34 }
 0x23f   :  { %v2550_v45 = vadd.f32 %v2549_v53, %v2427_v59  ;;  %v2296_v20 = vadd.f32 %v2295_v4, %v4879_v43  ;;  %v2431_v4 = vmul.f32 %v2175_v46, %v2175_v46 }
 0x241   :  { %v2551_v18 = vadd.f32 %v2550_v45, %v2428_v23  ;;  %v2297_v35 = vadd.f32 %v2296_v20, %v4884_v28 }
 0x243   :  { %v2552_v12 = vadd.f32 %v2551_v18, %v2429_v30  ;;  %v2298_v49 = vadd.f32 %v2297_v35, %v4892_v34 }
 0x245   :  { %v2553_v59 = vadd.f32 %v2552_v12, %v2430_v41  ;;  %v2299_v53 = vadd.f32 %v2298_v49, %v2175_v46 }
 0x247   :  { %v2300_v21 = vrot.slane %v2299_v53, 4  ;;  %v2554_v56 = vadd.f32 %v2553_v59, %v2431_v4 }
 0x249   :  { %v2301_v44 = vadd.f32 %v2300_v21, %v2299_v53  ;;  %v2555_v45 = vrot.slane %v2554_v56, 4 }
 0x24b   :  { %v2302_v23 = vrot.slane %v2301_v44, 2  ;;  %v2556_v20 = vadd.f32 %v2555_v45, %v2554_v56 }
 0x24d   :  { %v2303_v43 = vadd.f32 %v2302_v23, %v2301_v44  ;;  %v2557_v24 = vrot.slane %v2556_v20, 2 }
 0x24f   :  { %v2304_v28 = vrot.slane %v2303_v43, 1  ;;  %v2558_v40 = vadd.f32 %v2557_v24, %v2556_v20  ;;  %v6264_v20 = vld [vmem:[#allocation15_spill] sm:$0xff] }
 0x251   :  { %v2305_v18 = vadd.f32 %v2304_v28, %v2303_v43  ;;  %v2559_v30 = vrot.slane %v2558_v40, 1 }
 0x253   :  { %v2306_v35 = vadd.f32 %v2305_v18, %v2176_v39  ;;  %v2560_v5 = vadd.f32 %v2559_v30, %v2558_v40  ;;  %v6265_v18 = vld [vmem:[#allocation14_spill] sm:$0xff] }
 0x255   :  { %v2561_v34 = vadd.f32 %v2560_v5, %v2307_v63  ;;  %v2562_v12 = vmul.f32 0.0010121458, %v2306_v35  ;;  %v2567_v5 = vld [vmem:[%s6069_s3] sm:$0x1] }
 0x257   :  { %v2563_v49 = vmul.f32 0.0010121458, %v2561_v34  ;;  %v2564_v46 = vmul.f32 %v2562_v12, %v2562_v12  ;;  %v2580_v34 = vld [vmem:[%s6070_s4] sm:$0x1] }
 0x259   :  { %v2565_v41 = vsub.f32 %v2563_v49, %v2564_v46  ;;  %v6267_v46 = vld [vmem:[#allocation18_spill] sm:$0xff] }
 0x25b   :  { %v2566_v59 = vmax.f32 %v2565_v41, 0.0 }
 0x25d   :  { %v2568_v53 = vadd.f32 1e-05, %v2566_v59  ;;  %v6268_v59 = vld [vmem:[#allocation19_spill] sm:$0xff] }
 0x25f   :  { %3590 = vrsqrt.f32 %v2568_v53  ;;  %vm2575_vm2 = vweird.f32 %v2568_v53 }
 0x265   :  { %v3591_v4 = vpop.eup %3590 }
 0x266   :  { %v2570_v21 = vmul.f32 %v3591_v4, %v2568_v53  ;;  %vm2576_vm1 = vweird.f32 %v3591_v4 }
 0x267   :  { %vm2577_vm3 = vmor %vm2575_vm2, %vm2576_vm1 }
 0x268   :  { %v2571_v56 = vmul.f32 %v3591_v4, %v2570_v21 }
 0x26a   :  { %v2572_v44 = vmul.f32 0.5, %v2571_v56  ;;  %v6271_v56 = vld [vmem:[#allocation21_spill] sm:$0xff] }
 0x26c   :  { %v2573_v45 = vsub.f32 1.5, %v2572_v44  ;;  %v6273_v44 = vld [vmem:[#allocation22_spill] sm:$0xff] }
 0x26e   :  { %v2574_v24 = vmul.f32 %v3591_v4, %v2573_v45 }
 0x270   :  { %v2578_v40 = vsel %vm2577_vm3, %v3591_v4, %v2574_v24  ;;  %v6269_v4 = vld [vmem:[#allocation20_spill] sm:$0xff] }
 0x271   :  { %v2579_v43 = vmul.f32 %v2578_v40, %v2567_v5 }
 0x273   :  { %v2581_v28 = vmul.f32 %v2579_v43, %v2562_v12  ;;  %v4904_v63 = vperm.slane %v2579_v43, 0  ;;  %v6266_v12 = vld [vmem:[#allocation16_spill] sm:$0xff] }
 0x275   :  { %v2582_v23 = vsub.f32 %v2580_v34, %v2581_v28  ;;  %v4911_v39 = vmul.f32 %v4904_v63, %v6264_v20  ;;  %v4915_v30 = vmul.f32 %v4904_v63, %v6265_v18  ;;  %v4919_v35 = vmul.f32 %v4904_v63, %v3954_v33  ;;  %v6275_v34 = vld [vmem:[#allocation7_spill] sm:$0xff]  ;;  %v6276_v20 = vld [vmem:[#allocation9_spill] sm:$0xff] }
 0x276   :  { %v4923_v49 = vmul.f32 %v4904_v63, %v6266_v12  ;;  %v4927_v41 = vmul.f32 %v4904_v63, %v6267_v46  ;;  %v4931_v53 = vmul.f32 %v4904_v63, %v6268_v59  ;;  %v4935_v21 = vmul.f32 %v4904_v63, %v6269_v4  ;;  %v6277_v18 = vld [vmem:[#allocation11_spill] sm:$0xff]  ;;  %v6278_v12 = vld [vmem:[#allocation13_spill] sm:$0xff]  ;;  %v6279_v46 = vld [vmem:[#allocation4_spill] sm:$0xff] }
 0x277   :  { %v4939_v33 = vmul.f32 %v4904_v63, %v6271_v56  ;;  %v4943_v45 = vmul.f32 %v4904_v63, %v6273_v44  ;;  %v4947_v24 = vmul.f32 %v4904_v63, %v4466_v27  ;;  %v4951_v5 = vmul.f32 %v4904_v63, %v4473_v8  ;;  %v6280_v59 = vld [vmem:[#allocation5_spill] sm:$0xff]  ;;  %v6281_v44 = vld [vmem:[#allocation6_spill] sm:$0xff] }
 0x278   :  { %6270 = vst [vmem:[#allocation15_spill] sm:$0xff] %v4935_v21  ;;  %v4955_v40 = vmul.f32 %v4904_v63, %v4484_v62  ;;  %v4959_v43 = vmul.f32 %v4904_v63, %v4491_v2  ;;  %v4963_v28 = vmul.f32 %v4904_v63, %v4498_v22  ;;  %v4967_v27 = vmul.f32 %v4904_v63, %v4505_v26  ;;  %v6289_v21 = vld [vmem:[#allocation77_spill] sm:$0xff] }
 0x279   :  { %6272 = vst [vmem:[#allocation14_spill] sm:$0xff] %v4939_v33  ;;  %v4971_v8 = vmul.f32 %v4904_v63, %v4512_v31  ;;  %v4975_v62 = vmul.f32 %v4904_v63, %v4523_v47  ;;  %v4979_v2 = vmul.f32 %v4904_v63, %v4530_v25  ;;  %v4983_v22 = vmul.f32 %v4904_v63, %v4537_v54  ;;  %v6288_v33 = vld [vmem:[#allocation17_spill] sm:$0xff] }
 0x27a   :  { %6274 = vst [vmem:[#allocation16_spill] sm:$0xff] %v4943_v45  ;;  %v4987_v26 = vmul.f32 %v4904_v63, %v4544_v11  ;;  %v4991_v31 = vmul.f32 %v4904_v63, %v4551_v60  ;;  %v4995_v47 = vmul.f32 %v4904_v63, %v4560_v10  ;;  %v4999_v25 = vmul.f32 %v4904_v63, %v4567_v42  ;;  %v6286_v45 = vld [vmem:[#allocation12_spill] sm:$0xff] }
 0x27b   :  { %v5003_v54 = vmul.f32 %v4904_v63, %v4574_v19  ;;  %v5007_v11 = vmul.f32 %v4904_v63, %v4581_v36  ;;  %v5011_v60 = vmul.f32 %v4904_v63, %v4588_v52  ;;  %v5015_v10 = vmul.f32 %v4904_v63, %v4597_v29 }
 0x27c   :  { %v5019_v42 = vmul.f32 %v4904_v63, %v4604_v7  ;;  %v5023_v19 = vmul.f32 %v4904_v63, %v4611_v16  ;;  %v5027_v36 = vmul.f32 %v4904_v63, %v4618_v15  ;;  %v5031_v52 = vmul.f32 %v4904_v63, %v4626_v50 }
 0x27d   :  { %v5035_v29 = vmul.f32 %v4904_v63, %v4635_v6  ;;  %v5039_v7 = vmul.f32 %v4904_v63, %v4642_v61  ;;  %v5043_v16 = vmul.f32 %v4904_v63, %v4649_v48  ;;  %v5047_v15 = vmul.f32 %v4904_v63, %v6275_v34 }
 0x27e   :  { %v5051_v50 = vmul.f32 %v4904_v63, %v6276_v20  ;;  %v5055_v6 = vmul.f32 %v4904_v63, %v6277_v18  ;;  %v5059_v61 = vmul.f32 %v4904_v63, %v6278_v12  ;;  %v5063_v48 = vmul.f32 %v4904_v63, %v6279_v46 }
 0x27f   :  { %v5067_v4 = vmul.f32 %v4904_v63, %v6280_v59  ;;  %v5071_v56 = vmul.f32 %v4904_v63, %v4695_v3  ;;  %v5075_v34 = vmul.f32 %v4904_v63, %v6281_v44  ;;  %v5079_v20 = vmul.f32 %v4904_v63, %v4711_v17  ;;  %v6282_v59 = vld [vmem:[#allocation8_spill] sm:$0xff]  ;;  %v6283_v44 = vld [vmem:[#allocation10_spill] sm:$0xff] }
 0x280   :  { %v5083_v18 = vmul.f32 %v4904_v63, %v4718_v13  ;;  %v5087_v12 = vmul.f32 %v4904_v63, %v4725_v51  ;;  %v5091_v3 = vmul.f32 %v4904_v63, %v4732_v58  ;;  %v5095_v46 = vmul.f32 %v4904_v63, %v4741_v0 }
 0x281   :  { %v5099_v17 = vmul.f32 %v4904_v63, %v6282_v59  ;;  %v5103_v13 = vmul.f32 %v4904_v63, %v4755_v14  ;;  %v5107_v51 = vmul.f32 %v4904_v63, %v4762_v38  ;;  %v5111_v58 = vmul.f32 %v4904_v63, %v4770_v57 }
 0x282   :  { %v5115_v0 = vmul.f32 %v4904_v63, %v6283_v44  ;;  %v5119_v59 = vmul.f32 %v4904_v63, %v4787_v9  ;;  %v5123_v14 = vmul.f32 %v4904_v63, %v6286_v45  ;;  %v5127_v38 = vmul.f32 %v4904_v63, %v6288_v33  ;;  %v6290_v9 = vld [vmem:[#allocation78_spill] sm:$0xff]  ;;  %v6292_v45 = vld [vmem:[#allocation79_spill] sm:$0xff] }
 0x283   :  { %v5131_v57 = vmul.f32 %v4904_v63, %v4808_v37  ;;  %v5135_v44 = vmul.f32 %v4904_v63, %v6289_v21  ;;  %v5149_v33 = vmul.f32 %v4904_v63, %v4836_v55  ;;  %v5153_v37 = vmul.f32 %v4904_v63, %v4840_v1  ;;  %v6297_v21 = vld [vmem:[#allocation80_spill] sm:$0xff] }
 0x284   :  { %6284 = vst [vmem:[#allocation18_spill] sm:$0xff] %v5115_v0  ;;  %v5137_v0 = vperm.slane %v2582_v23, 0  ;;  %v5157_v23 = vmul.f32 %v4904_v63, %v4848_v32 }
 0x285   :  { %6285 = vst [vmem:[#allocation19_spill] sm:$0xff] %v5119_v59  ;;  %v5141_v59 = vmul.f32 %v4904_v63, %v6290_v9  ;;  %v5161_v9 = vmul.f32 %v4904_v63, %v6297_v21 }
 0x286   :  { %6287 = vst [vmem:[#allocation20_spill] sm:$0xff] %v5123_v14  ;;  %v5145_v14 = vmul.f32 %v4904_v63, %v6292_v45 }
 0x287   :  { %6291 = vst [vmem:[#allocation21_spill] sm:$0xff] %v5141_v59  ;;  %v6299_v59 = vld [vmem:[#allocation81_spill] sm:$0xff] }
 0x288   :  { %6293 = vst [vmem:[#allocation22_spill] sm:$0xff] %v5145_v14  ;;  %v5165_v45 = vmul.f32 %v4904_v63, %v6299_v59  ;;  %v6301_v14 = vld [vmem:[#allocation82_spill] sm:$0xff] }
 0x289   :  { %6294 = vst [vmem:[#allocation7_spill] sm:$0xff] %v5149_v33  ;;  %v5169_v55 = vmul.f32 %v4904_v63, %v6301_v14  ;;  %v6302_v33 = vld [vmem:[#allocation83_spill] sm:$0xff] }
 0x28a   :  { %6295 = vst [vmem:[#allocation9_spill] sm:$0xff] %v5153_v37  ;;  %v5173_v1 = vmul.f32 %v4904_v63, %v6302_v33  ;;  %v6303_v37 = vld [vmem:[#allocation84_spill] sm:$0xff]  ;;  %v5193_v33 = vadd.f32 %v5137_v0, %v4911_v39  ;;  %v5213_v39 = vadd.f32 %v5137_v0, %v4931_v53  ;;  %v5233_v53 = vadd.f32 %v5137_v0, %v4963_v28 }
 0x28b   :  { %6296 = vst [vmem:[#allocation11_spill] sm:$0xff] %v5157_v23  ;;  %v5177_v32 = vmul.f32 %v4904_v63, %v6303_v37  ;;  %v6304_v23 = vld [vmem:[#allocation85_spill] sm:$0xff]  ;;  %v5197_v37 = vadd.f32 %v5137_v0, %v4915_v30  ;;  %v5217_v30 = vadd.f32 %v5137_v0, %v4947_v24  ;;  %v5237_v24 = vadd.f32 %v5137_v0, %v4967_v27 }
 0x28c   :  { %6298 = vst [vmem:[#allocation13_spill] sm:$0xff] %v5161_v9  ;;  %v5181_v21 = vmul.f32 %v4904_v63, %v6304_v23  ;;  %v6305_v9 = vld [vmem:[#allocation87_spill] sm:$0xff]  ;;  %v5201_v23 = vadd.f32 %v5137_v0, %v4919_v35  ;;  %v5221_v35 = vadd.f32 %v5137_v0, %v4951_v5  ;;  %v5241_v5 = vadd.f32 %v5137_v0, %v4971_v8 }
 0x28d   :  { %6300 = vst [vmem:[#allocation4_spill] sm:$0xff] %v5165_v45  ;;  %v5185_v59 = vmul.f32 %v4904_v63, %v6305_v9  ;;  %v6306_v45 = vld [vmem:[#allocation86_spill] sm:$0xff]  ;;  %v5205_v9 = vadd.f32 %v5137_v0, %v4923_v49  ;;  %v5225_v49 = vadd.f32 %v5137_v0, %v4955_v40  ;;  %v5245_v40 = vadd.f32 %v5137_v0, %v4975_v62 }
 0x28e   :  { %v5189_v14 = vmul.f32 %v4904_v63, %v6306_v45  ;;  %v5209_v45 = vadd.f32 %v5137_v0, %v4927_v41  ;;  %v5229_v41 = vadd.f32 %v5137_v0, %v4959_v43  ;;  %v5249_v43 = vadd.f32 %v5137_v0, %v4979_v2 }
 0x28f   :  { %v5253_v28 = vadd.f32 %v5137_v0, %v4983_v22  ;;  %v5257_v27 = vadd.f32 %v5137_v0, %v4987_v26  ;;  %v5261_v8 = vadd.f32 %v5137_v0, %v4991_v31  ;;  %v5265_v62 = vadd.f32 %v5137_v0, %v4995_v47 }
 0x290   :  { %v5269_v2 = vadd.f32 %v5137_v0, %v4999_v25  ;;  %v5273_v22 = vadd.f32 %v5137_v0, %v5003_v54  ;;  %v5277_v26 = vadd.f32 %v5137_v0, %v5007_v11  ;;  %v5281_v31 = vadd.f32 %v5137_v0, %v5011_v60 }
 0x291   :  { %v5285_v47 = vadd.f32 %v5137_v0, %v5015_v10  ;;  %v5289_v25 = vadd.f32 %v5137_v0, %v5019_v42  ;;  %v5293_v54 = vadd.f32 %v5137_v0, %v5023_v19  ;;  %v5297_v11 = vadd.f32 %v5137_v0, %v5027_v36 }
 0x292   :  { %v5301_v60 = vadd.f32 %v5137_v0, %v5031_v52  ;;  %v5305_v10 = vadd.f32 %v5137_v0, %v5035_v29  ;;  %v5309_v42 = vadd.f32 %v5137_v0, %v5039_v7  ;;  %v5313_v19 = vadd.f32 %v5137_v0, %v5043_v16 }
 0x293   :  { %v5317_v36 = vadd.f32 %v5137_v0, %v5047_v15  ;;  %v5321_v52 = vadd.f32 %v5137_v0, %v5051_v50  ;;  %v5325_v29 = vadd.f32 %v5137_v0, %v5055_v6  ;;  %v5329_v7 = vadd.f32 %v5137_v0, %v5059_v61 }
 0x294   :  { %v5333_v16 = vadd.f32 %v5137_v0, %v5063_v48  ;;  %v5337_v15 = vadd.f32 %v5137_v0, %v5067_v4  ;;  %v5341_v50 = vadd.f32 %v5137_v0, %v5071_v56  ;;  %v5345_v6 = vadd.f32 %v5137_v0, %v5075_v34 }
 0x295   :  { %v5349_v61 = vadd.f32 %v5137_v0, %v5079_v20  ;;  %v5353_v48 = vadd.f32 %v5137_v0, %v5083_v18  ;;  %v5357_v4 = vadd.f32 %v5137_v0, %v5087_v12  ;;  %v5361_v56 = vadd.f32 %v5137_v0, %v5091_v3 }
 0x296   :  { %v5365_v34 = vadd.f32 %v5137_v0, %v5095_v46  ;;  %v5369_v20 = vadd.f32 %v5137_v0, %v5099_v17  ;;  %v5373_v18 = vadd.f32 %v5137_v0, %v5103_v13  ;;  %v5377_v12 = vadd.f32 %v5137_v0, %v5107_v51 }
 0x297   :  { %6307 = vst [vmem:[#allocation5_spill] sm:$0xff] %v5361_v56  ;;  %v5381_v3 = vadd.f32 %v5137_v0, %v5111_v58  ;;  %v6310_v56 = vld [vmem:[#allocation18_spill] sm:$0xff]  ;;  %v5397_v51 = vadd.f32 %v5137_v0, %v5127_v38  ;;  %v5401_v58 = vadd.f32 %v5137_v0, %v5131_v57 }
 0x298   :  { %6308 = vst [vmem:[#allocation6_spill] sm:$0xff] %v5365_v34  ;;  %v5385_v46 = vadd.f32 %v5137_v0, %v6310_v56  ;;  %v6312_v34 = vld [vmem:[#allocation19_spill] sm:$0xff]  ;;  %v5405_v56 = vadd.f32 %v5137_v0, %v5135_v44 }
 0x299   :  { %6309 = vst [vmem:[#allocation8_spill] sm:$0xff] %v5369_v20  ;;  %v5389_v17 = vadd.f32 %v5137_v0, %v6312_v34  ;;  %v6314_v20 = vld [vmem:[#allocation20_spill] sm:$0xff] }
 0x29a   :  { %6311 = vst [vmem:[#allocation10_spill] sm:$0xff] %v5385_v46  ;;  %v5393_v13 = vadd.f32 %v5137_v0, %v6314_v20  ;;  %v6319_v46 = vld [vmem:[#allocation21_spill] sm:$0xff] }
 0x29b   :  { %6313 = vst [vmem:[#allocation12_spill] sm:$0xff] %v5389_v17  ;;  %v5409_v34 = vadd.f32 %v5137_v0, %v6319_v46  ;;  %v6321_v17 = vld [vmem:[#allocation22_spill] sm:$0xff] }
 0x29c   :  { %6315 = vst [vmem:[#allocation17_spill] sm:$0xff] %v5393_v13  ;;  %v5413_v20 = vadd.f32 %v5137_v0, %v6321_v17  ;;  %v6322_v13 = vld [vmem:[#allocation7_spill] sm:$0xff] }
 0x29d   :  { %6316 = vst [vmem:[#allocation77_spill] sm:$0xff] %v5397_v51  ;;  %v5417_v38 = vadd.f32 %v5137_v0, %v6322_v13  ;;  %v6323_v51 = vld [vmem:[#allocation9_spill] sm:$0xff]  ;;  %v5437_v13 = vadd.f32 %v5137_v0, %v5169_v55  ;;  %v5457_v55 = vadd.f32 %v5137_v0, %v5189_v14 }
 0x29e   :  { %6317 = vst [vmem:[#allocation78_spill] sm:$0xff] %v5401_v58  ;;  %v5421_v57 = vadd.f32 %v5137_v0, %v6323_v51  ;;  %v6324_v58 = vld [vmem:[#allocation11_spill] sm:$0xff]  ;;  %v5441_v51 = vadd.f32 %v5137_v0, %v5173_v1 }
 0x29f   :  { %6318 = vst [vmem:[#allocation79_spill] sm:$0xff] %v5405_v56  ;;  %v5425_v44 = vadd.f32 %v5137_v0, %v6324_v58  ;;  %v6325_v56 = vld [vmem:[#allocation13_spill] sm:$0xff]  ;;  %v5445_v58 = vadd.f32 %v5137_v0, %v5177_v32  ;;  %v2962_v32 = vmax.f32 %v5197_v37, 0.0 }
 0x2a0   :  { %6320 = vst [vmem:[#allocation80_spill] sm:$0xff] %v5409_v34  ;;  %v5429_v46 = vadd.f32 %v5137_v0, %v6325_v56  ;;  %v6327_v34 = vld [vmem:[#allocation4_spill] sm:$0xff]  ;;  %v5449_v56 = vadd.f32 %v5137_v0, %v5181_v21  ;;  %v6340_v37 = vld [vmem:[#allocation25_spill] sm:$0xff] }
 0x2a1   :  { %v5433_v17 = vadd.f32 %v5137_v0, %v6327_v34  ;;  %6329 = vst [vmem:[#allocation83_spill] sm:$0xff] %v5437_v13  ;;  %v5453_v34 = vadd.f32 %v5137_v0, %v5185_v59  ;;  %v6335_v13 = vld [vmem:[#allocation15_spill] sm:$0xff] }
 0x2a2   :  { %6326 = vst [vmem:[#allocation81_spill] sm:$0xff] %v5429_v46  ;;  %v2843_v1 = vadd.f32 %v5137_v0, %v6335_v13  ;;  %v6338_v46 = vld [vmem:[#allocation24_spill] sm:$0xff] }
 0x2a3   :  { %6328 = vst [vmem:[#allocation82_spill] sm:$0xff] %v5433_v17  ;;  %v6336_v17 = vld [vmem:[#allocation23_spill] sm:$0xff]  ;;  %v2720_v14 = vmul.f32 %v4904_v63, %v6338_v46 }
 0x2a4   :  { %6330 = vst [vmem:[#allocation84_spill] sm:$0xff] %v5441_v51  ;;  %v2961_v51 = vmax.f32 %v5193_v33, 0.0  ;;  %v2719_v21 = vmul.f32 %v4904_v63, %v6336_v17  ;;  %v2965_v33 = vmax.f32 %v5209_v45, 0.0 }
 0x2a5   :  { %6331 = vst [vmem:[#allocation85_spill] sm:$0xff] %v5445_v58  ;;  %v2963_v58 = vmax.f32 %v5201_v23, 0.0  ;;  %v2721_v23 = vmul.f32 %v4904_v63, %v6340_v37  ;;  %v2847_v45 = vadd.f32 %v5137_v0, %v2720_v14 }
 0x2a6   :  { %6332 = vst [vmem:[#allocation87_spill] sm:$0xff] %v5449_v56  ;;  %v6337_v56 = vld [vmem:[#allocation14_spill] sm:$0xff]  ;;  %v2846_v17 = vadd.f32 %v5137_v0, %v2719_v21 }
 0x2a7   :  { %6333 = vst [vmem:[#allocation86_spill] sm:$0xff] %v5453_v34  ;;  %v2844_v59 = vadd.f32 %v5137_v0, %v6337_v56  ;;  %v2964_v34 = vmax.f32 %v5205_v9, 0.0  ;;  %v2966_v56 = vmax.f32 %v5213_v39, 0.0  ;;  %v6341_v9 = vld [vmem:[#allocation26_spill] sm:$0xff]  ;;  %v2848_v21 = vadd.f32 %v5137_v0, %v2721_v23 }
 0x2a8   :  { %6334 = vst [vmem:[#allocation18_spill] sm:$0xff] %v5457_v55  ;;  %v6339_v55 = vld [vmem:[#allocation16_spill] sm:$0xff]  ;;  %v2722_v46 = vmul.f32 %v4904_v63, %v6341_v9 }
 0x2a9   :  { %v2845_v13 = vadd.f32 %v5137_v0, %v6339_v55  ;;  %3085 = vst [vmem:[%s6071_s5] sm:$0xff] %v2961_v51  ;;  %v2967_v55 = vmax.f32 %v2843_v1, 0.0  ;;  %v6342_v51 = vld [vmem:[#allocation27_spill] sm:$0xff]  ;;  %v2968_v39 = vmax.f32 %v2844_v59, 0.0  ;;  %v2970_v59 = vmax.f32 %v2846_v17, 0.0 }
 0x2aa   :  { %3086 = vst [vmem:[%s6071_s5 + $0x8] sm:$0xff] %v2962_v32  ;;  %v2723_v37 = vmul.f32 %v4904_v63, %v6342_v51  ;;  %v6343_v32 = vld [vmem:[#allocation28_spill] sm:$0xff]  ;;  %v2849_v14 = vadd.f32 %v5137_v0, %v2722_v46  ;;  %v2972_v17 = vmax.f32 %v2848_v21, 0.0 }
 0x2ab   :  { %3087 = vst [vmem:[%s6071_s5 + $0x10] sm:$0xff] %v2963_v58  ;;  %v2724_v9 = vmul.f32 %v4904_v63, %v6343_v32  ;;  %v2969_v1 = vmax.f32 %v2845_v13, 0.0  ;;  %v6344_v58 = vld [vmem:[#allocation29_spill] sm:$0xff]  ;;  %v2971_v13 = vmax.f32 %v2847_v45, 0.0 }
 0x2ac   :  { %3088 = vst [vmem:[%s6071_s5 + $0x18] sm:$0xff] %v2964_v34  ;;  %v2725_v51 = vmul.f32 %v4904_v63, %v6344_v58  ;;  %v2850_v23 = vadd.f32 %v5137_v0, %v2723_v37  ;;  %v6345_v34 = vld [vmem:[#allocation30_spill] sm:$0xff]  ;;  %v2973_v45 = vmax.f32 %v2849_v14, 0.0 }
 0x2ad   :  { %3089 = vst [vmem:[%s6071_s5 + $0x20] sm:$0xff] %v2965_v33  ;;  %v2726_v32 = vmul.f32 %v4904_v63, %v6345_v34  ;;  %v2851_v46 = vadd.f32 %v5137_v0, %v2724_v9  ;;  %v6346_v33 = vld [vmem:[#allocation31_spill] sm:$0xff] }
 0x2ae   :  { %3090 = vst [vmem:[%s6071_s5 + $0x28] sm:$0xff] %v2966_v56  ;;  %v2727_v58 = vmul.f32 %v4904_v63, %v6346_v33  ;;  %v2852_v37 = vadd.f32 %v5137_v0, %v2725_v51  ;;  %v6347_v56 = vld [vmem:[#allocation32_spill] sm:$0xff]  ;;  %v2974_v21 = vmax.f32 %v2850_v23, 0.0 }
 0x2af   :  { %3091 = vst [vmem:[%s6071_s5 + $0x30] sm:$0xff] %v2967_v55  ;;  %v2728_v34 = vmul.f32 %v4904_v63, %v6347_v56  ;;  %v2853_v9 = vadd.f32 %v5137_v0, %v2726_v32  ;;  %v6348_v55 = vld [vmem:[#allocation33_spill] sm:$0xff]  ;;  %v2975_v14 = vmax.f32 %v2851_v46, 0.0 }
 0x2b0   :  { %3092 = vst [vmem:[%s6071_s5 + $0x38] sm:$0xff] %v2968_v39  ;;  %v2729_v33 = vmul.f32 %v4904_v63, %v6348_v55  ;;  %v2854_v51 = vadd.f32 %v5137_v0, %v2727_v58  ;;  %v6349_v39 = vld [vmem:[#allocation34_spill] sm:$0xff]  ;;  %v2976_v23 = vmax.f32 %v2852_v37, 0.0 }
 0x2b1   :  { %3093 = vst [vmem:[%s6071_s5 + $0x40] sm:$0xff] %v2969_v1  ;;  %v2730_v56 = vmul.f32 %v4904_v63, %v6349_v39  ;;  %v2855_v32 = vadd.f32 %v5137_v0, %v2728_v34  ;;  %v6350_v1 = vld [vmem:[#allocation35_spill] sm:$0xff]  ;;  %v2977_v46 = vmax.f32 %v2853_v9, 0.0 }
 0x2b2   :  { %3094 = vst [vmem:[%s6071_s5 + $0x48] sm:$0xff] %v2970_v59  ;;  %v2731_v55 = vmul.f32 %v4904_v63, %v6350_v1  ;;  %v2856_v58 = vadd.f32 %v5137_v0, %v2729_v33  ;;  %v6351_v59 = vld [vmem:[#allocation36_spill] sm:$0xff]  ;;  %v2978_v37 = vmax.f32 %v2854_v51, 0.0 }
 0x2b3   :  { %3095 = vst [vmem:[%s6071_s5 + $0x50] sm:$0xff] %v2971_v13  ;;  %v2732_v39 = vmul.f32 %v4904_v63, %v6351_v59  ;;  %v2857_v34 = vadd.f32 %v5137_v0, %v2730_v56  ;;  %v6352_v13 = vld [vmem:[#allocation37_spill] sm:$0xff]  ;;  %v2979_v9 = vmax.f32 %v2855_v32, 0.0 }
 0x2b4   :  { %3096 = vst [vmem:[%s6071_s5 + $0x58] sm:$0xff] %v2972_v17  ;;  %v2733_v1 = vmul.f32 %v4904_v63, %v6352_v13  ;;  %v2858_v33 = vadd.f32 %v5137_v0, %v2731_v55  ;;  %v6353_v17 = vld [vmem:[#allocation38_spill] sm:$0xff]  ;;  %v2980_v51 = vmax.f32 %v2856_v58, 0.0 }
 0x2b5   :  { %3097 = vst [vmem:[%s6071_s5 + $0x60] sm:$0xff] %v2973_v45  ;;  %v2734_v59 = vmul.f32 %v4904_v63, %v6353_v17  ;;  %v2859_v56 = vadd.f32 %v5137_v0, %v2732_v39  ;;  %v6354_v45 = vld [vmem:[#allocation39_spill] sm:$0xff]  ;;  %v2981_v32 = vmax.f32 %v2857_v34, 0.0 }
 0x2b6   :  { %3098 = vst [vmem:[%s6071_s5 + $0x68] sm:$0xff] %v2974_v21  ;;  %v2735_v13 = vmul.f32 %v4904_v63, %v6354_v45  ;;  %v2860_v55 = vadd.f32 %v5137_v0, %v2733_v1  ;;  %v6355_v21 = vld [vmem:[#allocation40_spill] sm:$0xff]  ;;  %v2982_v58 = vmax.f32 %v2858_v33, 0.0 }
 0x2b7   :  { %3099 = vst [vmem:[%s6071_s5 + $0x70] sm:$0xff] %v2975_v14  ;;  %v2736_v17 = vmul.f32 %v4904_v63, %v6355_v21  ;;  %v2861_v39 = vadd.f32 %v5137_v0, %v2734_v59  ;;  %v6356_v14 = vld [vmem:[#allocation41_spill] sm:$0xff]  ;;  %v2983_v34 = vmax.f32 %v2859_v56, 0.0 }
 0x2b8   :  { %3100 = vst [vmem:[%s6071_s5 + $0x78] sm:$0xff] %v2976_v23  ;;  %v2737_v45 = vmul.f32 %v4904_v63, %v6356_v14  ;;  %v2862_v1 = vadd.f32 %v5137_v0, %v2735_v13  ;;  %v6357_v23 = vld [vmem:[#allocation42_spill] sm:$0xff]  ;;  %v2984_v33 = vmax.f32 %v2860_v55, 0.0 }
 0x2b9   :  { %3101 = vst [vmem:[%s6071_s5 + $0x80] sm:$0xff] %v2977_v46  ;;  %v2738_v21 = vmul.f32 %v4904_v63, %v6357_v23  ;;  %v2863_v59 = vadd.f32 %v5137_v0, %v2736_v17  ;;  %v6358_v46 = vld [vmem:[#allocation44_spill] sm:$0xff]  ;;  %v2985_v56 = vmax.f32 %v2861_v39, 0.0 }
 0x2ba   :  { %3102 = vst [vmem:[%s6071_s5 + $0x88] sm:$0xff] %v2978_v37  ;;  %v2739_v14 = vmul.f32 %v4904_v63, %v6358_v46  ;;  %v2864_v13 = vadd.f32 %v5137_v0, %v2737_v45  ;;  %v6359_v37 = vld [vmem:[#allocation43_spill] sm:$0xff]  ;;  %v2986_v55 = vmax.f32 %v2862_v1, 0.0 }
 0x2bb   :  { %3103 = vst [vmem:[%s6071_s5 + $0x90] sm:$0xff] %v2979_v9  ;;  %v2740_v23 = vmul.f32 %v4904_v63, %v6359_v37  ;;  %v2865_v17 = vadd.f32 %v5137_v0, %v2738_v21  ;;  %v6360_v9 = vld [vmem:[#allocation45_spill] sm:$0xff]  ;;  %v2987_v39 = vmax.f32 %v2863_v59, 0.0 }
 0x2bc   :  { %3104 = vst [vmem:[%s6071_s5 + $0x98] sm:$0xff] %v2980_v51  ;;  %v2741_v46 = vmul.f32 %v4904_v63, %v6360_v9  ;;  %v2866_v45 = vadd.f32 %v5137_v0, %v2739_v14  ;;  %v6361_v51 = vld [vmem:[#allocation46_spill] sm:$0xff]  ;;  %v2988_v1 = vmax.f32 %v2864_v13, 0.0 }
 0x2bd   :  { %3105 = vst [vmem:[%s6071_s5 + $0xa0] sm:$0xff] %v2981_v32  ;;  %v2742_v37 = vmul.f32 %v4904_v63, %v6361_v51  ;;  %v2867_v21 = vadd.f32 %v5137_v0, %v2740_v23  ;;  %v6362_v32 = vld [vmem:[#allocation47_spill] sm:$0xff]  ;;  %v2989_v59 = vmax.f32 %v2865_v17, 0.0 }
 0x2be   :  { %3106 = vst [vmem:[%s6071_s5 + $0xa8] sm:$0xff] %v2982_v58  ;;  %v2743_v9 = vmul.f32 %v4904_v63, %v6362_v32  ;;  %v2868_v14 = vadd.f32 %v5137_v0, %v2741_v46  ;;  %v6363_v58 = vld [vmem:[#allocation48_spill] sm:$0xff]  ;;  %v2990_v13 = vmax.f32 %v2866_v45, 0.0 }
 0x2bf   :  { %3107 = vst [vmem:[%s6071_s5 + $0xb0] sm:$0xff] %v2983_v34  ;;  %v2744_v51 = vmul.f32 %v4904_v63, %v6363_v58  ;;  %v2869_v23 = vadd.f32 %v5137_v0, %v2742_v37  ;;  %v6364_v34 = vld [vmem:[#allocation49_spill] sm:$0xff]  ;;  %v2991_v17 = vmax.f32 %v2867_v21, 0.0 }
 0x2c0   :  { %3108 = vst [vmem:[%s6071_s5 + $0xb8] sm:$0xff] %v2984_v33  ;;  %v2745_v32 = vmul.f32 %v4904_v63, %v6364_v34  ;;  %v2870_v46 = vadd.f32 %v5137_v0, %v2743_v9  ;;  %v6365_v33 = vld [vmem:[#allocation50_spill] sm:$0xff]  ;;  %v2992_v45 = vmax.f32 %v2868_v14, 0.0 }
 0x2c1   :  { %3109 = vst [vmem:[%s6071_s5 + $0xc0] sm:$0xff] %v2985_v56  ;;  %v2746_v58 = vmul.f32 %v4904_v63, %v6365_v33  ;;  %v2871_v37 = vadd.f32 %v5137_v0, %v2744_v51  ;;  %v6366_v56 = vld [vmem:[#allocation51_spill] sm:$0xff]  ;;  %v2993_v21 = vmax.f32 %v2869_v23, 0.0 }
 0x2c2   :  { %3110 = vst [vmem:[%s6071_s5 + $0xc8] sm:$0xff] %v2986_v55  ;;  %v2747_v34 = vmul.f32 %v4904_v63, %v6366_v56  ;;  %v2872_v9 = vadd.f32 %v5137_v0, %v2745_v32  ;;  %v6367_v55 = vld [vmem:[#allocation52_spill] sm:$0xff]  ;;  %v2994_v14 = vmax.f32 %v2870_v46, 0.0 }
 0x2c3   :  { %3111 = vst [vmem:[%s6071_s5 + $0xd0] sm:$0xff] %v2987_v39  ;;  %v2748_v33 = vmul.f32 %v4904_v63, %v6367_v55  ;;  %v2873_v51 = vadd.f32 %v5137_v0, %v2746_v58  ;;  %v6368_v39 = vld [vmem:[#allocation53_spill] sm:$0xff]  ;;  %v2995_v23 = vmax.f32 %v2871_v37, 0.0 }
 0x2c4   :  { %3112 = vst [vmem:[%s6071_s5 + $0xd8] sm:$0xff] %v2988_v1  ;;  %v2749_v56 = vmul.f32 %v4904_v63, %v6368_v39  ;;  %v2874_v32 = vadd.f32 %v5137_v0, %v2747_v34  ;;  %v6369_v1 = vld [vmem:[#allocation54_spill] sm:$0xff]  ;;  %v2996_v46 = vmax.f32 %v2872_v9, 0.0 }
 0x2c5   :  { %3113 = vst [vmem:[%s6071_s5 + $0xe0] sm:$0xff] %v2989_v59  ;;  %v2750_v55 = vmul.f32 %v4904_v63, %v6369_v1  ;;  %v2875_v58 = vadd.f32 %v5137_v0, %v2748_v33  ;;  %v6370_v59 = vld [vmem:[#allocation55_spill] sm:$0xff]  ;;  %v2997_v37 = vmax.f32 %v2873_v51, 0.0 }
 0x2c6   :  { %3114 = vst [vmem:[%s6071_s5 + $0xe8] sm:$0xff] %v2990_v13  ;;  %v2751_v39 = vmul.f32 %v4904_v63, %v6370_v59  ;;  %v2876_v34 = vadd.f32 %v5137_v0, %v2749_v56  ;;  %v6371_v13 = vld [vmem:[#allocation56_spill] sm:$0xff]  ;;  %v2998_v9 = vmax.f32 %v2874_v32, 0.0 }
 0x2c7   :  { %3115 = vst [vmem:[%s6071_s5 + $0xf0] sm:$0xff] %v2991_v17  ;;  %v2752_v1 = vmul.f32 %v4904_v63, %v6371_v13  ;;  %v2877_v33 = vadd.f32 %v5137_v0, %v2750_v55  ;;  %v6372_v17 = vld [vmem:[#allocation57_spill] sm:$0xff]  ;;  %v2999_v51 = vmax.f32 %v2875_v58, 0.0 }
 0x2c8   :  { %3116 = vst [vmem:[%s6071_s5 + $0xf8] sm:$0xff] %v2992_v45  ;;  %v2753_v59 = vmul.f32 %v4904_v63, %v6372_v17  ;;  %v2878_v56 = vadd.f32 %v5137_v0, %v2751_v39  ;;  %v6373_v45 = vld [vmem:[#allocation58_spill] sm:$0xff]  ;;  %v3000_v32 = vmax.f32 %v2876_v34, 0.0 }
 0x2c9   :  { %3117 = vst [vmem:[%s6071_s5 + $0x100] sm:$0xff] %v2993_v21  ;;  %v2754_v13 = vmul.f32 %v4904_v63, %v6373_v45  ;;  %v2879_v55 = vadd.f32 %v5137_v0, %v2752_v1  ;;  %v6374_v21 = vld [vmem:[#allocation59_spill] sm:$0xff]  ;;  %v3001_v58 = vmax.f32 %v2877_v33, 0.0 }
 0x2ca   :  { %3118 = vst [vmem:[%s6071_s5 + $0x108] sm:$0xff] %v2994_v14  ;;  %v2755_v17 = vmul.f32 %v4904_v63, %v6374_v21  ;;  %v2880_v39 = vadd.f32 %v5137_v0, %v2753_v59  ;;  %v6375_v14 = vld [vmem:[#allocation60_spill] sm:$0xff]  ;;  %v3002_v34 = vmax.f32 %v2878_v56, 0.0 }
 0x2cb   :  { %3119 = vst [vmem:[%s6071_s5 + $0x110] sm:$0xff] %v2995_v23  ;;  %v2756_v45 = vmul.f32 %v4904_v63, %v6375_v14  ;;  %v2881_v1 = vadd.f32 %v5137_v0, %v2754_v13  ;;  %v6376_v23 = vld [vmem:[#allocation61_spill] sm:$0xff]  ;;  %v3003_v33 = vmax.f32 %v2879_v55, 0.0 }
 0x2cc   :  { %3120 = vst [vmem:[%s6071_s5 + $0x118] sm:$0xff] %v2996_v46  ;;  %v2757_v21 = vmul.f32 %v4904_v63, %v6376_v23  ;;  %v2882_v59 = vadd.f32 %v5137_v0, %v2755_v17  ;;  %v6377_v46 = vld [vmem:[#allocation62_spill] sm:$0xff]  ;;  %v3004_v56 = vmax.f32 %v2880_v39, 0.0 }
 0x2cd   :  { %3121 = vst [vmem:[%s6071_s5 + $0x120] sm:$0xff] %v2997_v37  ;;  %v2758_v14 = vmul.f32 %v4904_v63, %v6377_v46  ;;  %v2883_v13 = vadd.f32 %v5137_v0, %v2756_v45  ;;  %v6378_v37 = vld [vmem:[#allocation63_spill] sm:$0xff]  ;;  %v3005_v55 = vmax.f32 %v2881_v1, 0.0 }
 0x2ce   :  { %3122 = vst [vmem:[%s6071_s5 + $0x128] sm:$0xff] %v2998_v9  ;;  %v2759_v23 = vmul.f32 %v4904_v63, %v6378_v37  ;;  %v2884_v17 = vadd.f32 %v5137_v0, %v2757_v21  ;;  %v6379_v9 = vld [vmem:[#allocation64_spill] sm:$0xff]  ;;  %v3006_v39 = vmax.f32 %v2882_v59, 0.0 }
 0x2cf   :  { %3123 = vst [vmem:[%s6071_s5 + $0x130] sm:$0xff] %v2999_v51  ;;  %v2760_v46 = vmul.f32 %v4904_v63, %v6379_v9  ;;  %v2885_v45 = vadd.f32 %v5137_v0, %v2758_v14  ;;  %v6380_v51 = vld [vmem:[#allocation65_spill] sm:$0xff]  ;;  %v3007_v1 = vmax.f32 %v2883_v13, 0.0 }
 0x2d0   :  { %3124 = vst [vmem:[%s6071_s5 + $0x138] sm:$0xff] %v3000_v32  ;;  %v2761_v37 = vmul.f32 %v4904_v63, %v6380_v51  ;;  %v2886_v21 = vadd.f32 %v5137_v0, %v2759_v23  ;;  %v6381_v32 = vld [vmem:[#allocation66_spill] sm:$0xff]  ;;  %v3008_v59 = vmax.f32 %v2884_v17, 0.0 }
 0x2d1   :  { %3125 = vst [vmem:[%s6071_s5 + $0x140] sm:$0xff] %v3001_v58  ;;  %v2762_v9 = vmul.f32 %v4904_v63, %v6381_v32  ;;  %v2887_v14 = vadd.f32 %v5137_v0, %v2760_v46  ;;  %v6382_v58 = vld [vmem:[#allocation67_spill] sm:$0xff]  ;;  %v3009_v13 = vmax.f32 %v2885_v45, 0.0 }
 0x2d2   :  { %3126 = vst [vmem:[%s6071_s5 + $0x148] sm:$0xff] %v3002_v34  ;;  %v2763_v51 = vmul.f32 %v4904_v63, %v6382_v58  ;;  %v2888_v23 = vadd.f32 %v5137_v0, %v2761_v37  ;;  %v6383_v34 = vld [vmem:[#allocation68_spill] sm:$0xff]  ;;  %v3010_v17 = vmax.f32 %v2886_v21, 0.0 }
 0x2d3   :  { %3127 = vst [vmem:[%s6071_s5 + $0x150] sm:$0xff] %v3003_v33  ;;  %v2764_v32 = vmul.f32 %v4904_v63, %v6383_v34  ;;  %v2889_v46 = vadd.f32 %v5137_v0, %v2762_v9  ;;  %v6384_v33 = vld [vmem:[#allocation69_spill] sm:$0xff]  ;;  %v3011_v45 = vmax.f32 %v2887_v14, 0.0 }
 0x2d4   :  { %3128 = vst [vmem:[%s6071_s5 + $0x158] sm:$0xff] %v3004_v56  ;;  %v2765_v58 = vmul.f32 %v4904_v63, %v6384_v33  ;;  %v2890_v37 = vadd.f32 %v5137_v0, %v2763_v51  ;;  %v6385_v56 = vld [vmem:[#allocation70_spill] sm:$0xff]  ;;  %v3012_v21 = vmax.f32 %v2888_v23, 0.0 }
 0x2d5   :  { %3129 = vst [vmem:[%s6071_s5 + $0x160] sm:$0xff] %v3005_v55  ;;  %v2766_v34 = vmul.f32 %v4904_v63, %v6385_v56  ;;  %v2891_v9 = vadd.f32 %v5137_v0, %v2764_v32  ;;  %v6386_v55 = vld [vmem:[#allocation71_spill] sm:$0xff]  ;;  %v3013_v14 = vmax.f32 %v2889_v46, 0.0 }
 0x2d6   :  { %3130 = vst [vmem:[%s6071_s5 + $0x168] sm:$0xff] %v3006_v39  ;;  %v2767_v33 = vmul.f32 %v4904_v63, %v6386_v55  ;;  %v2892_v51 = vadd.f32 %v5137_v0, %v2765_v58  ;;  %v6387_v39 = vld [vmem:[#allocation72_spill] sm:$0xff]  ;;  %v3014_v23 = vmax.f32 %v2890_v37, 0.0 }
 0x2d7   :  { %3131 = vst [vmem:[%s6071_s5 + $0x170] sm:$0xff] %v3007_v1  ;;  %v2768_v56 = vmul.f32 %v4904_v63, %v6387_v39  ;;  %v2893_v32 = vadd.f32 %v5137_v0, %v2766_v34  ;;  %v6388_v1 = vld [vmem:[#allocation73_spill] sm:$0xff]  ;;  %v3015_v46 = vmax.f32 %v2891_v9, 0.0 }
 0x2d8   :  { %3132 = vst [vmem:[%s6071_s5 + $0x178] sm:$0xff] %v3008_v59  ;;  %v2769_v55 = vmul.f32 %v4904_v63, %v6388_v1  ;;  %v2894_v58 = vadd.f32 %v5137_v0, %v2767_v33  ;;  %v6389_v59 = vld [vmem:[#allocation74_spill] sm:$0xff]  ;;  %v3016_v37 = vmax.f32 %v2892_v51, 0.0 }
 0x2d9   :  { %3133 = vst [vmem:[%s6071_s5 + $0x180] sm:$0xff] %v3009_v13  ;;  %v2770_v39 = vmul.f32 %v4904_v63, %v6389_v59  ;;  %v2895_v34 = vadd.f32 %v5137_v0, %v2768_v56  ;;  %v6390_v13 = vld [vmem:[#allocation75_spill] sm:$0xff]  ;;  %v3017_v9 = vmax.f32 %v2893_v32, 0.0 }
 0x2da   :  { %3134 = vst [vmem:[%s6071_s5 + $0x188] sm:$0xff] %v3010_v17  ;;  %v2771_v1 = vmul.f32 %v4904_v63, %v6390_v13  ;;  %v2896_v33 = vadd.f32 %v5137_v0, %v2769_v55  ;;  %v6391_v17 = vld [vmem:[#allocation76_spill] sm:$0xff]  ;;  %v3018_v13 = vmax.f32 %v2894_v58, 0.0  ;;  %v3024_v55 = vmax.f32 %v5217_v30, 0.0 }
 0x2db   :  { %3135 = vst [vmem:[%s6071_s5 + $0x190] sm:$0xff] %v3011_v45  ;;  %v2772_v59 = vmul.f32 %v4904_v63, %v6391_v17  ;;  %v2897_v56 = vadd.f32 %v5137_v0, %v2770_v39  ;;  %v3025_v58 = vmax.f32 %v5221_v35, 0.0  ;;  %v3027_v39 = vmax.f32 %v5229_v41, 0.0  ;;  %v6395_v17 = vld [vmem:[#allocation10_spill] sm:$0xff] }
 0x2dc   :  { %3136 = vst [vmem:[%s6071_s5 + $0x198] sm:$0xff] %v3012_v21  ;;  %v2898_v45 = vadd.f32 %v5137_v0, %v2771_v1  ;;  %v3019_v21 = vmax.f32 %v2895_v34, 0.0  ;;  %v3020_v63 = vmax.f32 %v2896_v33, 0.0  ;;  %v3028_v30 = vmax.f32 %v5233_v53, 0.0 }
 0x2dd   :  { %3137 = vst [vmem:[%s6071_s5 + $0x1a0] sm:$0xff] %v3013_v14  ;;  %v2899_v51 = vadd.f32 %v5137_v0, %v2772_v59  ;;  %v3021_v32 = vmax.f32 %v2897_v56, 0.0  ;;  %v3029_v35 = vmax.f32 %v5237_v24, 0.0  ;;  %v3031_v41 = vmax.f32 %v5245_v40, 0.0 }
 0x2de   :  { %3138 = vst [vmem:[%s6071_s5 + $0x1a8] sm:$0xff] %v3014_v23  ;;  %v3022_v14 = vmax.f32 %v2898_v45, 0.0  ;;  %v3026_v23 = vmax.f32 %v5225_v49, 0.0  ;;  %v3030_v49 = vmax.f32 %v5241_v5, 0.0  ;;  %v3032_v53 = vmax.f32 %v5249_v43, 0.0 }
 0x2df   :  { %3139 = vst [vmem:[%s6071_s5 + $0x1b0] sm:$0xff] %v3015_v46  ;;  %v3023_v0 = vmax.f32 %v2899_v51, 0.0  ;;  %v3033_v24 = vmax.f32 %v5253_v28, 0.0  ;;  %v3034_v5 = vmax.f32 %v5257_v27, 0.0  ;;  %v3035_v40 = vmax.f32 %v5261_v8, 0.0 }
 0x2e0   :  { %3140 = vst [vmem:[%s6071_s5 + $0x1b8] sm:$0xff] %v3016_v37  ;;  %v3036_v43 = vmax.f32 %v5265_v62, 0.0  ;;  %v3037_v28 = vmax.f32 %v5269_v2, 0.0  ;;  %v3038_v27 = vmax.f32 %v5273_v22, 0.0  ;;  %v3039_v8 = vmax.f32 %v5277_v26, 0.0 }
 0x2e1   :  { %3141 = vst [vmem:[%s6071_s5 + $0x1c0] sm:$0xff] %v3017_v9  ;;  %v3040_v62 = vmax.f32 %v5281_v31, 0.0  ;;  %v3041_v2 = vmax.f32 %v5285_v47, 0.0  ;;  %v3042_v22 = vmax.f32 %v5289_v25, 0.0  ;;  %v3043_v26 = vmax.f32 %v5293_v54, 0.0 }
 0x2e2   :  { %3142 = vst [vmem:[%s6071_s5 + $0x1c8] sm:$0xff] %v3018_v13  ;;  %v3044_v31 = vmax.f32 %v5297_v11, 0.0  ;;  %v3045_v47 = vmax.f32 %v5301_v60, 0.0  ;;  %v3046_v25 = vmax.f32 %v5305_v10, 0.0  ;;  %v3047_v54 = vmax.f32 %v5309_v42, 0.0  ;;  %v6399_v13 = vld [vmem:[#allocation78_spill] sm:$0xff] }
 0x2e3   :  { %3143 = vst [vmem:[%s6071_s5 + $0x1d0] sm:$0xff] %v3019_v21  ;;  %v3048_v11 = vmax.f32 %v5313_v19, 0.0  ;;  %v3049_v60 = vmax.f32 %v5317_v36, 0.0  ;;  %v3050_v10 = vmax.f32 %v5321_v52, 0.0  ;;  %v3051_v42 = vmax.f32 %v5325_v29, 0.0  ;;  %v6400_v21 = vld [vmem:[#allocation79_spill] sm:$0xff] }
 0x2e4   :  { %3144 = vst [vmem:[%s6071_s5 + $0x1d8] sm:$0xff] %v3020_v63  ;;  %v3052_v19 = vmax.f32 %v5329_v7, 0.0  ;;  %v3053_v36 = vmax.f32 %v5333_v16, 0.0  ;;  %v3054_v52 = vmax.f32 %v5337_v15, 0.0  ;;  %v3055_v29 = vmax.f32 %v5341_v50, 0.0 }
 0x2e5   :  { %3145 = vst [vmem:[%s6071_s5 + $0x1e0] sm:$0xff] %v3021_v32  ;;  %v3056_v7 = vmax.f32 %v5345_v6, 0.0  ;;  %v3057_v16 = vmax.f32 %v5349_v61, 0.0  ;;  %v3058_v15 = vmax.f32 %v5353_v48, 0.0  ;;  %v3059_v50 = vmax.f32 %v5357_v4, 0.0  ;;  %v6392_v6 = vld [vmem:[#allocation5_spill] sm:$0xff] }
 0x2e6   :  { %3146 = vst [vmem:[%s6071_s5 + $0x1e8] sm:$0xff] %v3022_v14  ;;  %v3060_v34 = vmax.f32 %v6392_v6, 0.0  ;;  %v6393_v61 = vld [vmem:[#allocation6_spill] sm:$0xff]  ;;  %v6394_v48 = vld [vmem:[#allocation8_spill] sm:$0xff]  ;;  %v3063_v4 = vmax.f32 %v5373_v18, 0.0  ;;  %v3064_v33 = vmax.f32 %v5377_v12, 0.0 }
 0x2e7   :  { %3147 = vst [vmem:[%s6071_s5 + $0x1f0] sm:$0xff] %v3023_v0  ;;  %v3061_v46 = vmax.f32 %v6393_v61, 0.0  ;;  %v3062_v1 = vmax.f32 %v6394_v48, 0.0  ;;  %v3065_v37 = vmax.f32 %v5381_v3, 0.0  ;;  %v3066_v59 = vmax.f32 %v6395_v17, 0.0  ;;  %v6396_v18 = vld [vmem:[#allocation12_spill] sm:$0xff] }
 0x2e8   :  { %3148 = vst [vmem:[%s6071_s5 + $0x1f8] sm:$0xff] %v3024_v55  ;;  %v3067_v56 = vmax.f32 %v6396_v18, 0.0  ;;  %v6397_v12 = vld [vmem:[#allocation17_spill] sm:$0xff]  ;;  %v3070_v51 = vmax.f32 %v6399_v13, 0.0  ;;  %v3071_v63 = vmax.f32 %v6400_v21, 0.0  ;;  %v6401_v32 = vld [vmem:[#allocation80_spill] sm:$0xff] }
 0x2e9   :  { %3149 = vst [vmem:[%s6071_s5 + $0x200] sm:$0xff] %v3025_v58  ;;  %v3068_v9 = vmax.f32 %v6397_v12, 0.0  ;;  %v6398_v3 = vld [vmem:[#allocation77_spill] sm:$0xff]  ;;  %v3072_v14 = vmax.f32 %v6401_v32, 0.0  ;;  %v3073_v0 = vmax.f32 %v5413_v20, 0.0  ;;  %v3074_v55 = vmax.f32 %v5417_v38, 0.0 }
 0x2ea   :  { %3150 = vst [vmem:[%s6071_s5 + $0x208] sm:$0xff] %v3026_v23  ;;  %v3069_v45 = vmax.f32 %v6398_v3, 0.0  ;;  %v3075_v58 = vmax.f32 %v5421_v57, 0.0  ;;  %v3076_v23 = vmax.f32 %v5425_v44, 0.0  ;;  %v6402_v20 = vld [vmem:[#allocation81_spill] sm:$0xff]  ;;  %v6403_v38 = vld [vmem:[#allocation82_spill] sm:$0xff] }
 0x2eb   :  { %3151 = vst [vmem:[%s6071_s5 + $0x210] sm:$0xff] %v3027_v39  ;;  %v3077_v39 = vmax.f32 %v6402_v20, 0.0  ;;  %v6404_v57 = vld [vmem:[#allocation83_spill] sm:$0xff]  ;;  %v6405_v44 = vld [vmem:[#allocation84_spill] sm:$0xff] }
 0x2ec   :  { %3152 = vst [vmem:[%s6071_s5 + $0x218] sm:$0xff] %v3028_v30  ;;  %v3078_v30 = vmax.f32 %v6403_v38, 0.0 }
 0x2ed   :  { %3153 = vst [vmem:[%s6071_s5 + $0x220] sm:$0xff] %v3029_v35  ;;  %v3079_v35 = vmax.f32 %v6404_v57, 0.0 }
 0x2ee   :  { %3154 = vst [vmem:[%s6071_s5 + $0x228] sm:$0xff] %v3030_v49  ;;  %v3080_v49 = vmax.f32 %v6405_v44, 0.0 }
 0x2ef   :  { %3155 = vst [vmem:[%s6071_s5 + $0x230] sm:$0xff] %v3031_v41  ;;  %v6406_v41 = vld [vmem:[#allocation85_spill] sm:$0xff] }
 0x2f0   :  { %3156 = vst [vmem:[%s6071_s5 + $0x238] sm:$0xff] %v3032_v53  ;;  %v3081_v53 = vmax.f32 %v6406_v41, 0.0 }
 0x2f1   :  { %3157 = vst [vmem:[%s6071_s5 + $0x240] sm:$0xff] %v3033_v24  ;;  %v6407_v24 = vld [vmem:[#allocation87_spill] sm:$0xff] }
 0x2f2   :  { %3158 = vst [vmem:[%s6071_s5 + $0x248] sm:$0xff] %v3034_v5  ;;  %v3082_v5 = vmax.f32 %v6407_v24, 0.0 }
 0x2f3   :  { %3159 = vst [vmem:[%s6071_s5 + $0x250] sm:$0xff] %v3035_v40  ;;  %v6408_v40 = vld [vmem:[#allocation86_spill] sm:$0xff] }
 0x2f4   :  { %3160 = vst [vmem:[%s6071_s5 + $0x258] sm:$0xff] %v3036_v43  ;;  %v3083_v43 = vmax.f32 %v6408_v40, 0.0 }
 0x2f5   :  { %3161 = vst [vmem:[%s6071_s5 + $0x260] sm:$0xff] %v3037_v28  ;;  %v6409_v28 = vld [vmem:[#allocation18_spill] sm:$0xff] }
 0x2f6   :  { %3162 = vst [vmem:[%s6071_s5 + $0x268] sm:$0xff] %v3038_v27  ;;  %v3084_v27 = vmax.f32 %v6409_v28, 0.0 }
 0x2f7   :  { %3163 = vst [vmem:[%s6071_s5 + $0x270] sm:$0xff] %v3039_v8 }
 0x2f8   :  { %3164 = vst [vmem:[%s6071_s5 + $0x278] sm:$0xff] %v3040_v62 }
 0x2f9   :  { %3165 = vst [vmem:[%s6071_s5 + $0x280] sm:$0xff] %v3041_v2 }
 0x2fa   :  { %3166 = vst [vmem:[%s6071_s5 + $0x288] sm:$0xff] %v3042_v22 }
 0x2fb   :  { %3167 = vst [vmem:[%s6071_s5 + $0x290] sm:$0xff] %v3043_v26 }
 0x2fc   :  { %3168 = vst [vmem:[%s6071_s5 + $0x298] sm:$0xff] %v3044_v31 }
 0x2fd   :  { %3169 = vst [vmem:[%s6071_s5 + $0x2a0] sm:$0xff] %v3045_v47 }
 0x2fe   :  { %3170 = vst [vmem:[%s6071_s5 + $0x2a8] sm:$0xff] %v3046_v25 }
 0x2ff   :  { %3171 = vst [vmem:[%s6071_s5 + $0x2b0] sm:$0xff] %v3047_v54 }
 0x300   :  { %3172 = vst [vmem:[%s6071_s5 + $0x2b8] sm:$0xff] %v3048_v11 }
 0x301   :  { %3173 = vst [vmem:[%s6071_s5 + $0x2c0] sm:$0xff] %v3049_v60 }
 0x302   :  { %3174 = vst [vmem:[%s6071_s5 + $0x2c8] sm:$0xff] %v3050_v10 }
 0x303   :  { %3175 = vst [vmem:[%s6071_s5 + $0x2d0] sm:$0xff] %v3051_v42 }
 0x304   :  { %3176 = vst [vmem:[%s6071_s5 + $0x2d8] sm:$0xff] %v3052_v19 }
 0x305   :  { %3177 = vst [vmem:[%s6071_s5 + $0x2e0] sm:$0xff] %v3053_v36 }
 0x306   :  { %3178 = vst [vmem:[%s6071_s5 + $0x2e8] sm:$0xff] %v3054_v52 }
 0x307   :  { %3179 = vst [vmem:[%s6071_s5 + $0x2f0] sm:$0xff] %v3055_v29 }
 0x308   :  { %3180 = vst [vmem:[%s6071_s5 + $0x2f8] sm:$0xff] %v3056_v7 }
 0x309   :  { %3181 = vst [vmem:[%s6071_s5 + $0x300] sm:$0xff] %v3057_v16 }
 0x30a   :  { %3182 = vst [vmem:[%s6071_s5 + $0x308] sm:$0xff] %v3058_v15 }
 0x30b   :  { %3183 = vst [vmem:[%s6071_s5 + $0x310] sm:$0xff] %v3059_v50 }
 0x30c   :  { %3184 = vst [vmem:[%s6071_s5 + $0x318] sm:$0xff] %v3060_v34 }
 0x30d   :  { %3185 = vst [vmem:[%s6071_s5 + $0x320] sm:$0xff] %v3061_v46 }
 0x30e   :  { %3186 = vst [vmem:[%s6071_s5 + $0x328] sm:$0xff] %v3062_v1 }
 0x30f   :  { %3187 = vst [vmem:[%s6071_s5 + $0x330] sm:$0xff] %v3063_v4 }
 0x310   :  { %3188 = vst [vmem:[%s6071_s5 + $0x338] sm:$0xff] %v3064_v33 }
 0x311   :  { %3189 = vst [vmem:[%s6071_s5 + $0x340] sm:$0xff] %v3065_v37 }
 0x312   :  { %3190 = vst [vmem:[%s6071_s5 + $0x348] sm:$0xff] %v3066_v59 }
 0x313   :  { %3191 = vst [vmem:[%s6071_s5 + $0x350] sm:$0xff] %v3067_v56 }
 0x314   :  { %3192 = vst [vmem:[%s6071_s5 + $0x358] sm:$0xff] %v3068_v9 }
 0x315   :  { %3193 = vst [vmem:[%s6071_s5 + $0x360] sm:$0xff] %v3069_v45 }
 0x316   :  { %3194 = vst [vmem:[%s6071_s5 + $0x368] sm:$0xff] %v3070_v51 }
 0x317   :  { %3195 = vst [vmem:[%s6071_s5 + $0x370] sm:$0xff] %v3071_v63 }
 0x318   :  { %3196 = vst [vmem:[%s6071_s5 + $0x378] sm:$0xff] %v3072_v14 }
 0x319   :  { %3197 = vst [vmem:[%s6071_s5 + $0x380] sm:$0xff] %v3073_v0 }
 0x31a   :  { %3198 = vst [vmem:[%s6071_s5 + $0x388] sm:$0xff] %v3074_v55 }
 0x31b   :  { %3199 = vst [vmem:[%s6071_s5 + $0x390] sm:$0xff] %v3075_v58 }
 0x31c   :  { %3200 = vst [vmem:[%s6071_s5 + $0x398] sm:$0xff] %v3076_v23 }
 0x31d   :  { %3201 = vst [vmem:[%s6071_s5 + $0x3a0] sm:$0xff] %v3077_v39 }
 0x31e   :  { %3202 = vst [vmem:[%s6071_s5 + $0x3a8] sm:$0xff] %v3078_v30 }
 0x31f   :  { %3203 = vst [vmem:[%s6071_s5 + $0x3b0] sm:$0xff] %v3079_v35 }
 0x320   :  { %3204 = vst [vmem:[%s6071_s5 + $0x3b8] sm:$0xff] %v3080_v49 }
 0x321   :  { %3205 = vst [vmem:[%s6071_s5 + $0x3c0] sm:$0xff] %v3081_v53 }
 0x322   :  { %3206 = vst [vmem:[%s6071_s5 + $0x3c8] sm:$0xff] %v3082_v5 }
 0x323   :  { %3207 = vst [vmem:[%s6071_s5 + $0x3d0] sm:$0xff] %v3083_v43 }
 0x324   :  { %3208 = vst [vmem:[%s6071_s5 + $0x3d8] sm:$0xff] %v3084_v27 }

// kernel: my_model_forward.8
= control target key start
LH: loop header
LB: loop body
LE: loop exit
PB: predicated region body
PF: predicated region fallthrough
CT: control target
= control target key end

     0   :  { %v583_v41 = vmov 0.0   ;;  %v346_v47 = vlaneseq  ;;  %s728_s1 = inlined_call_operand.vmem [shape: bf16[384,128], index: 1, kind: input, shape index: {}]   ;;  %s729_s2 = inlined_call_operand.vmem [shape: f32[1,128], index: 2, kind: input, shape index: {}]   ;;  %s730_s0 = inlined_call_operand.vmem [shape: bf16[24,384], index: 0, kind: input, shape index: {}]   ;;  %s731_s3 = inlined_call_operand.vmem [shape: f32[1,128], index: 3, kind: input, shape index: {}]   ;;  %s732_s4 = inlined_call_operand.vmem [shape: f32[1,128], index: 4, kind: input, shape index: {}]   ;;  %s733_s5 = inlined_call_operand.vmem [shape: f32[24,128], index: 5, kind: output, shape index: {}]  }
   0x1   :  { %v554_v0 = vld [vmem:[%s728_s1 + $0x38] sm:$0xff]  ;;  %v553_v3 = vld [vmem:[%s728_s1 + $0x30] sm:$0xff]  ;;  %v552_v6 = vld [vmem:[%s728_s1 + $0x28] sm:$0xff]  ;;  %24 = vst [vmem:[#allocation2] sm:$0x1] %v583_v41 }
   0x2   :  { %v562_v1 = vld [vmem:[%s728_s1 + $0x78] sm:$0xff]  ;;  %255 = vmatpush.bf16.msra.mxu0 %v554_v0  ;;  %v561_v4 = vld [vmem:[%s728_s1 + $0x70] sm:$0xff]  ;;  %571 = vmatpush.bf16.msra.mxu3 %v554_v0  ;;  %v560_v7 = vld [vmem:[%s728_s1 + $0x68] sm:$0xff]  ;;  %25 = vst [vmem:[#allocation3] sm:$0x1] %v583_v41  ;;  %v347_v50 = vshrl.u32 %v346_v47, 7 }
   0x3   :  { %v570_v2 = vld [vmem:[%s728_s1 + $0xb8] sm:$0xff]  ;;  %273 = vmatpush.bf16.msra.mxu1 %v562_v1  ;;  %v569_v5 = vld [vmem:[%s728_s1 + $0xb0] sm:$0xff]  ;;  %v568_v8 = vld [vmem:[%s728_s1 + $0xa8] sm:$0xff] }
   0x4   :  { %291 = vmatpush.bf16.msra.mxu2 %v570_v2  ;;  %v551_v9 = vld [vmem:[%s728_s1 + $0x20] sm:$0xff]  ;;  %v550_v12 = vld [vmem:[%s728_s1 + $0x18] sm:$0xff]  ;;  %v549_v15 = vld [vmem:[%s728_s1 + $0x10] sm:$0xff]  ;;  %v349_v57 = vadd.s32 16, %v347_v50 }
   0x5   :  { %v559_v10 = vld [vmem:[%s728_s1 + $0x60] sm:$0xff]  ;;  %v558_v13 = vld [vmem:[%s728_s1 + $0x58] sm:$0xff]  ;;  %v557_v16 = vld [vmem:[%s728_s1 + $0x50] sm:$0xff] }
   0x6   :  { %256 = vmatpush.bf16.msra.mxu0 %v553_v3  ;;  %572 = vmatpush.bf16.msra.mxu3 %v553_v3  ;;  %v567_v11 = vld [vmem:[%s728_s1 + $0xa0] sm:$0xff]  ;;  %v566_v14 = vld [vmem:[%s728_s1 + $0x98] sm:$0xff]  ;;  %v565_v17 = vld [vmem:[%s728_s1 + $0x90] sm:$0xff]  ;;  %vm356_vm0 = vcmp.lt.s32.totalorder %v349_v57, 22 }
   0x7   :  { %274 = vmatpush.bf16.msra.mxu1 %v561_v4  ;;  %v548_v18 = vld [vmem:[%s728_s1 + $0x8] sm:$0xff]  ;;  %v30_v21 = vld [vmem:[%s730_s0 + $0x18] sm:$0xff]  ;;  %v547_v22 = vld [vmem:[%s728_s1] sm:$0xff]  ;;  %v543_v0 = vsel %vm356_vm0, 1.0, %v583_v41 }
   0x8   :  { %292 = vmatpush.bf16.msra.mxu2 %v569_v5  ;;  %v556_v19 = vld [vmem:[%s728_s1 + $0x48] sm:$0xff]  ;;  %v555_v23 = vld [vmem:[%s728_s1 + $0x40] sm:$0xff]  ;;  %v439_v27 = vld [vmem:[%s730_s0 + $0xc] sm:$0xf0]  ;;  %v96_v28 = vunpack.c.l.b16 %v30_v21  ;;  %v97_v37 = vunpack.c.h.b16 %v30_v21 }
   0x9   :  { %v564_v20 = vld [vmem:[%s728_s1 + $0x88] sm:$0xff]  ;;  %v437_v24 = vld [vmem:[%s730_s0] sm:$0xf]  ;;  %v544_v26 = vld [vmem:[%s730_s0 + $0x4] sm:$0xf] }
   0xa   :  { %257 = vmatpush.bf16.msra.mxu0 %v552_v6  ;;  %573 = vmatpush.bf16.msra.mxu3 %v552_v6  ;;  %v545_v25 = vld [vmem:[%s730_s0 + $0x8] sm:$0xf0]  ;;  %v563_v29 = vld [vmem:[%s728_s1 + $0x80] sm:$0xff]  ;;  %v445_v30 = vld [vmem:[%s730_s0 + $0x8] sm:$0xf]  ;;  %v442_v33 = vor.u32 %v544_v26, %v439_v27  ;;  %v102_v35 = vpack.c.b16 %v96_v28, %v96_v28  ;;  %v103_v39 = vpack.c.b16 %v97_v37, %v97_v37 }
   0xb   :  { %275 = vmatpush.bf16.msra.mxu1 %v560_v7  ;;  %v546_v31 = vld [vmem:[%s730_s0 + $0x10] sm:$0xf0]  ;;  %v438_v32 = vor.u32 %v545_v25, %v437_v24  ;;  %v31_v36 = vld [vmem:[%s730_s0 + $0x20] sm:$0xf] }
   0xc   :  { %293 = vmatpush.bf16.msra.mxu2 %v568_v8  ;;  %v446_v34 = vor.u32 %v546_v31, %v445_v30  ;;  %v98_v38 = vunpack.c.l.b16 %v31_v36  ;;  %v580_v48 = vld [vmem:[%s729_s2] ss:$0 sm:$0xff]  ;;  %v376_v24 = vld [vmem:[#allocation3] sm:$0x1] }
   0xd   :  { %v366_v21 = vld [vmem:[#allocation2] sm:$0x1] }
   0xe   :  { %258 = vmatpush.bf16.msra.mxu0 %v551_v9  ;;  %574 = vmatpush.bf16.msra.mxu3 %v551_v9  ;;  %v104_v40 = vpack.c.b16 %v98_v38, %v98_v38 }
   0xf   :  { %276 = vmatpush.bf16.msra.mxu1 %v559_v10 }
  0x10   :  { %294 = vmatpush.bf16.msra.mxu2 %v567_v11 }
  0x12   :  { %259 = vmatpush.bf16.msra.mxu0 %v550_v12  ;;  %575 = vmatpush.bf16.msra.mxu3 %v550_v12 }
  0x13   :  { %277 = vmatpush.bf16.msra.mxu1 %v558_v13 }
  0x14   :  { %295 = vmatpush.bf16.msra.mxu2 %v566_v14 }
  0x16   :  { %260 = vmatpush.bf16.msra.mxu0 %v549_v15  ;;  %576 = vmatpush.bf16.msra.mxu3 %v549_v15 }
  0x17   :  { %278 = vmatpush.bf16.msra.mxu1 %v557_v16 }
  0x18   :  { %296 = vmatpush.bf16.msra.mxu2 %v565_v17 }
  0x1a   :  { %261 = vmatpush.bf16.msra.mxu0 %v548_v18  ;;  %577 = vmatpush.bf16.msra.mxu3 %v548_v18 }
  0x1b   :  { %279 = vmatpush.bf16.msra.mxu1 %v556_v19 }
  0x1c   :  { %297 = vmatpush.bf16.msra.mxu2 %v564_v20 }
  0x1e   :  { %262 = vmatpush.bf16.msra.mxu0 %v547_v22  ;;  %578 = vmatpush.bf16.msra.mxu3 %v547_v22 }
  0x1f   :  { %280 = vmatpush.bf16.msra.mxu1 %v555_v23 }
  0x20   :  { %298 = vmatpush.bf16.msra.mxu2 %v563_v29 }
  0x21   :  { %263 = vmatmul.bf16.vlgmr.msra.gmra.mxu0 %v438_v32  ;;  %268 = vmatmul.bf16.vlgmr.msra.gmra.mxu3 %v102_v35 }
  0x22   :  { %281 = vmatmul.bf16.vlgmr.msra.gmra.mxu1 %v442_v33 }
  0x23   :  { %299 = vmatmul.bf16.vlgmr.msra.gmra.mxu2 %v446_v34 }
  0x32   :  { %286 = vmatmul.bf16.gmra.mxu1 %v103_v39  ;;  %v394_v39 = vld [vmem:[%s731_s3] sm:$0x1] }
  0x33   :  { %304 = vmatmul.bf16.gmra.mxu2 %v104_v40 }
  0x9e   :  { %v264_v43 = vpop.f32.mrf.mxu0 }
  0x9f   :  { %v282_v42 = vpop.f32.mrf.mxu1  ;;  %v265_v51 = vadd.f32 %v580_v48, %v264_v43  ;;  %v407_v43 = vld [vmem:[%s732_s4] sm:$0x1] }
  0xa1   :  { %v283_v58 = vadd.f32 %v282_v42, %v265_v51 }
  0xa4   :  { %v269_v45 = vpop.f32.mrf.mxu3 }
  0xa5   :  { %v270_v55 = vadd.f32 %v580_v48, %v269_v45 }
  0xa6   :  { %v300_v44 = vpop.f32.mrf.mxu2  ;;  %v266_v49 = vpop.f32.mrf.mxu0 }
  0xa7   :  { %v284_v46 = vpop.f32.mrf.mxu1  ;;  %v267_v52 = vadd.f32 %v580_v48, %v266_v49  ;;  %v301_v62 = vadd.f32 %v300_v44, %v283_v58 }
  0xa9   :  { %v285_v59 = vadd.f32 %v284_v46, %v267_v52  ;;  %v377_v4 = vmul.f32 %v301_v62, %v301_v62 }
  0xac   :  { %v271_v54 = vpop.f32.mrf.mxu3 }
  0xae   :  { %v302_v53 = vpop.f32.mrf.mxu2 }
  0xaf   :  { %v287_v56 = vpop.f32.mrf.mxu1  ;;  %v303_v60 = vadd.f32 %v302_v53, %v285_v59 }
  0xb0   :  { %v288_v61 = vadd.f32 %v287_v56, %v270_v55 }
  0xb1   :  { %v378_v1 = vmul.f32 %v303_v60, %v303_v60  ;;  %v367_v5 = vadd.f32 %v303_v60, %v301_v62 }
  0xb3   :  { %v380_v7 = vadd.f32 %v378_v1, %v377_v4 }
  0xb6   :  { %v305_v63 = vpop.f32.mrf.mxu2 }
  0xb7   :  { %v306_v2 = vadd.f32 %v305_v63, %v288_v61  ;;  %v289_v3 = vpop.f32.mrf.mxu1 }
  0xb9   :  { %v365_v6 = vmul.f32 %v543_v0, %v306_v2 }
  0xbb   :  { %v368_v8 = vadd.f32 %v367_v5, %v365_v6  ;;  %v379_v9 = vmul.f32 %v365_v6, %v365_v6 }
  0xbd   :  { %v369_v10 = vrot.slane %v368_v8, 4  ;;  %v381_v11 = vadd.f32 %v380_v7, %v379_v9 }
  0xbe   :  { %v307_v12 = vpop.f32.mrf.mxu2 }
  0xbf   :  { %v370_v13 = vadd.f32 %v369_v10, %v368_v8  ;;  %v382_v14 = vrot.slane %v381_v11, 4 }
  0xc1   :  { %v371_v15 = vrot.slane %v370_v13, 2  ;;  %v383_v16 = vadd.f32 %v382_v14, %v381_v11 }
  0xc3   :  { %v372_v17 = vadd.f32 %v371_v15, %v370_v13  ;;  %v384_v18 = vrot.slane %v383_v16, 2 }
  0xc5   :  { %v373_v19 = vrot.slane %v372_v17, 1  ;;  %v385_v20 = vadd.f32 %v384_v18, %v383_v16 }
  0xc7   :  { %v374_v22 = vadd.f32 %v373_v19, %v372_v17  ;;  %v386_v23 = vrot.slane %v385_v20, 1 }
  0xc9   :  { %v375_v25 = vadd.f32 %v374_v22, %v366_v21  ;;  %v387_v26 = vadd.f32 %v386_v23, %v385_v20 }
  0xcb   :  { %v388_v27 = vadd.f32 %v387_v26, %v376_v24  ;;  %v389_v28 = vmul.f32 0.045454547, %v375_v25 }
  0xcd   :  { %v390_v29 = vmul.f32 0.045454547, %v388_v27  ;;  %v391_v30 = vmul.f32 %v389_v28, %v389_v28 }
  0xcf   :  { %v392_v31 = vsub.f32 %v390_v29, %v391_v30 }
  0xd1   :  { %v393_v32 = vmax.f32 %v392_v31, 0.0 }
  0xd3   :  { %v395_v33 = vadd.f32 1e-05, %v393_v32 }
  0xd5   :  { %581 = vrsqrt.f32 %v395_v33  ;;  %vm402_vm2 = vweird.f32 %v395_v33 }
  0xdb   :  { %v582_v34 = vpop.eup %581 }
  0xdc   :  { %v397_v35 = vmul.f32 %v582_v34, %v395_v33  ;;  %vm403_vm1 = vweird.f32 %v582_v34 }
  0xdd   :  { %vm404_vm3 = vmor %vm402_vm2, %vm403_vm1 }
  0xde   :  { %v398_v36 = vmul.f32 %v582_v34, %v397_v35 }
  0xe0   :  { %v399_v37 = vmul.f32 0.5, %v398_v36 }
  0xe2   :  { %v400_v38 = vsub.f32 1.5, %v399_v37 }
  0xe4   :  { %v401_v40 = vmul.f32 %v582_v34, %v400_v38 }
  0xe6   :  { %v405_v41 = vsel %vm404_vm3, %v582_v34, %v401_v40 }
  0xe7   :  { %v406_v42 = vmul.f32 %v405_v41, %v394_v39 }
  0xe9   :  { %v408_v44 = vmul.f32 %v406_v42, %v389_v28  ;;  %v414_v45 = vperm.slane %v406_v42, 0 }
  0xeb   :  { %v409_v46 = vsub.f32 %v407_v43, %v408_v44  ;;  %v416_v47 = vmul.f32 %v414_v45, %v301_v62  ;;  %v417_v48 = vmul.f32 %v414_v45, %v303_v60  ;;  %v418_v49 = vmul.f32 %v414_v45, %v306_v2 }
  0xed   :  { %v420_v50 = vperm.slane %v409_v46, 0 }
  0xef   :  { %v422_v51 = vadd.f32 %v420_v50, %v416_v47  ;;  %v423_v52 = vadd.f32 %v420_v50, %v417_v48  ;;  %v424_v53 = vadd.f32 %v420_v50, %v418_v49 }
  0xf1   :  { %v425_v54 = vmax.f32 %v422_v51, 0.0  ;;  %v426_v55 = vmax.f32 %v423_v52, 0.0  ;;  %v427_v56 = vmax.f32 %v424_v53, 0.0 }
  0xf3   :  { %428 = vst [vmem:[%s733_s5] sm:$0xff] %v425_v54 }
  0xf4   :  { %429 = vst [vmem:[%s733_s5 + $0x8] sm:$0xff] %v426_v55 }
  0xf5   :  { %430 = vst [vmem:[%s733_s5 + $0x10] sm:$0xff] %v427_v56 }

// kernel: my_model_forward.10
= control target key start
LH: loop header
LB: loop body
LE: loop exit
PB: predicated region body
PF: predicated region fallthrough
CT: control target
= control target key end

     0   :  { %v592_v41 = vmov 0.0   ;;  %v349_v47 = vlaneseq  ;;  %s751_s1 = inlined_call_operand.vmem [shape: bf16[384,128], index: 1, kind: input, shape index: {}]   ;;  %s752_s2 = inlined_call_operand.vmem [shape: f32[1,128], index: 2, kind: input, shape index: {}]   ;;  %s753_s0 = inlined_call_operand.vmem [shape: bf16[24,384], index: 0, kind: input, shape index: {}]   ;;  %s754_s3 = inlined_call_operand.vmem [shape: f32[1,128], index: 3, kind: input, shape index: {}]   ;;  %s755_s4 = inlined_call_operand.vmem [shape: f32[1,128], index: 4, kind: input, shape index: {}]   ;;  %s756_s5 = inlined_call_operand.vmem [shape: f32[24,128], index: 5, kind: input, shape index: {}]   ;;  %s757_s6 = inlined_call_operand.vmem [shape: f32[24,128], index: 6, kind: output, shape index: {}]  }
   0x1   :  { %v563_v0 = vld [vmem:[%s751_s1 + $0x38] sm:$0xff]  ;;  %v562_v3 = vld [vmem:[%s751_s1 + $0x30] sm:$0xff]  ;;  %v561_v6 = vld [vmem:[%s751_s1 + $0x28] sm:$0xff]  ;;  %27 = vst [vmem:[#allocation2] sm:$0x1] %v592_v41 }
   0x2   :  { %v571_v1 = vld [vmem:[%s751_s1 + $0x78] sm:$0xff]  ;;  %258 = vmatpush.bf16.msra.mxu0 %v563_v0  ;;  %v570_v4 = vld [vmem:[%s751_s1 + $0x70] sm:$0xff]  ;;  %580 = vmatpush.bf16.msra.mxu3 %v563_v0  ;;  %v569_v7 = vld [vmem:[%s751_s1 + $0x68] sm:$0xff]  ;;  %28 = vst [vmem:[#allocation3] sm:$0x1] %v592_v41  ;;  %v350_v50 = vshrl.u32 %v349_v47, 7 }
   0x3   :  { %v579_v2 = vld [vmem:[%s751_s1 + $0xb8] sm:$0xff]  ;;  %276 = vmatpush.bf16.msra.mxu1 %v571_v1  ;;  %v578_v5 = vld [vmem:[%s751_s1 + $0xb0] sm:$0xff]  ;;  %v577_v8 = vld [vmem:[%s751_s1 + $0xa8] sm:$0xff] }
   0x4   :  { %294 = vmatpush.bf16.msra.mxu2 %v579_v2  ;;  %v560_v9 = vld [vmem:[%s751_s1 + $0x20] sm:$0xff]  ;;  %v559_v12 = vld [vmem:[%s751_s1 + $0x18] sm:$0xff]  ;;  %v558_v15 = vld [vmem:[%s751_s1 + $0x10] sm:$0xff]  ;;  %v352_v57 = vadd.s32 16, %v350_v50 }
   0x5   :  { %v568_v10 = vld [vmem:[%s751_s1 + $0x60] sm:$0xff]  ;;  %v567_v13 = vld [vmem:[%s751_s1 + $0x58] sm:$0xff]  ;;  %v566_v16 = vld [vmem:[%s751_s1 + $0x50] sm:$0xff] }
   0x6   :  { %259 = vmatpush.bf16.msra.mxu0 %v562_v3  ;;  %581 = vmatpush.bf16.msra.mxu3 %v562_v3  ;;  %v576_v11 = vld [vmem:[%s751_s1 + $0xa0] sm:$0xff]  ;;  %v575_v14 = vld [vmem:[%s751_s1 + $0x98] sm:$0xff]  ;;  %v574_v17 = vld [vmem:[%s751_s1 + $0x90] sm:$0xff]  ;;  %vm359_vm0 = vcmp.lt.s32.totalorder %v352_v57, 22 }
   0x7   :  { %277 = vmatpush.bf16.msra.mxu1 %v570_v4  ;;  %v557_v18 = vld [vmem:[%s751_s1 + $0x8] sm:$0xff]  ;;  %v33_v21 = vld [vmem:[%s753_s0 + $0x18] sm:$0xff]  ;;  %v556_v22 = vld [vmem:[%s751_s1] sm:$0xff]  ;;  %v552_v0 = vsel %vm359_vm0, 1.0, %v592_v41 }
   0x8   :  { %295 = vmatpush.bf16.msra.mxu2 %v578_v5  ;;  %v565_v19 = vld [vmem:[%s751_s1 + $0x48] sm:$0xff]  ;;  %v564_v23 = vld [vmem:[%s751_s1 + $0x40] sm:$0xff]  ;;  %v448_v27 = vld [vmem:[%s753_s0 + $0xc] sm:$0xf0]  ;;  %v99_v28 = vunpack.c.l.b16 %v33_v21  ;;  %v100_v37 = vunpack.c.h.b16 %v33_v21 }
   0x9   :  { %v573_v20 = vld [vmem:[%s751_s1 + $0x88] sm:$0xff]  ;;  %v446_v24 = vld [vmem:[%s753_s0] sm:$0xf]  ;;  %v553_v26 = vld [vmem:[%s753_s0 + $0x4] sm:$0xf] }
   0xa   :  { %260 = vmatpush.bf16.msra.mxu0 %v561_v6  ;;  %582 = vmatpush.bf16.msra.mxu3 %v561_v6  ;;  %v554_v25 = vld [vmem:[%s753_s0 + $0x8] sm:$0xf0]  ;;  %v572_v29 = vld [vmem:[%s751_s1 + $0x80] sm:$0xff]  ;;  %v454_v30 = vld [vmem:[%s753_s0 + $0x8] sm:$0xf]  ;;  %v451_v33 = vor.u32 %v553_v26, %v448_v27  ;;  %v105_v35 = vpack.c.b16 %v99_v28, %v99_v28  ;;  %v106_v39 = vpack.c.b16 %v100_v37, %v100_v37 }
   0xb   :  { %278 = vmatpush.bf16.msra.mxu1 %v569_v7  ;;  %v555_v31 = vld [vmem:[%s753_s0 + $0x10] sm:$0xf0]  ;;  %v447_v32 = vor.u32 %v554_v25, %v446_v24  ;;  %v34_v36 = vld [vmem:[%s753_s0 + $0x20] sm:$0xf] }
   0xc   :  { %296 = vmatpush.bf16.msra.mxu2 %v577_v8  ;;  %v455_v34 = vor.u32 %v555_v31, %v454_v30  ;;  %v101_v38 = vunpack.c.l.b16 %v34_v36  ;;  %v589_v48 = vld [vmem:[%s752_s2] ss:$0 sm:$0xff]  ;;  %v379_v24 = vld [vmem:[#allocation3] sm:$0x1] }
   0xd   :  { %v369_v21 = vld [vmem:[#allocation2] sm:$0x1] }
   0xe   :  { %261 = vmatpush.bf16.msra.mxu0 %v560_v9  ;;  %583 = vmatpush.bf16.msra.mxu3 %v560_v9  ;;  %v107_v40 = vpack.c.b16 %v101_v38, %v101_v38 }
   0xf   :  { %279 = vmatpush.bf16.msra.mxu1 %v568_v10 }
  0x10   :  { %297 = vmatpush.bf16.msra.mxu2 %v576_v11 }
  0x12   :  { %262 = vmatpush.bf16.msra.mxu0 %v559_v12  ;;  %584 = vmatpush.bf16.msra.mxu3 %v559_v12 }
  0x13   :  { %280 = vmatpush.bf16.msra.mxu1 %v567_v13 }
  0x14   :  { %298 = vmatpush.bf16.msra.mxu2 %v575_v14 }
  0x16   :  { %263 = vmatpush.bf16.msra.mxu0 %v558_v15  ;;  %585 = vmatpush.bf16.msra.mxu3 %v558_v15 }
  0x17   :  { %281 = vmatpush.bf16.msra.mxu1 %v566_v16 }
  0x18   :  { %299 = vmatpush.bf16.msra.mxu2 %v574_v17 }
  0x1a   :  { %264 = vmatpush.bf16.msra.mxu0 %v557_v18  ;;  %586 = vmatpush.bf16.msra.mxu3 %v557_v18 }
  0x1b   :  { %282 = vmatpush.bf16.msra.mxu1 %v565_v19 }
  0x1c   :  { %300 = vmatpush.bf16.msra.mxu2 %v573_v20 }
  0x1e   :  { %265 = vmatpush.bf16.msra.mxu0 %v556_v22  ;;  %587 = vmatpush.bf16.msra.mxu3 %v556_v22 }
  0x1f   :  { %283 = vmatpush.bf16.msra.mxu1 %v564_v23 }
  0x20   :  { %301 = vmatpush.bf16.msra.mxu2 %v572_v29 }
  0x21   :  { %266 = vmatmul.bf16.vlgmr.msra.gmra.mxu0 %v447_v32  ;;  %271 = vmatmul.bf16.vlgmr.msra.gmra.mxu3 %v105_v35 }
  0x22   :  { %284 = vmatmul.bf16.vlgmr.msra.gmra.mxu1 %v451_v33 }
  0x23   :  { %302 = vmatmul.bf16.vlgmr.msra.gmra.mxu2 %v455_v34 }
  0x32   :  { %289 = vmatmul.bf16.gmra.mxu1 %v106_v39  ;;  %v397_v39 = vld [vmem:[%s754_s3] sm:$0x1] }
  0x33   :  { %307 = vmatmul.bf16.gmra.mxu2 %v107_v40 }
  0x9e   :  { %v267_v43 = vpop.f32.mrf.mxu0 }
  0x9f   :  { %v285_v42 = vpop.f32.mrf.mxu1  ;;  %v268_v51 = vadd.f32 %v589_v48, %v267_v43  ;;  %v410_v43 = vld [vmem:[%s755_s4] sm:$0x1] }
  0xa1   :  { %v286_v58 = vadd.f32 %v285_v42, %v268_v51  ;;  %v428_v51 = vld [vmem:[%s756_s5] sm:$0xff] }
  0xa4   :  { %v272_v45 = vpop.f32.mrf.mxu3 }
  0xa5   :  { %v273_v55 = vadd.f32 %v589_v48, %v272_v45 }
  0xa6   :  { %v303_v44 = vpop.f32.mrf.mxu2  ;;  %v269_v49 = vpop.f32.mrf.mxu0 }
  0xa7   :  { %v287_v46 = vpop.f32.mrf.mxu1  ;;  %v270_v52 = vadd.f32 %v589_v48, %v269_v49  ;;  %v304_v62 = vadd.f32 %v303_v44, %v286_v58 }
  0xa9   :  { %v288_v59 = vadd.f32 %v287_v46, %v270_v52  ;;  %v380_v4 = vmul.f32 %v304_v62, %v304_v62  ;;  %v429_v52 = vld [vmem:[%s756_s5 + $0x8] sm:$0xff] }
  0xac   :  { %v274_v54 = vpop.f32.mrf.mxu3 }
  0xae   :  { %v305_v53 = vpop.f32.mrf.mxu2 }
  0xaf   :  { %v290_v56 = vpop.f32.mrf.mxu1  ;;  %v306_v60 = vadd.f32 %v305_v53, %v288_v59  ;;  %v430_v53 = vld [vmem:[%s756_s5 + $0x10] sm:$0xff] }
  0xb0   :  { %v291_v61 = vadd.f32 %v290_v56, %v273_v55 }
  0xb1   :  { %v381_v1 = vmul.f32 %v306_v60, %v306_v60  ;;  %v370_v5 = vadd.f32 %v306_v60, %v304_v62 }
  0xb3   :  { %v383_v7 = vadd.f32 %v381_v1, %v380_v4 }
  0xb6   :  { %v308_v63 = vpop.f32.mrf.mxu2 }
  0xb7   :  { %v309_v2 = vadd.f32 %v308_v63, %v291_v61  ;;  %v292_v3 = vpop.f32.mrf.mxu1 }
  0xb9   :  { %v368_v6 = vmul.f32 %v552_v0, %v309_v2 }
  0xbb   :  { %v371_v8 = vadd.f32 %v370_v5, %v368_v6  ;;  %v382_v9 = vmul.f32 %v368_v6, %v368_v6 }
  0xbd   :  { %v372_v10 = vrot.slane %v371_v8, 4  ;;  %v384_v11 = vadd.f32 %v383_v7, %v382_v9 }
  0xbe   :  { %v310_v12 = vpop.f32.mrf.mxu2 }
  0xbf   :  { %v373_v13 = vadd.f32 %v372_v10, %v371_v8  ;;  %v385_v14 = vrot.slane %v384_v11, 4 }
  0xc1   :  { %v374_v15 = vrot.slane %v373_v13, 2  ;;  %v386_v16 = vadd.f32 %v385_v14, %v384_v11 }
  0xc3   :  { %v375_v17 = vadd.f32 %v374_v15, %v373_v13  ;;  %v387_v18 = vrot.slane %v386_v16, 2 }
  0xc5   :  { %v376_v19 = vrot.slane %v375_v17, 1  ;;  %v388_v20 = vadd.f32 %v387_v18, %v386_v16 }
  0xc7   :  { %v377_v22 = vadd.f32 %v376_v19, %v375_v17  ;;  %v389_v23 = vrot.slane %v388_v20, 1 }
  0xc9   :  { %v378_v25 = vadd.f32 %v377_v22, %v369_v21  ;;  %v390_v26 = vadd.f32 %v389_v23, %v388_v20 }
  0xcb   :  { %v391_v27 = vadd.f32 %v390_v26, %v379_v24  ;;  %v392_v28 = vmul.f32 0.045454547, %v378_v25 }
  0xcd   :  { %v393_v29 = vmul.f32 0.045454547, %v391_v27  ;;  %v394_v30 = vmul.f32 %v392_v28, %v392_v28 }
  0xcf   :  { %v395_v31 = vsub.f32 %v393_v29, %v394_v30 }
  0xd1   :  { %v396_v32 = vmax.f32 %v395_v31, 0.0 }
  0xd3   :  { %v398_v33 = vadd.f32 1e-05, %v396_v32 }
  0xd5   :  { %590 = vrsqrt.f32 %v398_v33  ;;  %vm405_vm2 = vweird.f32 %v398_v33 }
  0xdb   :  { %v591_v34 = vpop.eup %590 }
  0xdc   :  { %v400_v35 = vmul.f32 %v591_v34, %v398_v33  ;;  %vm406_vm1 = vweird.f32 %v591_v34 }
  0xdd   :  { %vm407_vm3 = vmor %vm405_vm2, %vm406_vm1 }
  0xde   :  { %v401_v36 = vmul.f32 %v591_v34, %v400_v35 }
  0xe0   :  { %v402_v37 = vmul.f32 0.5, %v401_v36 }
  0xe2   :  { %v403_v38 = vsub.f32 1.5, %v402_v37 }
  0xe4   :  { %v404_v40 = vmul.f32 %v591_v34, %v403_v38 }
  0xe6   :  { %v408_v41 = vsel %vm407_vm3, %v591_v34, %v404_v40 }
  0xe7   :  { %v409_v42 = vmul.f32 %v408_v41, %v397_v39 }
  0xe9   :  { %v411_v44 = vmul.f32 %v409_v42, %v392_v28  ;;  %v417_v45 = vperm.slane %v409_v42, 0 }
  0xeb   :  { %v412_v46 = vsub.f32 %v410_v43, %v411_v44  ;;  %v419_v47 = vmul.f32 %v417_v45, %v304_v62  ;;  %v420_v48 = vmul.f32 %v417_v45, %v306_v60  ;;  %v421_v49 = vmul.f32 %v417_v45, %v309_v2 }
  0xed   :  { %v423_v50 = vperm.slane %v412_v46, 0 }
  0xef   :  { %v425_v54 = vadd.f32 %v423_v50, %v419_v47  ;;  %v426_v55 = vadd.f32 %v423_v50, %v420_v48  ;;  %v427_v56 = vadd.f32 %v423_v50, %v421_v49 }
  0xf1   :  { %v431_v57 = vadd.f32 %v428_v51, %v425_v54  ;;  %v432_v58 = vadd.f32 %v429_v52, %v426_v55  ;;  %v433_v59 = vadd.f32 %v430_v53, %v427_v56 }
  0xf3   :  { %v434_v60 = vmax.f32 %v431_v57, 0.0  ;;  %v435_v61 = vmax.f32 %v432_v58, 0.0  ;;  %v436_v62 = vmax.f32 %v433_v59, 0.0 }
  0xf5   :  { %437 = vst [vmem:[%s757_s6] sm:$0xff] %v434_v60 }
  0xf6   :  { %438 = vst [vmem:[%s757_s6 + $0x8] sm:$0xff] %v435_v61 }
  0xf7   :  { %439 = vst [vmem:[%s757_s6 + $0x10] sm:$0xff] %v436_v62 }

// kernel: my_model_forward.11
= control target key start
LH: loop header
LB: loop body
LE: loop exit
PB: predicated region body
PF: predicated region fallthrough
CT: control target
= control target key end

     0   :  { %v489_v32 = vmov 0.0   ;;  %v303_v33 = vlaneseq  ;;  %s610_s1 = inlined_call_operand.vmem [shape: bf16[384,128], index: 1, kind: input, shape index: {}]   ;;  %s611_s2 = inlined_call_operand.vmem [shape: f32[1,128], index: 2, kind: input, shape index: {}]   ;;  %s612_s0 = inlined_call_operand.vmem [shape: bf16[8,384], index: 0, kind: input, shape index: {}]   ;;  %s613_s3 = inlined_call_operand.vmem [shape: f32[1,128], index: 3, kind: input, shape index: {}]   ;;  %s614_s4 = inlined_call_operand.vmem [shape: f32[1,128], index: 4, kind: input, shape index: {}]   ;;  %s615_s5 = inlined_call_operand.vmem [shape: f32[8,128], index: 5, kind: output, shape index: {}]  }
   0x1   :  { %v468_v0 = vld [vmem:[%s610_s1 + $0x38] sm:$0xff]  ;;  %v467_v3 = vld [vmem:[%s610_s1 + $0x30] sm:$0xff]  ;;  %v466_v6 = vld [vmem:[%s610_s1 + $0x28] sm:$0xff]  ;;  %24 = vst [vmem:[#allocation2] sm:$0x1] %v489_v32 }
   0x2   :  { %v476_v1 = vld [vmem:[%s610_s1 + $0x78] sm:$0xff]  ;;  %235 = vmatpush.bf16.msra.mxu0 %v468_v0  ;;  %v475_v4 = vld [vmem:[%s610_s1 + $0x70] sm:$0xff]  ;;  %v474_v7 = vld [vmem:[%s610_s1 + $0x68] sm:$0xff]  ;;  %25 = vst [vmem:[#allocation3] sm:$0x1] %v489_v32  ;;  %v304_v37 = vshrl.u32 %v303_v33, 7 }
   0x3   :  { %v484_v2 = vld [vmem:[%s610_s1 + $0xb8] sm:$0xff]  ;;  %248 = vmatpush.bf16.msra.mxu1 %v476_v1  ;;  %v483_v5 = vld [vmem:[%s610_s1 + $0xb0] sm:$0xff]  ;;  %v482_v8 = vld [vmem:[%s610_s1 + $0xa8] sm:$0xff] }
   0x4   :  { %261 = vmatpush.bf16.msra.mxu2 %v484_v2  ;;  %v465_v9 = vld [vmem:[%s610_s1 + $0x20] sm:$0xff]  ;;  %v464_v12 = vld [vmem:[%s610_s1 + $0x18] sm:$0xff]  ;;  %v463_v15 = vld [vmem:[%s610_s1 + $0x10] sm:$0xff]  ;;  %vm307_vm0 = vcmp.lt.s32.totalorder %v304_v37, 4 }
   0x5   :  { %v473_v10 = vld [vmem:[%s610_s1 + $0x60] sm:$0xff]  ;;  %v472_v13 = vld [vmem:[%s610_s1 + $0x58] sm:$0xff]  ;;  %v471_v16 = vld [vmem:[%s610_s1 + $0x50] sm:$0xff]  ;;  %v460_v41 = vsel %vm307_vm0, 1.0, %v489_v32 }
   0x6   :  { %236 = vmatpush.bf16.msra.mxu0 %v467_v3  ;;  %v481_v11 = vld [vmem:[%s610_s1 + $0xa0] sm:$0xff]  ;;  %v480_v14 = vld [vmem:[%s610_s1 + $0x98] sm:$0xff]  ;;  %v479_v17 = vld [vmem:[%s610_s1 + $0x90] sm:$0xff] }
   0x7   :  { %249 = vmatpush.bf16.msra.mxu1 %v475_v4  ;;  %v462_v18 = vld [vmem:[%s610_s1 + $0x8] sm:$0xff]  ;;  %v26_v20 = vld [vmem:[%s612_s0] sm:$0xff] }
   0x8   :  { %262 = vmatpush.bf16.msra.mxu2 %v483_v5  ;;  %v470_v19 = vld [vmem:[%s610_s1 + $0x48] sm:$0xff]  ;;  %v82_v23 = vunpack.c.l.b16 %v26_v20  ;;  %v83_v24 = vunpack.c.h.b16 %v26_v20  ;;  %v461_v25 = vld [vmem:[%s610_s1] sm:$0xff] }
   0x9   :  { %v478_v21 = vld [vmem:[%s610_s1 + $0x88] sm:$0xff]  ;;  %v469_v26 = vld [vmem:[%s610_s1 + $0x40] sm:$0xff] }
   0xa   :  { %237 = vmatpush.bf16.msra.mxu0 %v466_v6  ;;  %v27_v22 = vld [vmem:[%s612_s0 + $0x8] sm:$0xf]  ;;  %v477_v28 = vld [vmem:[%s610_s1 + $0x80] sm:$0xff]  ;;  %v85_v29 = vpack.c.b16 %v82_v23, %v82_v23  ;;  %v86_v30 = vpack.c.b16 %v83_v24, %v83_v24 }
   0xb   :  { %250 = vmatpush.bf16.msra.mxu1 %v474_v7  ;;  %v84_v27 = vunpack.c.l.b16 %v27_v22  ;;  %v486_v34 = vld [vmem:[%s611_s2] ss:$0 sm:$0xff]  ;;  %v319_v60 = vld [vmem:[#allocation3] sm:$0x1] }
   0xc   :  { %263 = vmatpush.bf16.msra.mxu2 %v482_v8  ;;  %v311_v57 = vld [vmem:[#allocation2] sm:$0x1] }
   0xd   :  { %v87_v31 = vpack.c.b16 %v84_v27, %v84_v27 }
   0xe   :  { %238 = vmatpush.bf16.msra.mxu0 %v465_v9 }
   0xf   :  { %251 = vmatpush.bf16.msra.mxu1 %v473_v10 }
  0x10   :  { %264 = vmatpush.bf16.msra.mxu2 %v481_v11  ;;  %v333_v11 = vld [vmem:[%s613_s3] sm:$0x1] }
  0x12   :  { %239 = vmatpush.bf16.msra.mxu0 %v464_v12 }
  0x13   :  { %252 = vmatpush.bf16.msra.mxu1 %v472_v13 }
  0x14   :  { %265 = vmatpush.bf16.msra.mxu2 %v480_v14 }
  0x16   :  { %240 = vmatpush.bf16.msra.mxu0 %v463_v15  ;;  %v346_v15 = vld [vmem:[%s614_s4] sm:$0x1] }
  0x17   :  { %253 = vmatpush.bf16.msra.mxu1 %v471_v16 }
  0x18   :  { %266 = vmatpush.bf16.msra.mxu2 %v479_v17 }
  0x1a   :  { %241 = vmatpush.bf16.msra.mxu0 %v462_v18 }
  0x1b   :  { %254 = vmatpush.bf16.msra.mxu1 %v470_v19 }
  0x1c   :  { %267 = vmatpush.bf16.msra.mxu2 %v478_v21 }
  0x1e   :  { %242 = vmatpush.bf16.msra.mxu0 %v461_v25 }
  0x1f   :  { %255 = vmatpush.bf16.msra.mxu1 %v469_v26 }
  0x20   :  { %268 = vmatpush.bf16.msra.mxu2 %v477_v28 }
  0x21   :  { %243 = vmatmul.bf16.vlgmr.msra.gmra.mxu0 %v85_v29 }
  0x22   :  { %256 = vmatmul.bf16.vlgmr.msra.gmra.mxu1 %v86_v30 }
  0x23   :  { %269 = vmatmul.bf16.vlgmr.msra.gmra.mxu2 %v87_v31 }
  0x9e   :  { %v244_v35 = vpop.f32.mrf.mxu0 }
  0x9f   :  { %v257_v36 = vpop.f32.mrf.mxu1  ;;  %v245_v38 = vadd.f32 %v486_v34, %v244_v35 }
  0xa1   :  { %v258_v39 = vadd.f32 %v257_v36, %v245_v38 }
  0xa6   :  { %v270_v40 = vpop.f32.mrf.mxu2  ;;  %v246_v43 = vpop.f32.mrf.mxu0 }
  0xa7   :  { %v271_v42 = vadd.f32 %v270_v40, %v258_v39  ;;  %v259_v44 = vpop.f32.mrf.mxu1 }
  0xa9   :  { %v310_v45 = vmul.f32 %v460_v41, %v271_v42 }
  0xab   :  { %v312_v46 = vrot.slane %v310_v45, 4  ;;  %v320_v47 = vmul.f32 %v310_v45, %v310_v45 }
  0xad   :  { %v313_v48 = vadd.f32 %v312_v46, %v310_v45  ;;  %v321_v49 = vrot.slane %v320_v47, 4 }
  0xae   :  { %v272_v50 = vpop.f32.mrf.mxu2 }
  0xaf   :  { %v314_v51 = vrot.slane %v313_v48, 2  ;;  %v322_v52 = vadd.f32 %v321_v49, %v320_v47 }
  0xb1   :  { %v315_v53 = vadd.f32 %v314_v51, %v313_v48  ;;  %v323_v54 = vrot.slane %v322_v52, 2 }
  0xb3   :  { %v316_v55 = vrot.slane %v315_v53, 1  ;;  %v324_v56 = vadd.f32 %v323_v54, %v322_v52 }
  0xb5   :  { %v317_v58 = vadd.f32 %v316_v55, %v315_v53  ;;  %v325_v59 = vrot.slane %v324_v56, 1 }
  0xb7   :  { %v318_v61 = vadd.f32 %v317_v58, %v311_v57  ;;  %v326_v62 = vadd.f32 %v325_v59, %v324_v56 }
  0xb9   :  { %v327_v63 = vadd.f32 %v326_v62, %v319_v60  ;;  %v328_v0 = vmul.f32 0.25, %v318_v61 }
  0xbb   :  { %v329_v1 = vmul.f32 0.25, %v327_v63  ;;  %v330_v2 = vmul.f32 %v328_v0, %v328_v0 }
  0xbd   :  { %v331_v3 = vsub.f32 %v329_v1, %v330_v2 }
  0xbf   :  { %v332_v4 = vmax.f32 %v331_v3, 0.0 }
  0xc1   :  { %v334_v5 = vadd.f32 1e-05, %v332_v4 }
  0xc3   :  { %487 = vrsqrt.f32 %v334_v5  ;;  %vm341_vm2 = vweird.f32 %v334_v5 }
  0xc9   :  { %v488_v6 = vpop.eup %487 }
  0xca   :  { %v336_v7 = vmul.f32 %v488_v6, %v334_v5  ;;  %vm342_vm1 = vweird.f32 %v488_v6 }
  0xcb   :  { %vm343_vm3 = vmor %vm341_vm2, %vm342_vm1 }
  0xcc   :  { %v337_v8 = vmul.f32 %v488_v6, %v336_v7 }
  0xce   :  { %v338_v9 = vmul.f32 0.5, %v337_v8 }
  0xd0   :  { %v339_v10 = vsub.f32 1.5, %v338_v9 }
  0xd2   :  { %v340_v12 = vmul.f32 %v488_v6, %v339_v10 }
  0xd4   :  { %v344_v13 = vsel %vm343_vm3, %v488_v6, %v340_v12 }
  0xd5   :  { %v345_v14 = vmul.f32 %v344_v13, %v333_v11 }
  0xd7   :  { %v347_v16 = vmul.f32 %v345_v14, %v328_v0  ;;  %v351_v17 = vperm.slane %v345_v14, 0 }
  0xd9   :  { %v348_v18 = vsub.f32 %v346_v15, %v347_v16  ;;  %v353_v19 = vmul.f32 %v351_v17, %v271_v42 }
  0xdb   :  { %v355_v20 = vperm.slane %v348_v18, 0 }
  0xdd   :  { %v357_v21 = vadd.f32 %v355_v20, %v353_v19 }
  0xdf   :  { %v358_v22 = vmax.f32 %v357_v21, 0.0 }
  0xe1   :  { %359 = vst [vmem:[%s615_s5] sm:$0xff] %v358_v22 }

// kernel: my_model_forward.13
= control target key start
LH: loop header
LB: loop body
LE: loop exit
PB: predicated region body
PF: predicated region fallthrough
CT: control target
= control target key end

     0   :  { %v494_v32 = vmov 0.0   ;;  %v306_v33 = vlaneseq  ;;  %s623_s1 = inlined_call_operand.vmem [shape: bf16[384,128], index: 1, kind: input, shape index: {}]   ;;  %s624_s2 = inlined_call_operand.vmem [shape: f32[1,128], index: 2, kind: input, shape index: {}]   ;;  %s625_s0 = inlined_call_operand.vmem [shape: bf16[8,384], index: 0, kind: input, shape index: {}]   ;;  %s626_s3 = inlined_call_operand.vmem [shape: f32[1,128], index: 3, kind: input, shape index: {}]   ;;  %s627_s4 = inlined_call_operand.vmem [shape: f32[1,128], index: 4, kind: input, shape index: {}]   ;;  %s628_s5 = inlined_call_operand.vmem [shape: f32[8,128], index: 5, kind: input, shape index: {}]   ;;  %s629_s6 = inlined_call_operand.vmem [shape: f32[8,128], index: 6, kind: output, shape index: {}]  }
   0x1   :  { %v473_v0 = vld [vmem:[%s623_s1 + $0x38] sm:$0xff]  ;;  %v472_v3 = vld [vmem:[%s623_s1 + $0x30] sm:$0xff]  ;;  %v471_v6 = vld [vmem:[%s623_s1 + $0x28] sm:$0xff]  ;;  %27 = vst [vmem:[#allocation2] sm:$0x1] %v494_v32 }
   0x2   :  { %v481_v1 = vld [vmem:[%s623_s1 + $0x78] sm:$0xff]  ;;  %238 = vmatpush.bf16.msra.mxu0 %v473_v0  ;;  %v480_v4 = vld [vmem:[%s623_s1 + $0x70] sm:$0xff]  ;;  %v479_v7 = vld [vmem:[%s623_s1 + $0x68] sm:$0xff]  ;;  %28 = vst [vmem:[#allocation3] sm:$0x1] %v494_v32  ;;  %v307_v37 = vshrl.u32 %v306_v33, 7 }
   0x3   :  { %v489_v2 = vld [vmem:[%s623_s1 + $0xb8] sm:$0xff]  ;;  %251 = vmatpush.bf16.msra.mxu1 %v481_v1  ;;  %v488_v5 = vld [vmem:[%s623_s1 + $0xb0] sm:$0xff]  ;;  %v487_v8 = vld [vmem:[%s623_s1 + $0xa8] sm:$0xff] }
   0x4   :  { %264 = vmatpush.bf16.msra.mxu2 %v489_v2  ;;  %v470_v9 = vld [vmem:[%s623_s1 + $0x20] sm:$0xff]  ;;  %v469_v12 = vld [vmem:[%s623_s1 + $0x18] sm:$0xff]  ;;  %v468_v15 = vld [vmem:[%s623_s1 + $0x10] sm:$0xff]  ;;  %vm310_vm0 = vcmp.lt.s32.totalorder %v307_v37, 4 }
   0x5   :  { %v478_v10 = vld [vmem:[%s623_s1 + $0x60] sm:$0xff]  ;;  %v477_v13 = vld [vmem:[%s623_s1 + $0x58] sm:$0xff]  ;;  %v476_v16 = vld [vmem:[%s623_s1 + $0x50] sm:$0xff]  ;;  %v465_v41 = vsel %vm310_vm0, 1.0, %v494_v32 }
   0x6   :  { %239 = vmatpush.bf16.msra.mxu0 %v472_v3  ;;  %v486_v11 = vld [vmem:[%s623_s1 + $0xa0] sm:$0xff]  ;;  %v485_v14 = vld [vmem:[%s623_s1 + $0x98] sm:$0xff]  ;;  %v484_v17 = vld [vmem:[%s623_s1 + $0x90] sm:$0xff] }
   0x7   :  { %252 = vmatpush.bf16.msra.mxu1 %v480_v4  ;;  %v467_v18 = vld [vmem:[%s623_s1 + $0x8] sm:$0xff]  ;;  %v29_v20 = vld [vmem:[%s625_s0] sm:$0xff] }
   0x8   :  { %265 = vmatpush.bf16.msra.mxu2 %v488_v5  ;;  %v475_v19 = vld [vmem:[%s623_s1 + $0x48] sm:$0xff]  ;;  %v85_v23 = vunpack.c.l.b16 %v29_v20  ;;  %v86_v24 = vunpack.c.h.b16 %v29_v20  ;;  %v466_v25 = vld [vmem:[%s623_s1] sm:$0xff] }
   0x9   :  { %v483_v21 = vld [vmem:[%s623_s1 + $0x88] sm:$0xff]  ;;  %v474_v26 = vld [vmem:[%s623_s1 + $0x40] sm:$0xff] }
   0xa   :  { %240 = vmatpush.bf16.msra.mxu0 %v471_v6  ;;  %v30_v22 = vld [vmem:[%s625_s0 + $0x8] sm:$0xf]  ;;  %v482_v28 = vld [vmem:[%s623_s1 + $0x80] sm:$0xff]  ;;  %v88_v29 = vpack.c.b16 %v85_v23, %v85_v23  ;;  %v89_v30 = vpack.c.b16 %v86_v24, %v86_v24 }
   0xb   :  { %253 = vmatpush.bf16.msra.mxu1 %v479_v7  ;;  %v87_v27 = vunpack.c.l.b16 %v30_v22  ;;  %v491_v34 = vld [vmem:[%s624_s2] ss:$0 sm:$0xff]  ;;  %v322_v60 = vld [vmem:[#allocation3] sm:$0x1] }
   0xc   :  { %266 = vmatpush.bf16.msra.mxu2 %v487_v8  ;;  %v314_v57 = vld [vmem:[#allocation2] sm:$0x1] }
   0xd   :  { %v90_v31 = vpack.c.b16 %v87_v27, %v87_v27 }
   0xe   :  { %241 = vmatpush.bf16.msra.mxu0 %v470_v9 }
   0xf   :  { %254 = vmatpush.bf16.msra.mxu1 %v478_v10 }
  0x10   :  { %267 = vmatpush.bf16.msra.mxu2 %v486_v11  ;;  %v336_v11 = vld [vmem:[%s626_s3] sm:$0x1] }
  0x12   :  { %242 = vmatpush.bf16.msra.mxu0 %v469_v12 }
  0x13   :  { %255 = vmatpush.bf16.msra.mxu1 %v477_v13 }
  0x14   :  { %268 = vmatpush.bf16.msra.mxu2 %v485_v14 }
  0x16   :  { %243 = vmatpush.bf16.msra.mxu0 %v468_v15  ;;  %v349_v15 = vld [vmem:[%s627_s4] sm:$0x1] }
  0x17   :  { %256 = vmatpush.bf16.msra.mxu1 %v476_v16 }
  0x18   :  { %269 = vmatpush.bf16.msra.mxu2 %v484_v17 }
  0x1a   :  { %244 = vmatpush.bf16.msra.mxu0 %v467_v18 }
  0x1b   :  { %257 = vmatpush.bf16.msra.mxu1 %v475_v19 }
  0x1c   :  { %270 = vmatpush.bf16.msra.mxu2 %v483_v21  ;;  %v361_v21 = vld [vmem:[%s628_s5] sm:$0xff] }
  0x1e   :  { %245 = vmatpush.bf16.msra.mxu0 %v466_v25 }
  0x1f   :  { %258 = vmatpush.bf16.msra.mxu1 %v474_v26 }
  0x20   :  { %271 = vmatpush.bf16.msra.mxu2 %v482_v28 }
  0x21   :  { %246 = vmatmul.bf16.vlgmr.msra.gmra.mxu0 %v88_v29 }
  0x22   :  { %259 = vmatmul.bf16.vlgmr.msra.gmra.mxu1 %v89_v30 }
  0x23   :  { %272 = vmatmul.bf16.vlgmr.msra.gmra.mxu2 %v90_v31 }
  0x9e   :  { %v247_v35 = vpop.f32.mrf.mxu0 }
  0x9f   :  { %v260_v36 = vpop.f32.mrf.mxu1  ;;  %v248_v38 = vadd.f32 %v491_v34, %v247_v35 }
  0xa1   :  { %v261_v39 = vadd.f32 %v260_v36, %v248_v38 }
  0xa6   :  { %v273_v40 = vpop.f32.mrf.mxu2  ;;  %v249_v43 = vpop.f32.mrf.mxu0 }
  0xa7   :  { %v274_v42 = vadd.f32 %v273_v40, %v261_v39  ;;  %v262_v44 = vpop.f32.mrf.mxu1 }
  0xa9   :  { %v313_v45 = vmul.f32 %v465_v41, %v274_v42 }
  0xab   :  { %v315_v46 = vrot.slane %v313_v45, 4  ;;  %v323_v47 = vmul.f32 %v313_v45, %v313_v45 }
  0xad   :  { %v316_v48 = vadd.f32 %v315_v46, %v313_v45  ;;  %v324_v49 = vrot.slane %v323_v47, 4 }
  0xae   :  { %v275_v50 = vpop.f32.mrf.mxu2 }
  0xaf   :  { %v317_v51 = vrot.slane %v316_v48, 2  ;;  %v325_v52 = vadd.f32 %v324_v49, %v323_v47 }
  0xb1   :  { %v318_v53 = vadd.f32 %v317_v51, %v316_v48  ;;  %v326_v54 = vrot.slane %v325_v52, 2 }
  0xb3   :  { %v319_v55 = vrot.slane %v318_v53, 1  ;;  %v327_v56 = vadd.f32 %v326_v54, %v325_v52 }
  0xb5   :  { %v320_v58 = vadd.f32 %v319_v55, %v318_v53  ;;  %v328_v59 = vrot.slane %v327_v56, 1 }
  0xb7   :  { %v321_v61 = vadd.f32 %v320_v58, %v314_v57  ;;  %v329_v62 = vadd.f32 %v328_v59, %v327_v56 }
  0xb9   :  { %v330_v63 = vadd.f32 %v329_v62, %v322_v60  ;;  %v331_v0 = vmul.f32 0.25, %v321_v61 }
  0xbb   :  { %v332_v1 = vmul.f32 0.25, %v330_v63  ;;  %v333_v2 = vmul.f32 %v331_v0, %v331_v0 }
  0xbd   :  { %v334_v3 = vsub.f32 %v332_v1, %v333_v2 }
  0xbf   :  { %v335_v4 = vmax.f32 %v334_v3, 0.0 }
  0xc1   :  { %v337_v5 = vadd.f32 1e-05, %v335_v4 }
  0xc3   :  { %492 = vrsqrt.f32 %v337_v5  ;;  %vm344_vm2 = vweird.f32 %v337_v5 }
  0xc9   :  { %v493_v6 = vpop.eup %492 }
  0xca   :  { %v339_v7 = vmul.f32 %v493_v6, %v337_v5  ;;  %vm345_vm1 = vweird.f32 %v493_v6 }
  0xcb   :  { %vm346_vm3 = vmor %vm344_vm2, %vm345_vm1 }
  0xcc   :  { %v340_v8 = vmul.f32 %v493_v6, %v339_v7 }
  0xce   :  { %v341_v9 = vmul.f32 0.5, %v340_v8 }
  0xd0   :  { %v342_v10 = vsub.f32 1.5, %v341_v9 }
  0xd2   :  { %v343_v12 = vmul.f32 %v493_v6, %v342_v10 }
  0xd4   :  { %v347_v13 = vsel %vm346_vm3, %v493_v6, %v343_v12 }
  0xd5   :  { %v348_v14 = vmul.f32 %v347_v13, %v336_v11 }
  0xd7   :  { %v350_v16 = vmul.f32 %v348_v14, %v331_v0  ;;  %v354_v17 = vperm.slane %v348_v14, 0 }
  0xd9   :  { %v351_v18 = vsub.f32 %v349_v15, %v350_v16  ;;  %v356_v19 = vmul.f32 %v354_v17, %v274_v42 }
  0xdb   :  { %v358_v20 = vperm.slane %v351_v18, 0 }
  0xdd   :  { %v360_v22 = vadd.f32 %v358_v20, %v356_v19 }
  0xdf   :  { %v362_v23 = vadd.f32 %v361_v21, %v360_v22 }
  0xe1   :  { %v363_v24 = vmax.f32 %v362_v23, 0.0 }
  0xe3   :  { %364 = vst [vmem:[%s629_s6] sm:$0xff] %v363_v24 }

</bundles_post_ra>
